<compile_context>
chip_gen: v5e
topology: v5e:2x2
jax: 0.10.0
libtpu: 0.0.40
codegen_flags: <defaults>
</compile_context>

<pallas_src>
import functools

import jax
import jax.numpy as jnp
from jax import lax
from jax.experimental import pallas as pl
from jax.experimental.pallas import tpu as pltpu


# ----------------------------------------------------------------------------
# Pallas kernel: whole IRBlock forward for one batch element per grid step.
# Layout: channels on sublanes, flattened zero-padded spatial map on lanes.
#   LS = source width  (halo slack G on both sides of the LO-wide working grid)
#   LO = working width (padded H+2 x W+2 grid, rounded up to a multiple of 128)
# ----------------------------------------------------------------------------
def _ir_block_kernel(
    x_ref,       # (1, C, LS) f32   zero-padded flat input (also residual source)
    mask_ref,    # (1, LO)    f32   1.0 at valid (interior) padded positions
    w1_ref,      # (C, 9C)    bf16  conv1 weights with bn0-scale and bn1 folded
    b1m_ref,     # (C, LO)    f32   conv1 bias map (bn0-bias/pad interaction + b1 + bn1)
    pa_ref,      # (1, 1)     f32   shared PReLU slope
    w2_ref,      # (P, 9C)    bf16  conv2 weights with bn2 folded
    b2_ref,      # (P, 1)     f32   conv2 bias column (b2 + bn2)
    f1w_ref,     # (P, R)     f32   SE fc1 weight
    f1b_ref,     # (1, R)     f32   SE fc1 bias
    sea_ref,     # (1, 1)     f32   SE PReLU slope
    f2wt_ref,    # (P, R)     f32   SE fc2 weight (transposed)
    f2b_ref,     # (P, 1)     f32   SE fc2 bias (column)
    o_ref,       # (1, P, LO) f32   output on the padded working grid
    col_ref,     # VMEM (9C, LO) bf16   im2col buffer (channels-outer, K on sublanes)
    src_ref,     # VMEM (C,  LS) bf16   staged conv1 output (source for conv2)
    *, wp, inv_hw,
):
    C = src_ref.shape[0]
    LS = src_ref.shape[1]
    LO = o_ref.shape[2]
    G = (LS - LO) // 2                       # halo slack each side (= wp + 1)

    # Static lane offsets of the 9 conv taps on the flattened padded grid.
    starts = [G + (dy - 1) * wp + (dx - 1) for dy in range(3) for dx in range(3)]

    mask = mask_ref[...]                     # (1, LO)
    a = pa_ref[...]                          # (1, 1) shared PReLU slope

    # ---- conv1 (+ folded bn0/bn1): im2col via shifted lane-window reads ------
    # Stores into col are full-width, lane-dense, sublane-aligned (t*C % 8 == 0).
    for t, st in enumerate(starts):
        col_ref[t * C:(t + 1) * C, :] = x_ref[0, :, st:st + LO].astype(col_ref.dtype)
    out1 = jnp.dot(w1_ref[...], col_ref[...], preferred_element_type=jnp.float32)
    out1 = out1 + b1m_ref[...]
    out1 = jnp.where(out1 > 0, out1, a * out1) * mask        # PReLU, zero halo

    # ---- stage out1 (bf16, zero-flanked) as the conv2 tap source -------------
    src_ref[:, 0:G] = jnp.zeros((C, G), src_ref.dtype)
    src_ref[:, G + LO:LS] = jnp.zeros((C, LS - G - LO), src_ref.dtype)
    src_ref[:, G:G + LO] = out1.astype(src_ref.dtype)

    # ---- conv2 (+ folded bn2) -------------------------------------------------
    for t, st in enumerate(starts):
        col_ref[t * C:(t + 1) * C, :] = src_ref[:, st:st + LO]
    out2 = jnp.dot(w2_ref[...], col_ref[...], preferred_element_type=jnp.float32)
    out2 = (out2 + b2_ref[...]) * mask

    # ---- SE: avg pool -> fc1 -> PReLU -> fc2 -> sigmoid (VPU/XLU/EUP only) ---
    y = jnp.sum(out2, axis=1, keepdims=True) * inv_hw                       # (P, 1)
    h = jnp.sum(y * f1w_ref[...], axis=0, keepdims=True) + f1b_ref[...]     # (1, R)
    a_se = sea_ref[...]
    h = jnp.where(h > 0, h, a_se * h)
    s = jnp.sum(h * f2wt_ref[...], axis=1, keepdims=True) + f2b_ref[...]    # (P, 1)
    s = pl.reciprocal(1.0 + jnp.exp(-s), approx=True)                       # sigmoid
    out2 = out2 * s

    # ---- residual (x re-read here -> low vreg pressure) + shared PReLU -------
    out = out2 + x_ref[0, :, G:G + LO]
    out = jnp.where(out > 0, out, a * out)
    o_ref[0] = out.astype(o_ref.dtype)


def _const_spec(shape):
    nd = len(shape)
    return pl.BlockSpec(shape, lambda b, _nd=nd: (0,) * _nd)


# ----------------------------------------------------------------------------
# Wrapper: NCHW in / NCHW out, one grid step per batch element.
# ----------------------------------------------------------------------------
@jax.jit
def ir_block(x_nchw, params):
    B, C, H, W = x_nchw.shape
    P = params["w2"].shape[2]
    Hp, Wp = H + 2, W + 2
    Np = Hp * Wp                               # flattened padded spatial size
    G = Wp + 1                                 # max |tap offset| on the flat grid
    LO = ((Np + 127) // 128) * 128             # lane-dense working width
    LS = G + LO + G                            # source width incl. halo slack

    s0 = params["bn0_scale"].reshape(C)
    b0 = params["bn0_bias"].reshape(C)
    s1 = params["bn1_scale"].reshape(C)
    bb1 = params["bn1_bias"].reshape(C)
    s2 = params["bn2_scale"].reshape(P)
    bb2 = params["bn2_bias"].reshape(P)
    w1 = params["w1"]                          # (9, Cin, Cout) taps row-major
    w2 = params["w2"]                          # (9, Cin, Cout)

    # conv1: fold bn0 (per-input-channel scale) and bn1 (per-output affine).
    w1_eff = jnp.transpose(w1 * s0[None, :, None] * s1[None, None, :],
                           (2, 0, 1)).reshape(C, 9 * C).astype(jnp.bfloat16)
    # bn0's bias interacts with the zero padding:
    #   conv1(pad0(bn0(x))) = conv_{w1*s0}(pad0(x)) + conv1_SAME(const image b0)
    # The second term is a param-only (Cout,H,W) bias map, computed here exactly.
    b0_img = jnp.broadcast_to(b0[None, None, None, :], (1, H, W, C))
    b0_conv = lax.conv_general_dilated(
        b0_img, w1.reshape(3, 3, C, C), (1, 1), "SAME",
        dimension_numbers=("NHWC", "HWIO", "NHWC"))[0]          # (H, W, Cout)
    b1_map = (s1[None, None, :] * (b0_conv + params["b1"].reshape(C)[None, None, :])
              + bb1[None, None, :])
    b1_map = jnp.transpose(b1_map, (2, 0, 1))                   # (Cout, H, W)
    b1_map = jnp.pad(b1_map, ((0, 0), (1, 1), (1, 1))).reshape(C, Np)
    b1_map = jnp.pad(b1_map, ((0, 0), (0, LO - Np)))            # (Cout, LO)

    # conv2: fold bn2 (out1's zero padding is genuine -> bias stays constant).
    w2_eff = jnp.transpose(w2 * s2[None, None, :],
                           (2, 0, 1)).reshape(P, 9 * C).astype(jnp.bfloat16)
    b2_col = (s2 * params["b2"].reshape(P) + bb2).reshape(P, 1)

    f1w = params["fc1_w"]                      # (P, R)
    f1b = params["fc1_b"]                      # (1, R)
    f2wt = jnp.transpose(params["fc2_w"])      # (P, R)
    f2b = params["fc2_b"].reshape(P, 1)        # (P, 1)

    # Zero-padded, flattened NCHW input (channels stay on sublanes; no
    # NCHW<->NHWC transposes anywhere in the wrapper).
    xp = jnp.pad(x_nchw.astype(jnp.float32),
                 ((0, 0), (0, 0), (1, 1), (1, 1))).reshape(B, C, Np)
    x_in = jnp.pad(xp, ((0, 0), (0, 0), (G, LS - G - Np)))      # (B, C, LS)

    # Interior (valid-pixel) mask on the padded working grid.
    pos = jnp.arange(LO)
    r, c = pos // Wp, pos % Wp
    mask = ((pos < Np) & (r >= 1) & (r <= H) & (c >= 1) & (c <= W))
    mask = mask.astype(jnp.float32).reshape(1, LO)

    kernel = functools.partial(_ir_block_kernel, wp=Wp, inv_hw=1.0 / (H * W))

    param_list = [mask, w1_eff, b1_map, params["prelu_a"], w2_eff, b2_col,
                  f1w, f1b, params["se_prelu_a"], f2wt, f2b]
    in_specs = [pl.BlockSpec((1, C, LS), lambda b: (b, 0, 0))]
    in_specs += [_const_spec(p.shape) for p in param_list]

    out_p = pl.pallas_call(
        kernel,
        out_shape=jax.ShapeDtypeStruct((B, P, LO), jnp.float32),
        grid_spec=pltpu.PrefetchScalarGridSpec(
            num_scalar_prefetch=0,
            grid=(B,),
            in_specs=in_specs,
            out_specs=pl.BlockSpec((1, P, LO), lambda b: (b, 0, 0)),
            scratch_shapes=[
                pltpu.VMEM((9 * C, LO), jnp.bfloat16),   # im2col (channels-outer)
                pltpu.VMEM((C, LS), jnp.bfloat16),       # staged conv1 output
            ],
        ),
        compiler_params=pltpu.CompilerParams(
            dimension_semantics=("parallel",),
            # Actual footprint (col + src + double-buffered I/O + params) is
            # well under 1 MiB at these shapes; request a small explicit budget
            # so the same structure also fits v7x's 64 MiB VMEM when scaled.
            vmem_limit_bytes=8 * 1024 * 1024,
        ),
    )(x_in, *param_list)

    # Drop the padded-grid halo (pure slice; NCHW layout preserved end-to-end).
    return out_p[:, :, :Np].reshape(B, P, Hp, Wp)[:, :, 1:H + 1, 1:W + 1]


# ----------------------------------------------------------------------------
# Deterministic parameter construction (synthetic; mirrors module shapes).
# ----------------------------------------------------------------------------
def make_params(key, inplanes, planes, reduction=16):
    assert inplanes == planes, "stride=1 / no downsample configuration"
    C, P, R = inplanes, planes, planes // reduction
    eps = 1e-5
    ks = jax.random.split(key, 16)

    def bn_fold(k, c):
        kw, kb, km, kv = jax.random.split(k, 4)
        w = 1.0 + 0.1 * jax.random.normal(kw, (c,), jnp.float32)
        b = 0.1 * jax.random.normal(kb, (c,), jnp.float32)
        mean = 0.1 * jax.random.normal(km, (c,), jnp.float32)
        var = 0.5 + jnp.abs(jax.random.normal(kv, (c,), jnp.float32))
        scale = w / jnp.sqrt(var + eps)
        bias = b - mean * scale
        return scale.reshape(1, c), bias.reshape(1, c)

    bn0s, bn0b = bn_fold(ks[0], C)
    bn1s, bn1b = bn_fold(ks[1], C)
    bn2s, bn2b = bn_fold(ks[2], P)

    # conv weights stored as (9, Cin, Cout) == HWIO taps flattened row-major
    w1 = 0.1 * jax.random.normal(ks[3], (9, C, C), jnp.float32)
    b1 = 0.1 * jax.random.normal(ks[4], (1, C), jnp.float32)
    w2 = 0.1 * jax.random.normal(ks[5], (9, C, P), jnp.float32)
    b2 = 0.1 * jax.random.normal(ks[6], (1, P), jnp.float32)

    fc1_w = 0.2 * jax.random.normal(ks[7], (P, R), jnp.float32)   # (in, out)
    fc1_b = 0.1 * jax.random.normal(ks[8], (1, R), jnp.float32)
    fc2_w = 0.2 * jax.random.normal(ks[9], (R, P), jnp.float32)
    fc2_b = 0.1 * jax.random.normal(ks[10], (1, P), jnp.float32)

    return {
        "bn0_scale": bn0s, "bn0_bias": bn0b,
        "w1": w1, "b1": b1,
        "bn1_scale": bn1s, "bn1_bias": bn1b,
        "prelu_a": jnp.full((1, 1), 0.25, jnp.float32),           # nn.PReLU() default
        "w2": w2, "b2": b2,
        "bn2_scale": bn2s, "bn2_bias": bn2b,
        "fc1_w": fc1_w, "fc1_b": fc1_b,
        "se_prelu_a": jnp.full((1, 1), 0.25, jnp.float32),
        "fc2_w": fc2_w, "fc2_b": fc2_b,
    }


# ----------------------------------------------------------------------------
# Pure-JAX reference (for correctness check).
# ----------------------------------------------------------------------------
def ref_forward(x_nchw, p):
    x = jnp.transpose(x_nchw, (0, 2, 3, 1)).astype(jnp.float32)   # NHWC

    def bn(t, s, b):
        return t * s.reshape(1, 1, 1, -1) + b.reshape(1, 1, 1, -1)

    def conv(t, w9, bias):
        cin, cout = w9.shape[1], w9.shape[2]
        w = w9.reshape(3, 3, cin, cout)
        y = lax.conv_general_dilated(
            t, w, (1, 1), "SAME",
            dimension_numbers=("NHWC", "HWIO", "NHWC"))
        return y + bias.reshape(1, 1, 1, -1)

    def prelu(t, a):
        return jnp.where(t > 0, t, a * t)

    a = p["prelu_a"][0, 0]
    a_se = p["se_prelu_a"][0, 0]

    out = bn(x, p["bn0_scale"], p["bn0_bias"])
    out = conv(out, p["w1"], p["b1"])
    out = bn(out, p["bn1_scale"], p["bn1_bias"])
    out = prelu(out, a)
    out = conv(out, p["w2"], p["b2"])
    out = bn(out, p["bn2_scale"], p["bn2_bias"])

    y = jnp.mean(out, axis=(1, 2))                                 # (B, P)
    h = prelu(y @ p["fc1_w"] + p["fc1_b"], a_se)
    s = jax.nn.sigmoid(h @ p["fc2_w"] + p["fc2_b"])
    out = out * s[:, None, None, :]

    out = out + x
    out = prelu(out, a)
    return jnp.transpose(out, (0, 3, 1, 2))


if __name__ == "__main__":
    B, C, H, W = 2, 32, 16, 16          # inplanes = planes = 32, stride = 1
    key = jax.random.PRNGKey(0)
    kx, kp = jax.random.split(key)
    x = jax.random.normal(kx, (B, C, H, W), jnp.float32)
    params = make_params(kp, C, C, reduction=16)

    out = jax.block_until_ready(ir_block(x, params))
    ref = jax.block_until_ready(ref_forward(x, params))

    assert out.shape == (B, C, H, W)
    err = float(jnp.max(jnp.abs(out - ref)))
    scale = float(jnp.max(jnp.abs(ref)))
    # bf16 MXU operands with f32 accumulation: allow ~1-3% relative error.
    assert err < 3e-2 * max(1.0, scale), (
        f"mismatch vs reference: max abs err {err}, ref max {scale}")

    print("KERNEL_OK")
</pallas_src>

<mosaic_0001>
module attributes {stable_mosaic.version = 11 : i64} {
  func.func @_ir_block_kernel(%arg0: i32, %arg1: memref<1x32x422xf32, #tpu.memory_space<vmem>>, %arg2: memref<1x384xf32, #tpu.memory_space<vmem>>, %arg3: memref<32x288xbf16, #tpu.memory_space<vmem>>, %arg4: memref<32x384xf32, #tpu.memory_space<vmem>>, %arg5: memref<1x1xf32, #tpu.memory_space<vmem>>, %arg6: memref<32x288xbf16, #tpu.memory_space<vmem>>, %arg7: memref<32x1xf32, #tpu.memory_space<vmem>>, %arg8: memref<32x2xf32, #tpu.memory_space<vmem>>, %arg9: memref<1x2xf32, #tpu.memory_space<vmem>>, %arg10: memref<1x1xf32, #tpu.memory_space<vmem>>, %arg11: memref<32x2xf32, #tpu.memory_space<vmem>>, %arg12: memref<32x1xf32, #tpu.memory_space<vmem>>, %arg13: memref<1x32x384xf32, #tpu.memory_space<vmem>>, %arg14: memref<288x384xbf16, #tpu.memory_space<vmem>>, %arg15: memref<32x422xbf16, #tpu.memory_space<vmem>>) attributes {dimension_semantics = [#tpu.dimension_semantics<parallel>], iteration_bounds = array<i64: 2>, scalar_prefetch = 0 : i64, scratch_operands = 2 : i64, tpu.core_type = #tpu.core_type<tc>, window_params = [{transform_indices = @transform_0, window_bounds = array<i64: 1, 32, 422>}, {pipeline_mode = #tpu.pipeline_mode<synchronous>, transform_indices = @transform_1, window_bounds = array<i64: 1, 384>}, {pipeline_mode = #tpu.pipeline_mode<synchronous>, transform_indices = @transform_2, window_bounds = array<i64: 32, 288>}, {pipeline_mode = #tpu.pipeline_mode<synchronous>, transform_indices = @transform_3, window_bounds = array<i64: 32, 384>}, {pipeline_mode = #tpu.pipeline_mode<synchronous>, transform_indices = @transform_4, window_bounds = array<i64: 1, 1>}, {pipeline_mode = #tpu.pipeline_mode<synchronous>, transform_indices = @transform_5, window_bounds = array<i64: 32, 288>}, {pipeline_mode = #tpu.pipeline_mode<synchronous>, transform_indices = @transform_6, window_bounds = array<i64: 32, 1>}, {pipeline_mode = #tpu.pipeline_mode<synchronous>, transform_indices = @transform_7, window_bounds = array<i64: 32, 2>}, {pipeline_mode = #tpu.pipeline_mode<synchronous>, transform_indices = @transform_8, window_bounds = array<i64: 1, 2>}, {pipeline_mode = #tpu.pipeline_mode<synchronous>, transform_indices = @transform_9, window_bounds = array<i64: 1, 1>}, {pipeline_mode = #tpu.pipeline_mode<synchronous>, transform_indices = @transform_10, window_bounds = array<i64: 32, 2>}, {pipeline_mode = #tpu.pipeline_mode<synchronous>, transform_indices = @transform_11, window_bounds = array<i64: 32, 1>}, {transform_indices = @transform_12, window_bounds = array<i64: 1, 32, 384>}]} {
    %c0 = arith.constant 0 : index
    %c0_0 = arith.constant 0 : index
    %0 = vector.load %arg2[%c0, %c0_0] : memref<1x384xf32, #tpu.memory_space<vmem>>, vector<1x384xf32>
    %c0_1 = arith.constant 0 : index
    %c0_2 = arith.constant 0 : index
    %1 = vector.load %arg5[%c0_1, %c0_2] : memref<1x1xf32, #tpu.memory_space<vmem>>, vector<1x1xf32>
    %c0_3 = arith.constant 0 : index
    %c0_4 = arith.constant 0 : index
    %c0_5 = arith.constant 0 : index
    %2 = vector.load %arg1[%c0_3, %c0_4, %c0_5] : memref<1x32x422xf32, #tpu.memory_space<vmem>>, vector<1x32x384xf32>
    %3 = vector.shape_cast %2 : vector<1x32x384xf32> to vector<32x384xf32>
    %4 = arith.truncf %3 : vector<32x384xf32> to vector<32x384xbf16>
    %c0_6 = arith.constant 0 : index
    %c0_7 = arith.constant 0 : index
    %5 = vector.load %arg14[%c0_6, %c0_7] : memref<288x384xbf16, #tpu.memory_space<vmem>>, vector<32x384xbf16>
    tpu.vector_store %arg14[%c0_6, %c0_7], %4 {strides = array<i32>} : memref<288x384xbf16, #tpu.memory_space<vmem>>, vector<32x384xbf16>,
    %c0_8 = arith.constant 0 : index
    %c0_9 = arith.constant 0 : index
    %c1 = arith.constant 1 : index
    %6 = vector.load %arg1[%c0_8, %c0_9, %c1] : memref<1x32x422xf32, #tpu.memory_space<vmem>>, vector<1x32x384xf32>
    %7 = vector.shape_cast %6 : vector<1x32x384xf32> to vector<32x384xf32>
    %8 = arith.truncf %7 : vector<32x384xf32> to vector<32x384xbf16>
    %c32 = arith.constant 32 : index
    %c0_10 = arith.constant 0 : index
    %9 = vector.load %arg14[%c32, %c0_10] : memref<288x384xbf16, #tpu.memory_space<vmem>>, vector<32x384xbf16>
    tpu.vector_store %arg14[%c32, %c0_10], %8 {strides = array<i32>} : memref<288x384xbf16, #tpu.memory_space<vmem>>, vector<32x384xbf16>,
    %c0_11 = arith.constant 0 : index
    %c0_12 = arith.constant 0 : index
    %c2 = arith.constant 2 : index
    %10 = vector.load %arg1[%c0_11, %c0_12, %c2] : memref<1x32x422xf32, #tpu.memory_space<vmem>>, vector<1x32x384xf32>
    %11 = vector.shape_cast %10 : vector<1x32x384xf32> to vector<32x384xf32>
    %12 = arith.truncf %11 : vector<32x384xf32> to vector<32x384xbf16>
    %c64 = arith.constant 64 : index
    %c0_13 = arith.constant 0 : index
    %13 = vector.load %arg14[%c64, %c0_13] : memref<288x384xbf16, #tpu.memory_space<vmem>>, vector<32x384xbf16>
    tpu.vector_store %arg14[%c64, %c0_13], %12 {strides = array<i32>} : memref<288x384xbf16, #tpu.memory_space<vmem>>, vector<32x384xbf16>,
    %c0_14 = arith.constant 0 : index
    %c0_15 = arith.constant 0 : index
    %c18 = arith.constant 18 : index
    %14 = vector.load %arg1[%c0_14, %c0_15, %c18] : memref<1x32x422xf32, #tpu.memory_space<vmem>>, vector<1x32x384xf32>
    %15 = vector.shape_cast %14 : vector<1x32x384xf32> to vector<32x384xf32>
    %16 = arith.truncf %15 : vector<32x384xf32> to vector<32x384xbf16>
    %c96 = arith.constant 96 : index
    %c0_16 = arith.constant 0 : index
    %17 = vector.load %arg14[%c96, %c0_16] : memref<288x384xbf16, #tpu.memory_space<vmem>>, vector<32x384xbf16>
    tpu.vector_store %arg14[%c96, %c0_16], %16 {strides = array<i32>} : memref<288x384xbf16, #tpu.memory_space<vmem>>, vector<32x384xbf16>,
    %c0_17 = arith.constant 0 : index
    %c0_18 = arith.constant 0 : index
    %c19 = arith.constant 19 : index
    %18 = vector.load %arg1[%c0_17, %c0_18, %c19] : memref<1x32x422xf32, #tpu.memory_space<vmem>>, vector<1x32x384xf32>
    %19 = vector.shape_cast %18 : vector<1x32x384xf32> to vector<32x384xf32>
    %20 = arith.truncf %19 : vector<32x384xf32> to vector<32x384xbf16>
    %c128 = arith.constant 128 : index
    %c0_19 = arith.constant 0 : index
    %21 = vector.load %arg14[%c128, %c0_19] : memref<288x384xbf16, #tpu.memory_space<vmem>>, vector<32x384xbf16>
    tpu.vector_store %arg14[%c128, %c0_19], %20 {strides = array<i32>} : memref<288x384xbf16, #tpu.memory_space<vmem>>, vector<32x384xbf16>,
    %c0_20 = arith.constant 0 : index
    %c0_21 = arith.constant 0 : index
    %c20 = arith.constant 20 : index
    %22 = vector.load %arg1[%c0_20, %c0_21, %c20] : memref<1x32x422xf32, #tpu.memory_space<vmem>>, vector<1x32x384xf32>
    %23 = vector.shape_cast %22 : vector<1x32x384xf32> to vector<32x384xf32>
    %24 = arith.truncf %23 : vector<32x384xf32> to vector<32x384xbf16>
    %c160 = arith.constant 160 : index
    %c0_22 = arith.constant 0 : index
    %25 = vector.load %arg14[%c160, %c0_22] : memref<288x384xbf16, #tpu.memory_space<vmem>>, vector<32x384xbf16>
    tpu.vector_store %arg14[%c160, %c0_22], %24 {strides = array<i32>} : memref<288x384xbf16, #tpu.memory_space<vmem>>, vector<32x384xbf16>,
    %c0_23 = arith.constant 0 : index
    %c0_24 = arith.constant 0 : index
    %c36 = arith.constant 36 : index
    %26 = vector.load %arg1[%c0_23, %c0_24, %c36] : memref<1x32x422xf32, #tpu.memory_space<vmem>>, vector<1x32x384xf32>
    %27 = vector.shape_cast %26 : vector<1x32x384xf32> to vector<32x384xf32>
    %28 = arith.truncf %27 : vector<32x384xf32> to vector<32x384xbf16>
    %c192 = arith.constant 192 : index
    %c0_25 = arith.constant 0 : index
    %29 = vector.load %arg14[%c192, %c0_25] : memref<288x384xbf16, #tpu.memory_space<vmem>>, vector<32x384xbf16>
    tpu.vector_store %arg14[%c192, %c0_25], %28 {strides = array<i32>} : memref<288x384xbf16, #tpu.memory_space<vmem>>, vector<32x384xbf16>,
    %c0_26 = arith.constant 0 : index
    %c0_27 = arith.constant 0 : index
    %c37 = arith.constant 37 : index
    %30 = vector.load %arg1[%c0_26, %c0_27, %c37] : memref<1x32x422xf32, #tpu.memory_space<vmem>>, vector<1x32x384xf32>
    %31 = vector.shape_cast %30 : vector<1x32x384xf32> to vector<32x384xf32>
    %32 = arith.truncf %31 : vector<32x384xf32> to vector<32x384xbf16>
    %c224 = arith.constant 224 : index
    %c0_28 = arith.constant 0 : index
    %33 = vector.load %arg14[%c224, %c0_28] : memref<288x384xbf16, #tpu.memory_space<vmem>>, vector<32x384xbf16>
    tpu.vector_store %arg14[%c224, %c0_28], %32 {strides = array<i32>} : memref<288x384xbf16, #tpu.memory_space<vmem>>, vector<32x384xbf16>,
    %c0_29 = arith.constant 0 : index
    %c0_30 = arith.constant 0 : index
    %c38 = arith.constant 38 : index
    %34 = vector.load %arg1[%c0_29, %c0_30, %c38] : memref<1x32x422xf32, #tpu.memory_space<vmem>>, vector<1x32x384xf32>
    %35 = vector.shape_cast %34 : vector<1x32x384xf32> to vector<32x384xf32>
    %36 = arith.truncf %35 : vector<32x384xf32> to vector<32x384xbf16>
    %c256 = arith.constant 256 : index
    %c0_31 = arith.constant 0 : index
    %37 = vector.load %arg14[%c256, %c0_31] : memref<288x384xbf16, #tpu.memory_space<vmem>>, vector<32x384xbf16>
    tpu.vector_store %arg14[%c256, %c0_31], %36 {strides = array<i32>} : memref<288x384xbf16, #tpu.memory_space<vmem>>, vector<32x384xbf16>,
    %c0_32 = arith.constant 0 : index
    %c0_33 = arith.constant 0 : index
    %38 = vector.load %arg3[%c0_32, %c0_33] : memref<32x288xbf16, #tpu.memory_space<vmem>>, vector<32x288xbf16>
    %c0_34 = arith.constant 0 : index
    %c0_35 = arith.constant 0 : index
    %39 = vector.load %arg14[%c0_34, %c0_35] : memref<288x384xbf16, #tpu.memory_space<vmem>>, vector<288x384xbf16>
    %cst = arith.constant dense<0.000000e+00> : vector<32x384xf32>
    %40 = tpu.matmul %38, %39, %cst {dimension_numbers = #tpu.dot_dimension_numbers<[1], [0], [0], [1], [0, 0, 1, 1], [], []>} : vector<32x288xbf16>, vector<288x384xbf16>, vector<32x384xf32> -> vector<32x384xf32>
    %c0_36 = arith.constant 0 : index
    %c0_37 = arith.constant 0 : index
    %41 = vector.load %arg4[%c0_36, %c0_37] : memref<32x384xf32, #tpu.memory_space<vmem>>, vector<32x384xf32>
    %42 = arith.addf %40, %41 : vector<32x384xf32>
    %cst_38 = arith.constant 0.000000e+00 : f32
    %43 = vector.broadcast %cst_38 : f32 to vector<32x384xf32>
    %44 = arith.cmpf ogt, %42, %43 : vector<32x384xf32>
    %45 = vector.broadcast %1 : vector<1x1xf32> to vector<32x384xf32>
    %46 = arith.mulf %45, %42 : vector<32x384xf32>
    %47 = arith.select %44, %42, %46 : vector<32x384xi1>, vector<32x384xf32>
    %48 = vector.broadcast %0 : vector<1x384xf32> to vector<32x384xf32>
    %49 = arith.mulf %47, %48 : vector<32x384xf32>
    %cst_39 = arith.constant 0.000000e+00 : bf16
    %50 = vector.broadcast %cst_39 : bf16 to vector<32x19xbf16>
    %c0_40 = arith.constant 0 : index
    %c0_41 = arith.constant 0 : index
    %51 = vector.load %arg15[%c0_40, %c0_41] : memref<32x422xbf16, #tpu.memory_space<vmem>>, vector<32x19xbf16>
    tpu.vector_store %arg15[%c0_40, %c0_41], %50 {strides = array<i32>} : memref<32x422xbf16, #tpu.memory_space<vmem>>, vector<32x19xbf16>,
    %cst_42 = arith.constant 0.000000e+00 : bf16
    %52 = vector.broadcast %cst_42 : bf16 to vector<32x19xbf16>
    %c0_43 = arith.constant 0 : index
    %c403 = arith.constant 403 : index
    %53 = vector.load %arg15[%c0_43, %c403] : memref<32x422xbf16, #tpu.memory_space<vmem>>, vector<32x19xbf16>
    tpu.vector_store %arg15[%c0_43, %c403], %52 {strides = array<i32>} : memref<32x422xbf16, #tpu.memory_space<vmem>>, vector<32x19xbf16>,
    %54 = arith.truncf %49 : vector<32x384xf32> to vector<32x384xbf16>
    %c0_44 = arith.constant 0 : index
    %c19_45 = arith.constant 19 : index
    %55 = vector.load %arg15[%c0_44, %c19_45] : memref<32x422xbf16, #tpu.memory_space<vmem>>, vector<32x384xbf16>
    tpu.vector_store %arg15[%c0_44, %c19_45], %54 {strides = array<i32>} : memref<32x422xbf16, #tpu.memory_space<vmem>>, vector<32x384xbf16>,
    %c0_46 = arith.constant 0 : index
    %c0_47 = arith.constant 0 : index
    %56 = vector.load %arg15[%c0_46, %c0_47] : memref<32x422xbf16, #tpu.memory_space<vmem>>, vector<32x384xbf16>
    %c0_48 = arith.constant 0 : index
    %c0_49 = arith.constant 0 : index
    %57 = vector.load %arg14[%c0_48, %c0_49] : memref<288x384xbf16, #tpu.memory_space<vmem>>, vector<32x384xbf16>
    tpu.vector_store %arg14[%c0_48, %c0_49], %56 {strides = array<i32>} : memref<288x384xbf16, #tpu.memory_space<vmem>>, vector<32x384xbf16>,
    %c0_50 = arith.constant 0 : index
    %c1_51 = arith.constant 1 : index
    %58 = vector.load %arg15[%c0_50, %c1_51] : memref<32x422xbf16, #tpu.memory_space<vmem>>, vector<32x384xbf16>
    %c32_52 = arith.constant 32 : index
    %c0_53 = arith.constant 0 : index
    %59 = vector.load %arg14[%c32_52, %c0_53] : memref<288x384xbf16, #tpu.memory_space<vmem>>, vector<32x384xbf16>
    tpu.vector_store %arg14[%c32_52, %c0_53], %58 {strides = array<i32>} : memref<288x384xbf16, #tpu.memory_space<vmem>>, vector<32x384xbf16>,
    %c0_54 = arith.constant 0 : index
    %c2_55 = arith.constant 2 : index
    %60 = vector.load %arg15[%c0_54, %c2_55] : memref<32x422xbf16, #tpu.memory_space<vmem>>, vector<32x384xbf16>
    %c64_56 = arith.constant 64 : index
    %c0_57 = arith.constant 0 : index
    %61 = vector.load %arg14[%c64_56, %c0_57] : memref<288x384xbf16, #tpu.memory_space<vmem>>, vector<32x384xbf16>
    tpu.vector_store %arg14[%c64_56, %c0_57], %60 {strides = array<i32>} : memref<288x384xbf16, #tpu.memory_space<vmem>>, vector<32x384xbf16>,
    %c0_58 = arith.constant 0 : index
    %c18_59 = arith.constant 18 : index
    %62 = vector.load %arg15[%c0_58, %c18_59] : memref<32x422xbf16, #tpu.memory_space<vmem>>, vector<32x384xbf16>
    %c96_60 = arith.constant 96 : index
    %c0_61 = arith.constant 0 : index
    %63 = vector.load %arg14[%c96_60, %c0_61] : memref<288x384xbf16, #tpu.memory_space<vmem>>, vector<32x384xbf16>
    tpu.vector_store %arg14[%c96_60, %c0_61], %62 {strides = array<i32>} : memref<288x384xbf16, #tpu.memory_space<vmem>>, vector<32x384xbf16>,
    %c0_62 = arith.constant 0 : index
    %c19_63 = arith.constant 19 : index
    %64 = vector.load %arg15[%c0_62, %c19_63] : memref<32x422xbf16, #tpu.memory_space<vmem>>, vector<32x384xbf16>
    %c128_64 = arith.constant 128 : index
    %c0_65 = arith.constant 0 : index
    %65 = vector.load %arg14[%c128_64, %c0_65] : memref<288x384xbf16, #tpu.memory_space<vmem>>, vector<32x384xbf16>
    tpu.vector_store %arg14[%c128_64, %c0_65], %64 {strides = array<i32>} : memref<288x384xbf16, #tpu.memory_space<vmem>>, vector<32x384xbf16>,
    %c0_66 = arith.constant 0 : index
    %c20_67 = arith.constant 20 : index
    %66 = vector.load %arg15[%c0_66, %c20_67] : memref<32x422xbf16, #tpu.memory_space<vmem>>, vector<32x384xbf16>
    %c160_68 = arith.constant 160 : index
    %c0_69 = arith.constant 0 : index
    %67 = vector.load %arg14[%c160_68, %c0_69] : memref<288x384xbf16, #tpu.memory_space<vmem>>, vector<32x384xbf16>
    tpu.vector_store %arg14[%c160_68, %c0_69], %66 {strides = array<i32>} : memref<288x384xbf16, #tpu.memory_space<vmem>>, vector<32x384xbf16>,
    %c0_70 = arith.constant 0 : index
    %c36_71 = arith.constant 36 : index
    %68 = vector.load %arg15[%c0_70, %c36_71] : memref<32x422xbf16, #tpu.memory_space<vmem>>, vector<32x384xbf16>
    %c192_72 = arith.constant 192 : index
    %c0_73 = arith.constant 0 : index
    %69 = vector.load %arg14[%c192_72, %c0_73] : memref<288x384xbf16, #tpu.memory_space<vmem>>, vector<32x384xbf16>
    tpu.vector_store %arg14[%c192_72, %c0_73], %68 {strides = array<i32>} : memref<288x384xbf16, #tpu.memory_space<vmem>>, vector<32x384xbf16>,
    %c0_74 = arith.constant 0 : index
    %c37_75 = arith.constant 37 : index
    %70 = vector.load %arg15[%c0_74, %c37_75] : memref<32x422xbf16, #tpu.memory_space<vmem>>, vector<32x384xbf16>
    %c224_76 = arith.constant 224 : index
    %c0_77 = arith.constant 0 : index
    %71 = vector.load %arg14[%c224_76, %c0_77] : memref<288x384xbf16, #tpu.memory_space<vmem>>, vector<32x384xbf16>
    tpu.vector_store %arg14[%c224_76, %c0_77], %70 {strides = array<i32>} : memref<288x384xbf16, #tpu.memory_space<vmem>>, vector<32x384xbf16>,
    %c0_78 = arith.constant 0 : index
    %c38_79 = arith.constant 38 : index
    %72 = vector.load %arg15[%c0_78, %c38_79] : memref<32x422xbf16, #tpu.memory_space<vmem>>, vector<32x384xbf16>
    %c256_80 = arith.constant 256 : index
    %c0_81 = arith.constant 0 : index
    %73 = vector.load %arg14[%c256_80, %c0_81] : memref<288x384xbf16, #tpu.memory_space<vmem>>, vector<32x384xbf16>
    tpu.vector_store %arg14[%c256_80, %c0_81], %72 {strides = array<i32>} : memref<288x384xbf16, #tpu.memory_space<vmem>>, vector<32x384xbf16>,
    %c0_82 = arith.constant 0 : index
    %c0_83 = arith.constant 0 : index
    %74 = vector.load %arg6[%c0_82, %c0_83] : memref<32x288xbf16, #tpu.memory_space<vmem>>, vector<32x288xbf16>
    %c0_84 = arith.constant 0 : index
    %c0_85 = arith.constant 0 : index
    %75 = vector.load %arg14[%c0_84, %c0_85] : memref<288x384xbf16, #tpu.memory_space<vmem>>, vector<288x384xbf16>
    %cst_86 = arith.constant dense<0.000000e+00> : vector<32x384xf32>
    %76 = tpu.matmul %74, %75, %cst_86 {dimension_numbers = #tpu.dot_dimension_numbers<[1], [0], [0], [1], [0, 0, 1, 1], [], []>} : vector<32x288xbf16>, vector<288x384xbf16>, vector<32x384xf32> -> vector<32x384xf32>
    %c0_87 = arith.constant 0 : index
    %c0_88 = arith.constant 0 : index
    %77 = vector.load %arg7[%c0_87, %c0_88] : memref<32x1xf32, #tpu.memory_space<vmem>>, vector<32x1xf32>
    %78 = vector.broadcast %77 : vector<32x1xf32> to vector<32x384xf32>
    %79 = arith.addf %76, %78 : vector<32x384xf32>
    %80 = vector.broadcast %0 : vector<1x384xf32> to vector<32x384xf32>
    %81 = arith.mulf %79, %80 : vector<32x384xf32>
    %cst_89 = arith.constant dense<0.000000e+00> : vector<32xf32>
    %82 = vector.multi_reduction <add>, %81, %cst_89 [1] : vector<32x384xf32> to vector<32xf32>
    %83 = vector.shape_cast %82 : vector<32xf32> to vector<32x1xf32>
    %cst_90 = arith.constant 3.906250e-03 : f32
    %84 = vector.broadcast %cst_90 : f32 to vector<32x1xf32>
    %85 = arith.mulf %83, %84 : vector<32x1xf32>
    %c0_91 = arith.constant 0 : index
    %c0_92 = arith.constant 0 : index
    %86 = vector.load %arg8[%c0_91, %c0_92] : memref<32x2xf32, #tpu.memory_space<vmem>>, vector<32x2xf32>
    %87 = vector.broadcast %85 : vector<32x1xf32> to vector<32x2xf32>
    %88 = arith.mulf %87, %86 : vector<32x2xf32>
    %cst_93 = arith.constant dense<0.000000e+00> : vector<2xf32>
    %89 = vector.multi_reduction <add>, %88, %cst_93 [0] : vector<32x2xf32> to vector<2xf32>
    %90 = vector.shape_cast %89 : vector<2xf32> to vector<1x2xf32>
    %c0_94 = arith.constant 0 : index
    %c0_95 = arith.constant 0 : index
    %91 = vector.load %arg9[%c0_94, %c0_95] : memref<1x2xf32, #tpu.memory_space<vmem>>, vector<1x2xf32>
    %92 = arith.addf %90, %91 : vector<1x2xf32>
    %c0_96 = arith.constant 0 : index
    %c0_97 = arith.constant 0 : index
    %93 = vector.load %arg10[%c0_96, %c0_97] : memref<1x1xf32, #tpu.memory_space<vmem>>, vector<1x1xf32>
    %cst_98 = arith.constant 0.000000e+00 : f32
    %94 = vector.broadcast %cst_98 : f32 to vector<1x2xf32>
    %95 = arith.cmpf ogt, %92, %94 : vector<1x2xf32>
    %96 = vector.broadcast %93 : vector<1x1xf32> to vector<1x2xf32>
    %97 = arith.mulf %96, %92 : vector<1x2xf32>
    %98 = arith.select %95, %92, %97 : vector<1x2xi1>, vector<1x2xf32>
    %c0_99 = arith.constant 0 : index
    %c0_100 = arith.constant 0 : index
    %99 = vector.load %arg11[%c0_99, %c0_100] : memref<32x2xf32, #tpu.memory_space<vmem>>, vector<32x2xf32>
    %100 = vector.broadcast %98 : vector<1x2xf32> to vector<32x2xf32>
    %101 = arith.mulf %100, %99 : vector<32x2xf32>
    %cst_101 = arith.constant dense<0.000000e+00> : vector<32xf32>
    %102 = vector.multi_reduction <add>, %101, %cst_101 [1] : vector<32x2xf32> to vector<32xf32>
    %103 = vector.shape_cast %102 : vector<32xf32> to vector<32x1xf32>
    %c0_102 = arith.constant 0 : index
    %c0_103 = arith.constant 0 : index
    %104 = vector.load %arg12[%c0_102, %c0_103] : memref<32x1xf32, #tpu.memory_space<vmem>>, vector<32x1xf32>
    %105 = arith.addf %103, %104 : vector<32x1xf32>
    %cst_104 = arith.constant 0.000000e+00 : f32
    %106 = vector.broadcast %cst_104 : f32 to vector<32x1xf32>
    %107 = arith.subf %106, %105 : vector<32x1xf32>
    %108 = math.exp %107 : vector<32x1xf32>
    %cst_105 = arith.constant 1.000000e+00 : f32
    %109 = vector.broadcast %cst_105 : f32 to vector<32x1xf32>
    %110 = arith.addf %109, %108 : vector<32x1xf32>
    %111 = tpu.reciprocal %110 {approx = true} : vector<32x1xf32> -> vector<32x1xf32>
    %112 = vector.broadcast %111 : vector<32x1xf32> to vector<32x384xf32>
    %113 = arith.mulf %81, %112 : vector<32x384xf32>
    %c0_106 = arith.constant 0 : index
    %c0_107 = arith.constant 0 : index
    %c19_108 = arith.constant 19 : index
    %114 = vector.load %arg1[%c0_106, %c0_107, %c19_108] : memref<1x32x422xf32, #tpu.memory_space<vmem>>, vector<1x32x384xf32>
    %115 = vector.shape_cast %114 : vector<1x32x384xf32> to vector<32x384xf32>
    %116 = arith.addf %113, %115 : vector<32x384xf32>
    %cst_109 = arith.constant 0.000000e+00 : f32
    %117 = vector.broadcast %cst_109 : f32 to vector<32x384xf32>
    %118 = arith.cmpf ogt, %116, %117 : vector<32x384xf32>
    %119 = vector.broadcast %1 : vector<1x1xf32> to vector<32x384xf32>
    %120 = arith.mulf %119, %116 : vector<32x384xf32>
    %121 = arith.select %118, %116, %120 : vector<32x384xi1>, vector<32x384xf32>
    %c0_110 = arith.constant 0 : index
    %c0_111 = arith.constant 0 : index
    %c0_112 = arith.constant 0 : index
    %122 = vector.load %arg13[%c0_110, %c0_111, %c0_112] : memref<1x32x384xf32, #tpu.memory_space<vmem>>, vector<1x32x384xf32>
    %123 = vector.shape_cast %122 : vector<1x32x384xf32> to vector<32x384xf32>
    %124 = vector.shape_cast %121 : vector<32x384xf32> to vector<1x32x384xf32>
    tpu.vector_store %arg13[%c0_110, %c0_111, %c0_112], %124 {strides = array<i32>} : memref<1x32x384xf32, #tpu.memory_space<vmem>>, vector<1x32x384xf32>,
    return
  }
  func.func @transform_0(%arg0: i32) -> (i32, i32, i32) {
    %c0_i32 = arith.constant 0 : i32
    %c0_i32_0 = arith.constant 0 : i32
    %c0_i32_1 = arith.constant 0 : i32
    return %arg0, %c0_i32, %c0_i32_0 : i32, i32, i32
  }
  func.func @transform_1(%arg0: i32) -> (i32, i32) {
    %c0_i32 = arith.constant 0 : i32
    %c0_i32_0 = arith.constant 0 : i32
    %c0_i32_1 = arith.constant 0 : i32
    return %c0_i32, %c0_i32_0 : i32, i32
  }
  func.func @transform_2(%arg0: i32) -> (i32, i32) {
    %c0_i32 = arith.constant 0 : i32
    %c0_i32_0 = arith.constant 0 : i32
    %c0_i32_1 = arith.constant 0 : i32
    return %c0_i32, %c0_i32_0 : i32, i32
  }
  func.func @transform_3(%arg0: i32) -> (i32, i32) {
    %c0_i32 = arith.constant 0 : i32
    %c0_i32_0 = arith.constant 0 : i32
    %c0_i32_1 = arith.constant 0 : i32
    return %c0_i32, %c0_i32_0 : i32, i32
  }
  func.func @transform_4(%arg0: i32) -> (i32, i32) {
    %c0_i32 = arith.constant 0 : i32
    %c0_i32_0 = arith.constant 0 : i32
    %c0_i32_1 = arith.constant 0 : i32
    return %c0_i32, %c0_i32_0 : i32, i32
  }
  func.func @transform_5(%arg0: i32) -> (i32, i32) {
    %c0_i32 = arith.constant 0 : i32
    %c0_i32_0 = arith.constant 0 : i32
    %c0_i32_1 = arith.constant 0 : i32
    return %c0_i32, %c0_i32_0 : i32, i32
  }
  func.func @transform_6(%arg0: i32) -> (i32, i32) {
    %c0_i32 = arith.constant 0 : i32
    %c0_i32_0 = arith.constant 0 : i32
    %c0_i32_1 = arith.constant 0 : i32
    return %c0_i32, %c0_i32_0 : i32, i32
  }
  func.func @transform_7(%arg0: i32) -> (i32, i32) {
    %c0_i32 = arith.constant 0 : i32
    %c0_i32_0 = arith.constant 0 : i32
    %c0_i32_1 = arith.constant 0 : i32
    return %c0_i32, %c0_i32_0 : i32, i32
  }
  func.func @transform_8(%arg0: i32) -> (i32, i32) {
    %c0_i32 = arith.constant 0 : i32
    %c0_i32_0 = arith.constant 0 : i32
    %c0_i32_1 = arith.constant 0 : i32
    return %c0_i32, %c0_i32_0 : i32, i32
  }
  func.func @transform_9(%arg0: i32) -> (i32, i32) {
    %c0_i32 = arith.constant 0 : i32
    %c0_i32_0 = arith.constant 0 : i32
    %c0_i32_1 = arith.constant 0 : i32
    return %c0_i32, %c0_i32_0 : i32, i32
  }
  func.func @transform_10(%arg0: i32) -> (i32, i32) {
    %c0_i32 = arith.constant 0 : i32
    %c0_i32_0 = arith.constant 0 : i32
    %c0_i32_1 = arith.constant 0 : i32
    return %c0_i32, %c0_i32_0 : i32, i32
  }
  func.func @transform_11(%arg0: i32) -> (i32, i32) {
    %c0_i32 = arith.constant 0 : i32
    %c0_i32_0 = arith.constant 0 : i32
    %c0_i32_1 = arith.constant 0 : i32
    return %c0_i32, %c0_i32_0 : i32, i32
  }
  func.func @transform_12(%arg0: i32) -> (i32, i32, i32) {
    %c0_i32 = arith.constant 0 : i32
    %c0_i32_0 = arith.constant 0 : i32
    %c0_i32_1 = arith.constant 0 : i32
    return %arg0, %c0_i32, %c0_i32_0 : i32, i32, i32
  }
}

</mosaic_0001>

<bundles_post_ra>
// kernel: ir_block.1
= control target key start
LH: loop header
LB: loop body
LE: loop exit
PB: predicated region body
PF: predicated region fallthrough
CT: control target
= control target key end

     0   :  { %s4133_s25 = smov 0   ;;  %s5283_s0 = inlined_call_operand.vmem [shape: f32[2,32,422], index: 0, kind: input, shape index: {}]   ;;  %s5284_s1 = inlined_call_operand.vmem [shape: f32[1,384], index: 1, kind: input, shape index: {}]   ;;  %s5285_s2 = inlined_call_operand.vmem [shape: bf16[32,288], index: 2, kind: input, shape index: {}]   ;;  %s5286_s3 = inlined_call_operand.vmem [shape: f32[32,384], index: 3, kind: input, shape index: {}]   ;;  %s5287_s4 = inlined_call_operand.<no memory space> [shape: f32[1,1], index: 4, kind: input, shape index: {}]   ;;  %s5288_s5 = inlined_call_operand.vmem [shape: bf16[32,288], index: 5, kind: input, shape index: {}]   ;;  %s5289_s6 = inlined_call_operand.vmem [shape: f32[32,1], index: 6, kind: input, shape index: {}]   ;;  %s5290_s7 = inlined_call_operand.vmem [shape: f32[32,2], index: 7, kind: input, shape index: {}]   ;;  %s5291_s8 = inlined_call_operand.vmem [shape: f32[1,2], index: 8, kind: input, shape index: {}]   ;;  %s5292_s10 = inlined_call_operand.vmem [shape: f32[32,2], index: 10, kind: input, shape index: {}]   ;;  %s5293_s11 = inlined_call_operand.vmem [shape: f32[32,1], index: 11, kind: input, shape index: {}]   ;;  %s5294_s12 = inlined_call_operand.vmem [shape: f32[2,32,384], index: 12, kind: output, shape index: {}]   ;;  %s5295_s9 = inlined_call_operand.<no memory space> [shape: f32[1,1], index: 9, kind: input, shape index: {}]  }
   0x1   :  { %v17_v0 = vstv %s5287_s4  ;;  %v19_v1 = vstv %s5295_s9 }
   0x2   :  { %18 = vst [vmem:[#allocation4] sm:$0x1] %v17_v0 }
   0x3   :  { %20 = vst [vmem:[#allocation5] sm:$0x1] %v19_v1 }
   0x4 LB: > { %s3374_s26 = sadd.s32 4294967295, %s4050_s25   ;;  %p3378_p0 = scmp.ge.s32.totalorder %s4050_s25, 1  ;;  %s4050_s25 = sphi %s4133_s25, %s26_s25  }
   0x5   : > { %p366_p1 = scmp.lt.s32.totalorder %s4050_s25, 3 }
   0x7   : > { %p367_p2 = pnand %p3378_p0, %p366_p1 }
   0x8   : > { %p408_p3 = scmp.lt.s32.totalorder (!%p367_p2), %s3374_s26, 1  ;;  %s4052_s29 = smov (!%p367_p2), 90  }
   0x9   : > { %370 = sbr.rel (%p367_p2) target bundleno = 1520 (0x5f0), region = 68  ;;  %s4053_s30 = smov (!%p367_p2), 110  }
   0xa   : > { %s4054_s13 = smov (!%p367_p2), 91   ;;  %s4055_s14 = smov (!%p367_p2), 126  }
   0xb   : > { %s4056_s15 = smov (!%p367_p2), 92   ;;  %s4057_s16 = smov (!%p367_p2), 127  }
   0xc   : > { %s4058_s17 = smov (!%p367_p2), 108   ;;  %s4059_s18 = smov (!%p367_p2), 109  }
   0xd   : > { %s4061_s21 = smov (!%p367_p2), 19  }
   0xe   : > { %s5301_s26 = smov (!%p408_p3, %s3374_s26), 1  ;;  %vm505_vm0 = vcmask 1043456   ;;  %vm1102_vm1 = vcmask 736256   ;;  %vm677_vm2 = vcmask 900096   ;;  %vm1017_vm3 = vcmask 744448  }
   0xf   : > { %s3876_s4 = sshll.u32 %s5301_s26, 7  ;;  %vm932_vm4 = vcmask 752640   ;;  %vm592_vm5 = vcmask 1031168   ;;  %vm507_vm6 = vcmask 1039360   ;;  %vm847_vm7 = vcmask 883712   ;;  %s4005_s19 = smul.u32 96, %s5301_s26 }
  0x10   : > { %s4147_s28 = scalar_lea.vmem %s5283_s0, %s3876_s4  ;;  %vm1540_vm8 = vcmask 261120   ;;  %vm762_vm9 = vcmask 891904  }
  0x11   : > { %v1057_v2 = vld [vmem:[%s4147_s28 + $0x60] sm:$0xff]  ;;  %v1058_v3 = vld [vmem:[%s4147_s28 + $0x68] sm:$0xff]  ;;  %v1059_v8 = vld [vmem:[%s4147_s28 + $0x70] sm:$0xff] }
  0x12   : > { %v1053_v4 = vld [vmem:[%s4147_s28 + $0x40] sm:$0xff]  ;;  %v4152_v5 = vpack.c.bf16 %v1058_v3, %v1057_v2  ;;  %v1054_v6 = vld [vmem:[%s4147_s28 + $0x48] sm:$0xff]  ;;  %v1060_v9 = vld [vmem:[%s4147_s28 + $0x78] sm:$0xff] }
  0x13   : > { %v4155_v7 = vpack.c.bf16 %v1054_v6, %v1053_v4  ;;  %v1045_v10 = vld [vmem:[%s4147_s28] sm:$0xff]  ;;  %v1046_v11 = vld [vmem:[%s4147_s28 + $0x8] sm:$0xff]  ;;  %v1055_v12 = vld [vmem:[%s4147_s28 + $0x50] sm:$0xff]  ;;  %v4169_v15 = vpack.c.bf16 %v1060_v9, %v1059_v8 }
  0x14   : > { %1089 = vrot.lane.b32.xlu1 %v4152_v5, %s4052_s29  ;;  %v1056_v13 = vld [vmem:[%s4147_s28 + $0x58] sm:$0xff]  ;;  %v4167_v14 = vpack.c.bf16 %v1046_v11, %v1045_v10  ;;  %v1047_v17 = vld [vmem:[%s4147_s28 + $0x10] sm:$0xff]  ;;  %v1049_v22 = vld [vmem:[%s4147_s28 + $0x20] sm:$0xff] }
  0x15   : > { %1085 = vrot.lane.b32.xlu0 %v4155_v7, %s4052_s29  ;;  %v4173_v16 = vpack.c.bf16 %v1056_v13, %v1055_v12  ;;  %v1048_v18 = vld [vmem:[%s4147_s28 + $0x18] sm:$0xff]  ;;  %v1051_v20 = vld [vmem:[%s4147_s28 + $0x30] sm:$0xff]  ;;  %v1050_v23 = vld [vmem:[%s4147_s28 + $0x28] sm:$0xff] }
  0x16   : > { %1077 = vrot.lane.b32.xlu2 %v4167_v14, %s4052_s29  ;;  %v4179_v19 = vpack.c.bf16 %v1048_v18, %v1047_v17  ;;  %v1052_v21 = vld [vmem:[%s4147_s28 + $0x38] sm:$0xff]  ;;  %v4191_v25 = vpack.c.bf16 %v1050_v23, %v1049_v22 }
  0x17   : > { %v4187_v24 = vpack.c.bf16 %v1052_v21, %v1051_v20 }
  0x1c   : > { %1091 = vrot.lane.b32.xlu1 %v4169_v15, %s4052_s29 }
  0x1d   : > { %1087 = vrot.lane.b32.xlu0 %v4173_v16, %s4052_s29 }
  0x1e   : > { %1079 = vrot.lane.b32.xlu2 %v4179_v19, %s4052_s29 }
  0x24   : > { %1083 = vrot.lane.b32.xlu1 %v4187_v24, %s4052_s29 }
  0x25   : > { %1081 = vrot.lane.b32.xlu0 %v4191_v25, %s4052_s29 }
  0x26   : > { %660 = vrot.lane.b32.xlu2 %v4155_v7, %s4053_s30 }
  0x2c   : > { %664 = vrot.lane.b32.xlu1 %v4152_v5, %s4053_s30 }
  0x2d   : > { %662 = vrot.lane.b32.xlu0 %v4173_v16, %s4053_s30 }
  0x2e   : > { %666 = vrot.lane.b32.xlu2 %v4169_v15, %s4053_s30 }
  0x34   : > { %1002 = vrot.lane.b32.xlu1 %v4173_v16, %s4054_s13 }
  0x35   : > { %1000 = vrot.lane.b32.xlu0 %v4155_v7, %s4054_s13 }
  0x36   : > { %1004 = vrot.lane.b32.xlu2 %v4152_v5, %s4054_s13 }
  0x3c   : > { %652 = vrot.lane.b32.xlu1 %v4167_v14, %s4053_s30 }
  0x3d   : > { %1006 = vrot.lane.b32.xlu0 %v4169_v15, %s4054_s13 }
  0x3e   : > { %654 = vrot.lane.b32.xlu2 %v4179_v19, %s4053_s30 }
  0x44   : > { %658 = vrot.lane.b32.xlu1 %v4187_v24, %s4053_s30 }
  0x45   : > { %656 = vrot.lane.b32.xlu0 %v4191_v25, %s4053_s30 }
  0x46   : > { %992 = vrot.lane.b32.xlu2 %v4167_v14, %s4054_s13 }
  0x4c   : > { %996 = vrot.lane.b32.xlu1 %v4191_v25, %s4054_s13 }
  0x4d   : > { %994 = vrot.lane.b32.xlu0 %v4179_v19, %s4054_s13 }
  0x4e   : > { %998 = vrot.lane.b32.xlu2 %v4187_v24, %s4054_s13 }
  0x54   : > { %577 = vrot.lane.b32.xlu1 %v4173_v16, %s4055_s14 }
  0x55   : > { %575 = vrot.lane.b32.xlu0 %v4155_v7, %s4055_s14 }
  0x56   : > { %579 = vrot.lane.b32.xlu2 %v4152_v5, %s4055_s14 }
  0x5c   : > { %915 = vrot.lane.b32.xlu1 %v4155_v7, %s4056_s15 }
  0x5d   : > { %581 = vrot.lane.b32.xlu0 %v4169_v15, %s4055_s14 }
  0x5e   : > { %917 = vrot.lane.b32.xlu2 %v4173_v16, %s4056_s15 }
  0x64   : > { %921 = vrot.lane.b32.xlu1 %v4169_v15, %s4056_s15 }
  0x65   : > { %919 = vrot.lane.b32.xlu0 %v4152_v5, %s4056_s15 }
  0x66   : > { %567 = vrot.lane.b32.xlu2 %v4167_v14, %s4055_s14 }
  0x6c   : > { %571 = vrot.lane.b32.xlu1 %v4191_v25, %s4055_s14 }
  0x6d   : > { %569 = vrot.lane.b32.xlu0 %v4179_v19, %s4055_s14 }
  0x6e   : > { %573 = vrot.lane.b32.xlu2 %v4187_v24, %s4055_s14 }
  0x70   : > { %v1078_v26 = vpop.permute.xlu2 %1077 }
  0x71   : > { %v1093_v27 = vrot.slane %v1078_v26, 4 }
  0x74   : > { %909 = vrot.lane.b32.xlu1 %v4179_v19, %s4056_s15 }
  0x75   : > { %907 = vrot.lane.b32.xlu0 %v4167_v14, %s4056_s15 }
  0x76   : > { %911 = vrot.lane.b32.xlu2 %v4191_v25, %s4056_s15 }
  0x78   : > { %v1080_v28 = vpop.permute.xlu2 %1079 }
  0x79   : > { %v1094_v29 = vrot.slane %v1080_v28, 4 }
  0x7b   : > { %v1101_v30 = vsel %vm505_vm0, %v1093_v27, %v1094_v29  ;;  %v1104_v31 = vsel %vm1102_vm1, %v1080_v28, %v1094_v29 }
  0x7c   : > { %489 = vrot.lane.b32.xlu1 %v4155_v7, %s4057_s16  ;;  %v1103_v32 = vsel %vm1102_vm1, %v1078_v26, %v1101_v30  ;;  %1123 = vst [vmem:[#allocation2 + $0x188] sm:$0xf] %v1104_v31 }
  0x7d   : > { %913 = vrot.lane.b32.xlu0 %v4187_v24, %s4056_s15  ;;  %1122 = vst [vmem:[#allocation2 + $0x180] sm:$0xff] %v1103_v32 }
  0x7e   : > { %491 = vrot.lane.b32.xlu2 %v4173_v16, %s4057_s16 }
  0x80   : > { %v4268_v33 = vpop.permute.xlu2 %660 }
  0x81   : > { %v672_v1 = vrot.slane %v4268_v33, 4 }
  0x84   : > { %495 = vrot.lane.b32.xlu1 %v4169_v15, %s4057_s16  ;;  %v3600_v17 = vld [vmem:[#allocation2 + $0x180] sm:$0xf] }
  0x85   : > { %493 = vrot.lane.b32.xlu0 %v4152_v5, %s4057_s16 }
  0x86   : > { %v1090_v34 = vpop.permute.xlu1 %1089  ;;  %830 = vrot.lane.b32.xlu2 %v4155_v7, %s4058_s17 }
  0x87   : > { %v1086_v35 = vpop.permute.xlu0 %1085  ;;  %v1099_v38 = vrot.slane %v1090_v34, 4 }
  0x88   : > { %v667_v36 = vpop.permute.xlu2 %666  ;;  %v1097_v43 = vrot.slane %v1086_v35, 4 }
  0x89   : > { %v675_v37 = vrot.slane %v667_v36, 4 }
  0x8b   : > { %v688_v39 = vsel %vm677_vm2, %v667_v36, %v675_v37 }
  0x8c   : > { %834 = vrot.lane.b32.xlu1 %v4152_v5, %s4058_s17  ;;  %704 = vst [vmem:[#allocation2 + $0xbc] sm:$0xf] %v688_v39 }
  0x8d   : > { %832 = vrot.lane.b32.xlu0 %v4173_v16, %s4058_s17 }
  0x8e   : > { %v1092_v40 = vpop.permute.xlu1 %1091  ;;  %836 = vrot.lane.b32.xlu2 %v4169_v15, %s4058_s17 }
  0x8f   : > { %v1100_v41 = vrot.slane %v1092_v40, 4  ;;  %v1088_v42 = vpop.permute.xlu0 %1087 }
  0x90   : > { %v1098_v44 = vrot.slane %v1088_v42, 4  ;;  %v4288_v50 = vpop.permute.xlu2 %1004 }
  0x91   : > { %v1111_v45 = vsel %vm505_vm0, %v1099_v38, %v1100_v41  ;;  %v1113_v46 = vsel %vm1102_vm1, %v1092_v40, %v1100_v41  ;;  %v1014_v38 = vrot.slane %v4288_v50, 4 }
  0x92   : > { %v1112_v47 = vsel %vm1102_vm1, %v1090_v34, %v1111_v45  ;;  %1129 = vst [vmem:[#allocation2 + $0x1ac] sm:$0xf] %v1113_v46  ;;  %v1108_v48 = vsel %vm505_vm0, %v1097_v43, %v1098_v44  ;;  %v1110_v49 = vsel %vm1102_vm1, %v1088_v42, %v1098_v44 }
  0x93   : > { %1128 = vst [vmem:[#allocation2 + $0x1a4] sm:$0xff] %v1112_v47  ;;  %v1109_v51 = vsel %vm1102_vm1, %v1086_v35, %v1108_v48 }
  0x94   : > { %1126 = vst [vmem:[#allocation2 + $0x198] sm:$0xff] %v1109_v51  ;;  %483 = vrot.lane.b32.xlu1 %v4179_v19, %s4057_s16 }
  0x95   : > { %1127 = vst [vmem:[#allocation2 + $0x1a0] sm:$0xf] %v1110_v49  ;;  %481 = vrot.lane.b32.xlu0 %v4167_v14, %s4057_s16 }
  0x96   : > { %v1084_v52 = vpop.permute.xlu1 %1083  ;;  %485 = vrot.lane.b32.xlu2 %v4191_v25, %s4057_s16 }
  0x97   : > { %v1096_v53 = vrot.slane %v1084_v52, 4  ;;  %v1082_v54 = vpop.permute.xlu0 %1081 }
  0x98   : > { %v1095_v55 = vrot.slane %v1082_v54, 4  ;;  %v4299_v59 = vpop.permute.xlu2 %654 }
  0x99   : > { %v1107_v56 = vsel %vm1102_vm1, %v1084_v52, %v1096_v53  ;;  %v669_v62 = vrot.slane %v4299_v59, 4 }
  0x9a   : > { %1125 = vst [vmem:[#allocation2 + $0x194] sm:$0xf] %v1107_v56  ;;  %v1105_v57 = vsel %vm505_vm0, %v1095_v55, %v1096_v53  ;;  %v3935_v58 = vld [vmem:[#allocation2 + $0x1a0] sm:$0xf0] }
  0x9b   : > { %v1106_v60 = vsel %vm1102_vm1, %v1082_v54, %v1105_v57  ;;  %v3612_v61 = vld [vmem:[#allocation2 + $0x198] sm:$0xf]  ;;  %v679_v0 = vsel %vm677_vm2, %v4299_v59, %v669_v62 }
  0x9c   : > { %1124 = vst [vmem:[#allocation2 + $0x18c] sm:$0xff] %v1106_v60  ;;  %822 = vrot.lane.b32.xlu1 %v4167_v14, %s4058_s17  ;;  %v3613_v63 = vor.u32 %v3935_v58, %v3612_v61 }
  0x9d   : > { %487 = vrot.lane.b32.xlu0 %v4187_v24, %s4057_s16  ;;  %698 = vst [vmem:[#allocation2 + $0x98] sm:$0xf] %v679_v0 }
  0x9e   : > { %1591 = vmatpush.bf16.msra.mxu2 %v3613_v63  ;;  %v665_v2 = vpop.permute.xlu1 %664  ;;  %824 = vrot.lane.b32.xlu2 %v4179_v19, %s4058_s17 }
  0x9f   : > { %v674_v3 = vrot.slane %v665_v2, 4  ;;  %v663_v4 = vpop.permute.xlu0 %662 }
  0xa0   : > { %v673_v6 = vrot.slane %v663_v4, 4  ;;  %v4316_v12 = vpop.permute.xlu2 %992 }
  0xa1   : > { %v686_v8 = vsel %vm505_vm0, %v674_v3, %v675_v37  ;;  %v1008_v59 = vrot.slane %v4316_v12, 4 }
  0xa2   : > { %v683_v9 = vsel %vm505_vm0, %v672_v1, %v673_v6  ;;  %v685_v10 = vsel %vm677_vm2, %v663_v4, %v673_v6  ;;  %v687_v11 = vsel %vm677_vm2, %v665_v2, %v686_v8 }
  0xa3   : > { %v684_v13 = vsel %vm677_vm2, %v4268_v33, %v683_v9  ;;  %702 = vst [vmem:[#allocation2 + $0xb0] sm:$0xf] %v685_v10  ;;  %v3932_v18 = vld [vmem:[#allocation2 + $0x188] sm:$0xf0] }
  0xa4   : > { %701 = vst [vmem:[#allocation2 + $0xa8] sm:$0xff] %v684_v13  ;;  %828 = vrot.lane.b32.xlu1 %v4187_v24, %s4058_s17  ;;  %v3601_v20 = vor.u32 %v3932_v18, %v3600_v17 }
  0xa5   : > { %703 = vst [vmem:[#allocation2 + $0xb4] sm:$0xff] %v687_v11  ;;  %826 = vrot.lane.b32.xlu0 %v4191_v25, %s4058_s17 }
  0xa6   : > { %1592 = vmatpush.bf16.msra.mxu2 %v3601_v20  ;;  %v1003_v21 = vpop.permute.xlu1 %1002  ;;  %745 = vrot.lane.b32.xlu2 %v4155_v7, %s4059_s18 }
  0xa7   : > { %v1013_v22 = vrot.slane %v1003_v21, 4  ;;  %v1001_v23 = vpop.permute.xlu0 %1000 }
  0xa8   : > { %v1012_v26 = vrot.slane %v1001_v23, 4  ;;  %v4328_v29 = vpop.permute.xlu2 %998 }
  0xa9   : > { %v1025_v27 = vsel %vm1017_vm3, %v1003_v21, %v1013_v22  ;;  %v1011_v33 = vrot.slane %v4328_v29, 4 }
  0xaa   : > { %1042 = vst [vmem:[#allocation2 + $0x170] sm:$0xf] %v1025_v27  ;;  %v1023_v28 = vsel %vm505_vm0, %v1012_v26, %v1013_v22 }
  0xab   : > { %v1024_v30 = vsel %vm1017_vm3, %v1001_v23, %v1023_v28  ;;  %v3492_v31 = vld [vmem:[#allocation2 + $0xa8] sm:$0xf]  ;;  %v3904_v32 = vld [vmem:[#allocation2 + $0xac] sm:$0xf]  ;;  %v1022_v37 = vsel %vm1017_vm3, %v4328_v29, %v1011_v33 }
  0xac   : > { %1041 = vst [vmem:[#allocation2 + $0x168] sm:$0xff] %v1024_v30  ;;  %749 = vrot.lane.b32.xlu1 %v4152_v5, %s4059_s18  ;;  %v3905_v34 = vld [vmem:[#allocation2 + $0xb0] sm:$0xf0]  ;;  %v3494_v35 = vld [vmem:[#allocation2 + $0xb4] sm:$0xf0] }
  0xad   : > { %747 = vrot.lane.b32.xlu0 %v4173_v16, %s4059_s18  ;;  %v3493_v7 = vor.u32 %v3905_v34, %v3492_v31  ;;  %v3497_v36 = vor.u32 %v3904_v32, %v3494_v35  ;;  %1040 = vst [vmem:[#allocation2 + $0x164] sm:$0xf] %v1022_v37 }
  0xae   : > { %v653_v39 = vpop.permute.xlu1 %652  ;;  %751 = vrot.lane.b32.xlu2 %v4169_v15, %s4059_s18 }
  0xaf   : > { %1547 = vmatpush.bf16.msra.mxu0 %v3493_v7  ;;  %1604 = vmatpush.bf16.msra.mxu3 %v3497_v36  ;;  %v1007_v40 = vpop.permute.xlu0 %1006  ;;  %v668_v41 = vrot.slane %v653_v39, 4 }
  0xb0   : > { %v1015_v42 = vrot.slane %v1007_v40, 4  ;;  %v4345_v45 = vpop.permute.xlu2 %579 }
  0xb1   : > { %v676_v5 = vsel %vm505_vm0, %v668_v41, %v669_v62  ;;  %v589_v35 = vrot.slane %v4345_v45, 4 }
  0xb2   : > { %v1026_v16 = vsel %vm505_vm0, %v1014_v38, %v1015_v42  ;;  %v1028_v43 = vsel %vm1017_vm3, %v1007_v40, %v1015_v42  ;;  %v678_v44 = vsel %vm677_vm2, %v653_v39, %v676_v5 }
  0xb3   : > { %v1027_v46 = vsel %vm1017_vm3, %v4288_v50, %v1026_v16  ;;  %1044 = vst [vmem:[#allocation2 + $0x17c] sm:$0xf] %v1028_v43  ;;  %v3588_v52 = vld [vmem:[#allocation2 + $0x168] sm:$0xf]  ;;  %v3928_v53 = vld [vmem:[#allocation2 + $0x16c] sm:$0xf] }
  0xb4   : > { %1043 = vst [vmem:[#allocation2 + $0x174] sm:$0xff] %v1027_v46  ;;  %739 = vrot.lane.b32.xlu1 %v4179_v19, %s4059_s18 }
  0xb5   : > { %697 = vst [vmem:[#allocation2 + $0x90] sm:$0xff] %v678_v44  ;;  %737 = vrot.lane.b32.xlu0 %v4167_v14, %s4059_s18 }
  0xb6   : > { %v659_v15 = vpop.permute.xlu1 %658  ;;  %741 = vrot.lane.b32.xlu2 %v4191_v25, %s4059_s18 }
  0xb7   : > { %v657_v47 = vpop.permute.xlu0 %656  ;;  %v671_v48 = vrot.slane %v659_v15, 4 }
  0xb8   : > { %v670_v49 = vrot.slane %v657_v47, 4  ;;  %v4357_v19 = vpop.permute.xlu2 %917 }
  0xb9   : > { %v682_v51 = vsel %vm677_vm2, %v659_v15, %v671_v48  ;;  %v928_v56 = vrot.slane %v4357_v19, 4 }
  0xba   : > { %v680_v50 = vsel %vm505_vm0, %v670_v49, %v671_v48  ;;  %700 = vst [vmem:[#allocation2 + $0xa4] sm:$0xf] %v682_v51 }
  0xbb   : > { %v681_v54 = vsel %vm677_vm2, %v657_v47, %v680_v50  ;;  %v3929_v14 = vld [vmem:[#allocation2 + $0x170] sm:$0xf0]  ;;  %v3590_v55 = vld [vmem:[#allocation2 + $0x174] sm:$0xf0]  ;;  %v940_v25 = vsel %vm932_vm4, %v4357_v19, %v928_v56 }
  0xbc   : > { %699 = vst [vmem:[#allocation2 + $0x9c] sm:$0xff] %v681_v54  ;;  %v3589_v57 = vor.u32 %v3929_v14, %v3588_v52  ;;  %v3593_v58 = vor.u32 %v3928_v53, %v3590_v55  ;;  %v3480_v3 = vld [vmem:[#allocation2 + $0x90] sm:$0xf]  ;;  %v3901_v4 = vld [vmem:[#allocation2 + $0x94] sm:$0xf] }
  0xbd   : > { %743 = vrot.lane.b32.xlu0 %v4187_v24, %s4059_s18  ;;  %957 = vst [vmem:[#allocation2 + $0x140] sm:$0xf] %v940_v25 }
  0xbe   : > { %1566 = vmatpush.bf16.msra.mxu1 %v3589_v57  ;;  %1623 = vmatpush.bf16.msrb.mxu2 %v3593_v58  ;;  %v997_v60 = vpop.permute.xlu1 %996 }
  0xbf   : > { %v995_v61 = vpop.permute.xlu0 %994  ;;  %v1010_v62 = vrot.slane %v997_v60, 4 }
  0xc0   : > { %v1009_v63 = vrot.slane %v995_v61, 4  ;;  %v4370_v6 = vpop.permute.xlu2 %567 }
  0xc1   : > { %v1020_v0 = vsel %vm505_vm0, %v1010_v62, %v1011_v33 }
  0xc2   : > { %v1016_v1 = vsel %vm505_vm0, %v1008_v59, %v1009_v63  ;;  %v1019_v2 = vsel %vm1017_vm3, %v995_v61, %v1009_v63  ;;  %v1021_v24 = vsel %vm1017_vm3, %v997_v60, %v1020_v0 }
  0xc3   : > { %v1018_v8 = vsel %vm1017_vm3, %v4316_v12, %v1016_v1  ;;  %1038 = vst [vmem:[#allocation2 + $0x158] sm:$0xf] %v1019_v2  ;;  %v3902_v9 = vld [vmem:[#allocation2 + $0x98] sm:$0xf0]  ;;  %v3482_v10 = vld [vmem:[#allocation2 + $0x9c] sm:$0xf0] }
  0xc4   : > { %1037 = vst [vmem:[#allocation2 + $0x150] sm:$0xff] %v1018_v8  ;;  %v3481_v11 = vor.u32 %v3902_v9, %v3480_v3  ;;  %v3485_v13 = vor.u32 %v3901_v4, %v3482_v10 }
  0xc5   : > { %1039 = vst [vmem:[#allocation2 + $0x15c] sm:$0xff] %v1021_v24 }
  0xc6   : > { %1548 = vmatpush.bf16.msra.mxu0 %v3481_v11  ;;  %1605 = vmatpush.bf16.msra.mxu3 %v3485_v13  ;;  %v578_v17 = vpop.permute.xlu1 %577 }
  0xc7   : > { %v588_v18 = vrot.slane %v578_v17, 4  ;;  %v576_v20 = vpop.permute.xlu0 %575 }
  0xc8   : > { %v587_v21 = vrot.slane %v576_v20, 4  ;;  %v574_v12 = vpop.permute.xlu2 %573 }
  0xc9   : > { %v600_v22 = vsel %vm592_vm5, %v578_v17, %v588_v18  ;;  %v586_v29 = vrot.slane %v574_v12, 4 }
  0xca   : > { %617 = vst [vmem:[#allocation2 + $0x80] sm:$0xf] %v600_v22  ;;  %v598_v23 = vsel %vm505_vm0, %v587_v21, %v588_v18 }
  0xcb   : > { %v599_v26 = vsel %vm592_vm5, %v576_v20, %v598_v23  ;;  %v3576_v27 = vld [vmem:[#allocation2 + $0x150] sm:$0xf]  ;;  %v3925_v28 = vld [vmem:[#allocation2 + $0x154] sm:$0xf]  ;;  %v597_v34 = vsel %vm592_vm5, %v574_v12, %v586_v29 }
  0xcc   : > { %616 = vst [vmem:[#allocation2 + $0x78] sm:$0xff] %v599_v26  ;;  %v3926_v30 = vld [vmem:[#allocation2 + $0x158] sm:$0xf0]  ;;  %v3578_v31 = vld [vmem:[#allocation2 + $0x15c] sm:$0xf0] }
  0xcd   : > { %v3577_v32 = vor.u32 %v3926_v30, %v3576_v27  ;;  %v3581_v33 = vor.u32 %v3925_v28, %v3578_v31  ;;  %615 = vst [vmem:[#allocation2 + $0x74] sm:$0xf] %v597_v34 }
  0xce   : > { %v916_v7 = vpop.permute.xlu1 %915 }
  0xcf   : > { %1567 = vmatpush.bf16.msra.mxu1 %v3577_v32  ;;  %1624 = vmatpush.bf16.msrb.mxu2 %v3581_v33  ;;  %v927_v36 = vrot.slane %v916_v7, 4  ;;  %v582_v37 = vpop.permute.xlu0 %581 }
  0xd0   : > { %v590_v38 = vrot.slane %v582_v37, 4  ;;  %v4383_v5 = vpop.permute.xlu2 %911 }
  0xd1   : > { %v938_v39 = vsel %vm505_vm0, %v927_v36, %v928_v56  ;;  %v583_v56 = vrot.slane %v4370_v6, 4  ;;  %v925_v31 = vrot.slane %v4383_v5, 4 }
  0xd2   : > { %v939_v40 = vsel %vm932_vm4, %v916_v7, %v938_v39  ;;  %v601_v41 = vsel %vm505_vm0, %v589_v35, %v590_v38  ;;  %v603_v42 = vsel %vm592_vm5, %v582_v37, %v590_v38 }
  0xd3   : > { %956 = vst [vmem:[#allocation2 + $0x138] sm:$0xff] %v939_v40  ;;  %v602_v16 = vsel %vm592_vm5, %v4345_v45, %v601_v41  ;;  %v3468_v48 = vld [vmem:[#allocation2 + $0x78] sm:$0xf]  ;;  %v3898_v51 = vld [vmem:[#allocation2 + $0x7c] sm:$0xf] }
  0xd4   : > { %618 = vst [vmem:[#allocation2 + $0x84] sm:$0xff] %v602_v16 }
  0xd5   : > { %619 = vst [vmem:[#allocation2 + $0x8c] sm:$0xf] %v603_v42 }
  0xd6   : > { %v922_v43 = vpop.permute.xlu1 %921 }
  0xd7   : > { %v930_v44 = vrot.slane %v922_v43, 4  ;;  %v920_v46 = vpop.permute.xlu0 %919 }
  0xd8   : > { %v929_v15 = vrot.slane %v920_v46, 4  ;;  %v4389_v50 = vpop.permute.xlu2 %491 }
  0xd9   : > { %v943_v47 = vsel %vm932_vm4, %v922_v43, %v930_v44  ;;  %v502_v19 = vrot.slane %v4389_v50, 4  ;;  %v427_v43 = vld [vmem:[%s4147_s28 + $0x40] sm:$0xff] }
  0xda   : > { %959 = vst [vmem:[#allocation2 + $0x14c] sm:$0xf] %v943_v47  ;;  %v941_v49 = vsel %vm505_vm0, %v929_v15, %v930_v44  ;;  %v3564_v0 = vld [vmem:[#allocation2 + $0x138] sm:$0xf]  ;;  %v3922_v1 = vld [vmem:[#allocation2 + $0x13c] sm:$0xf] }
  0xdb   : > { %v942_v52 = vsel %vm932_vm4, %v920_v46, %v941_v49  ;;  %v3899_v53 = vld [vmem:[#allocation2 + $0x80] sm:$0xf0]  ;;  %v3470_v45 = vld [vmem:[#allocation2 + $0x84] sm:$0xf0]  ;;  %v515_v55 = vsel %vm507_vm6, %v4389_v50, %v502_v19 }
  0xdc   : > { %958 = vst [vmem:[#allocation2 + $0x144] sm:$0xff] %v942_v52  ;;  %v3469_v54 = vor.u32 %v3899_v53, %v3468_v48  ;;  %v3473_v14 = vor.u32 %v3898_v51, %v3470_v45  ;;  %v428_v44 = vld [vmem:[%s4147_s28 + $0x48] sm:$0xff]  ;;  %v430_v46 = vld [vmem:[%s4147_s28 + $0x60] sm:$0xff]  ;;  %v3879_v48 = vld [vmem:[%s5285_s2 + $0x10] sm:$0xf0] }
  0xdd   : > { %532 = vst [vmem:[#allocation2 + $0x50] sm:$0xf] %v515_v55  ;;  %v3392_v47 = vld [vmem:[%s5285_s2 + $0x8] sm:$0xf] }
  0xde   : > { %1549 = vmatpush.bf16.msra.mxu0 %v3469_v54  ;;  %1606 = vmatpush.bf16.msra.mxu3 %v3473_v14  ;;  %v572_v57 = vpop.permute.xlu1 %571  ;;  %v431_v49 = vld [vmem:[%s4147_s28 + $0x68] sm:$0xff]  ;;  %v4434_v52 = vor.u32 %v3879_v48, %v3392_v47 }
  0xdf   : > { %v585_v58 = vrot.slane %v572_v57, 4  ;;  %v570_v25 = vpop.permute.xlu0 %569  ;;  %v439_v53 = vpack.c.bf16 %v431_v49, %v430_v46 }
  0xe0   : > { %v584_v59 = vrot.slane %v570_v25, 4  ;;  %v4400_v2 = vpop.permute.xlu2 %830  ;;  %3622 = vmatmul.msk.bf16.vlgmr.msra.gmra.mxu2 %vm1540_vm8, %v4434_v52 }
  0xe1   : > { %v595_v60 = vsel %vm505_vm0, %v585_v58, %v586_v29  ;;  %447 = vst [vmem:[#allocation2 + $0x24] sm:$0xff] %v439_v53 }
  0xe2   : > { %v591_v61 = vsel %vm505_vm0, %v583_v56, %v584_v59  ;;  %v594_v62 = vsel %vm592_vm5, %v570_v25, %v584_v59  ;;  %v596_v63 = vsel %vm592_vm5, %v572_v57, %v595_v60  ;;  %v421_v59 = vld [vmem:[%s4147_s28] sm:$0xff] }
  0xe3   : > { %v593_v24 = vsel %vm592_vm5, %v4370_v6, %v591_v61  ;;  %613 = vst [vmem:[#allocation2 + $0x68] sm:$0xf] %v594_v62  ;;  %v3923_v3 = vld [vmem:[#allocation2 + $0x140] sm:$0xf0]  ;;  %v3566_v4 = vld [vmem:[#allocation2 + $0x144] sm:$0xf0] }
  0xe4   : > { %612 = vst [vmem:[#allocation2 + $0x60] sm:$0xff] %v593_v24  ;;  %v3565_v8 = vor.u32 %v3923_v3, %v3564_v0  ;;  %v3569_v9 = vor.u32 %v3922_v1, %v3566_v4  ;;  %v422_v61 = vld [vmem:[%s4147_s28 + $0x8] sm:$0xff]  ;;  %v424_v62 = vld [vmem:[%s4147_s28 + $0x20] sm:$0xff]  ;;  %v842_v0 = vrot.slane %v4400_v2, 4 }
  0xe5   : > { %614 = vst [vmem:[#allocation2 + $0x6c] sm:$0xff] %v596_v63  ;;  %v425_v63 = vld [vmem:[%s4147_s28 + $0x28] sm:$0xff]  ;;  %v433_v24 = vpack.c.bf16 %v422_v61, %v421_v59 }
  0xe6   : > { %1568 = vmatpush.bf16.msra.mxu1 %v3565_v8  ;;  %1625 = vmatpush.bf16.msrb.mxu2 %v3569_v9  ;;  %v910_v10 = vpop.permute.xlu1 %909  ;;  %v435_v3 = vpack.c.bf16 %v425_v63, %v424_v62 }
  0xe7   : > { %v924_v11 = vrot.slane %v910_v10, 4  ;;  %v908_v13 = vpop.permute.xlu0 %907  ;;  %441 = vst [vmem:[#allocation2] sm:$0xff] %v433_v24 }
  0xe8   : > { %v923_v17 = vrot.slane %v908_v13, 4  ;;  %v4406_v6 = vpop.permute.xlu2 %836  ;;  %443 = vst [vmem:[#allocation2 + $0xc] sm:$0xff] %v435_v3 }
  0xe9   : > { %v934_v18 = vsel %vm932_vm4, %v910_v10, %v924_v11  ;;  %v845_v12 = vrot.slane %v4406_v6, 4 }
  0xea   : > { %953 = vst [vmem:[#allocation2 + $0x128] sm:$0xf] %v934_v18  ;;  %v931_v20 = vsel %vm505_vm0, %v923_v17, %v924_v11 }
  0xeb   : > { %v933_v21 = vsel %vm932_vm4, %v908_v13, %v931_v20  ;;  %v3456_v22 = vld [vmem:[#allocation2 + $0x60] sm:$0xf]  ;;  %v3895_v23 = vld [vmem:[#allocation2 + $0x64] sm:$0xf]  ;;  %v858_v30 = vsel %vm847_vm7, %v4406_v6, %v845_v12 }
  0xec   : > { %952 = vst [vmem:[#allocation2 + $0x120] sm:$0xff] %v933_v21  ;;  %v3896_v26 = vld [vmem:[#allocation2 + $0x68] sm:$0xf0]  ;;  %v3458_v27 = vld [vmem:[#allocation2 + $0x6c] sm:$0xf0] }
  0xed   : > { %v3457_v28 = vor.u32 %v3896_v26, %v3456_v22  ;;  %v3461_v29 = vor.u32 %v3895_v23, %v3458_v27  ;;  %874 = vst [vmem:[#allocation2 + $0x11c] sm:$0xf] %v858_v30 }
  0xee   : > { %v490_v32 = vpop.permute.xlu1 %489 }
  0xef   : > { %1550 = vmatpush.bf16.msra.mxu0 %v3457_v28  ;;  %1607 = vmatpush.bf16.msra.mxu3 %v3461_v29  ;;  %v914_v33 = vpop.permute.xlu0 %913  ;;  %v501_v34 = vrot.slane %v490_v32, 4 }
  0xf0   : > { %v926_v35 = vrot.slane %v914_v33, 4  ;;  %v4419_v39 = vpop.permute.xlu2 %485 }
  0xf1   : > { %v513_v7 = vsel %vm505_vm0, %v501_v34, %v502_v19  ;;  %v3882_v34 = vld [vmem:[%s5285_s2 + $0x28] sm:$0xf0] }
  0xf2   : > { %v935_v36 = vsel %vm505_vm0, %v925_v31, %v926_v35  ;;  %v937_v37 = vsel %vm932_vm4, %v914_v33, %v926_v35  ;;  %v514_v38 = vsel %vm507_vm6, %v490_v32, %v513_v7  ;;  %v3404_v32 = vld [vmem:[%s5285_s2 + $0x20] sm:$0xf] }
  0xf3   : > { %v936_v40 = vsel %vm932_vm4, %v4383_v5, %v935_v36  ;;  %955 = vst [vmem:[#allocation2 + $0x134] sm:$0xf] %v937_v37  ;;  %v437_v5 = vpack.c.bf16 %v428_v44, %v427_v43  ;;  %v3552_v50 = vld [vmem:[#allocation2 + $0x120] sm:$0xf]  ;;  %v3919_v19 = vld [vmem:[#allocation2 + $0x124] sm:$0xf] }
  0xf4   : > { %954 = vst [vmem:[#allocation2 + $0x12c] sm:$0xff] %v936_v40  ;;  %v499_v44 = vrot.slane %v4419_v39, 4 }
  0xf5   : > { %531 = vst [vmem:[#allocation2 + $0x48] sm:$0xff] %v514_v38  ;;  %v4474_v38 = vor.u32 %v3882_v34, %v3404_v32 }
  0xf6   : > { %v496_v41 = vpop.permute.xlu1 %495  ;;  %445 = vst [vmem:[#allocation2 + $0x18] sm:$0xff] %v437_v5 }
  0xf7   : > { %v494_v42 = vpop.permute.xlu0 %493  ;;  %v504_v16 = vrot.slane %v496_v41, 4  ;;  %3623 = vmatmul.msk.bf16.gmra.mxu2 %vm1540_vm8, %v4474_v38 }
  0xf8   : > { %v503_v15 = vrot.slane %v494_v42, 4  ;;  %v4437_v54 = vpop.permute.xlu2 %824 }
  0xf9   : > { %v518_v51 = vsel %vm507_vm6, %v496_v41, %v504_v16  ;;  %v839_v57 = vrot.slane %v4437_v54, 4 }
  0xfa   : > { %v516_v45 = vsel %vm505_vm0, %v503_v15, %v504_v16  ;;  %534 = vst [vmem:[#allocation2 + $0x5c] sm:$0xf] %v518_v51 }
  0xfb   : > { %v517_v14 = vsel %vm507_vm6, %v494_v42, %v516_v45  ;;  %v3920_v55 = vld [vmem:[#allocation2 + $0x128] sm:$0xf0]  ;;  %v3554_v56 = vld [vmem:[#allocation2 + $0x12c] sm:$0xf0]  ;;  %v849_v60 = vsel %vm847_vm7, %v4437_v54, %v839_v57 }
  0xfc   : > { %533 = vst [vmem:[#allocation2 + $0x54] sm:$0xff] %v517_v14  ;;  %v3553_v58 = vor.u32 %v3920_v55, %v3552_v50  ;;  %v3557_v25 = vor.u32 %v3919_v19, %v3554_v56  ;;  %v3444_v18 = vld [vmem:[#allocation2 + $0x48] sm:$0xf]  ;;  %v3892_v20 = vld [vmem:[#allocation2 + $0x4c] sm:$0xf] }
  0xfd   : > { %868 = vst [vmem:[#allocation2 + $0xf8] sm:$0xf] %v849_v60  ;;  %v3420_v56 = vld [vmem:[#allocation2 + $0x18] sm:$0xf]  ;;  %v3422_v60 = vld [vmem:[#allocation2 + $0x24] sm:$0xf0] }
  0xfe   : > { %1569 = vmatpush.bf16.msra.mxu1 %v3553_v58  ;;  %1626 = vmatpush.bf16.msrb.mxu2 %v3557_v25  ;;  %v835_v1 = vpop.permute.xlu1 %834  ;;  %v3886_v58 = vld [vmem:[#allocation2 + $0x1c] sm:$0xf] }
  0xff   : > { %v833_v4 = vpop.permute.xlu0 %832  ;;  %v844_v8 = vrot.slane %v835_v1, 4 }
 0x100   : > { %v843_v9 = vrot.slane %v833_v4, 4  ;;  %v4458_v21 = vpop.permute.xlu2 %745 }
 0x101   : > { %v856_v10 = vsel %vm505_vm0, %v844_v8, %v845_v12  ;;  %v757_v24 = vrot.slane %v4458_v21, 4  ;;  %v3425_v8 = vor.u32 %v3886_v58, %v3422_v60  ;;  %v4060_v60 = vmov 0  }
 0x102   : > { %v853_v11 = vsel %vm505_vm0, %v842_v0, %v843_v9  ;;  %v855_v13 = vsel %vm847_vm7, %v833_v4, %v843_v9  ;;  %v857_v17 = vsel %vm847_vm7, %v835_v1, %v856_v10  ;;  %v3408_v9 = vld [vmem:[#allocation2] sm:$0xf]  ;;  %v3884_v10 = vld [vmem:[#allocation2 + $0x8] sm:$0xf0]  ;;  %4024 = vset.pattern.permute.xlu1 %v4060_v60  ;;  %4026 = vset.pattern.permute.xlu0 %v4060_v60 }
 0x103   : > { %v854_v22 = vsel %vm847_vm7, %v4400_v2, %v853_v11  ;;  %872 = vst [vmem:[#allocation2 + $0x110] sm:$0xf] %v855_v13  ;;  %v3893_v23 = vld [vmem:[#allocation2 + $0x50] sm:$0xf0]  ;;  %v3446_v26 = vld [vmem:[#allocation2 + $0x54] sm:$0xf0]  ;;  %4025 = vset.pattern.permute.xlu2 %v4060_v60 }
 0x104   : > { %871 = vst [vmem:[#allocation2 + $0x108] sm:$0xff] %v854_v22  ;;  %v3445_v6 = vor.u32 %v3893_v23, %v3444_v18  ;;  %v3449_v12 = vor.u32 %v3892_v20, %v3446_v26  ;;  %v3883_v18 = vld [vmem:[#allocation2 + $0x4] sm:$0xf]  ;;  %v3410_v20 = vld [vmem:[#allocation2 + $0xc] sm:$0xf0]  ;;  %v3409_v23 = vor.u32 %v3884_v10, %v3408_v9 }
 0x105   : > { %873 = vst [vmem:[#allocation2 + $0x114] sm:$0xff] %v857_v17  ;;  %v3934_v26 = vld [vmem:[#allocation2 + $0x19c] sm:$0xf] }
 0x106   : > { %1551 = vmatpush.bf16.msra.mxu0 %v3445_v6  ;;  %1608 = vmatpush.bf16.msra.mxu3 %v3449_v12  ;;  %v484_v27 = vpop.permute.xlu1 %483  ;;  %v3614_v6 = vld [vmem:[#allocation2 + $0x1a4] sm:$0xf0]  ;;  %v3930_v12 = vld [vmem:[#allocation2 + $0x178] sm:$0xf0] }
 0x107   : > { %v498_v28 = vrot.slane %v484_v27, 4  ;;  %v482_v29 = vpop.permute.xlu0 %481 }
 0x108   : > { %v497_v30 = vrot.slane %v482_v29, 4  ;;  %v4467_v33 = vpop.permute.xlu2 %751 }
 0x109   : > { %v509_v31 = vsel %vm507_vm6, %v484_v27, %v498_v28  ;;  %v760_v37 = vrot.slane %v4467_v33, 4  ;;  %v3384_v27 = vld [vmem:[%s5285_s2] sm:$0xf] }
 0x10a   : > { %528 = vst [vmem:[#allocation2 + $0x38] sm:$0xf] %v509_v31  ;;  %v506_v2 = vsel %vm505_vm0, %v497_v30, %v498_v28 }
 0x10b   : > { %v508_v35 = vsel %vm507_vm6, %v482_v29, %v506_v2  ;;  %v3540_v7 = vld [vmem:[#allocation2 + $0x108] sm:$0xf]  ;;  %v3916_v36 = vld [vmem:[#allocation2 + $0x10c] sm:$0xf]  ;;  %v773_v43 = vsel %vm762_vm9, %v4467_v33, %v760_v37 }
 0x10c   : > { %527 = vst [vmem:[#allocation2 + $0x30] sm:$0xff] %v508_v35  ;;  %v3917_v40 = vld [vmem:[#allocation2 + $0x110] sm:$0xf0]  ;;  %v3542_v41 = vld [vmem:[#allocation2 + $0x114] sm:$0xf0]  ;;  %v3413_v35 = vor.u32 %v3883_v18, %v3410_v20 }
 0x10d   : > { %v3541_v42 = vor.u32 %v3917_v40, %v3540_v7  ;;  %v3545_v16 = vor.u32 %v3916_v36, %v3542_v41  ;;  %789 = vst [vmem:[#allocation2 + $0xec] sm:$0xf] %v773_v43  ;;  %v3878_v2 = vld [vmem:[%s5285_s2 + $0x8] sm:$0xf0]  ;;  %v3596_v40 = vld [vmem:[#allocation2 + $0x170] sm:$0xf] }
 0x10e   : > { %v823_v46 = vpop.permute.xlu1 %822  ;;  %v4505_v41 = vor.u32 %v3878_v2, %v3384_v27  ;;  %v3597_v43 = vor.u32 %v3930_v12, %v3596_v40  ;;  %v3620_v2 = vld [vmem:[#allocation2 + $0x1a0] sm:$0xf] }
 0x10f   : > { %1570 = vmatpush.bf16.msra.mxu1 %v3541_v42  ;;  %1627 = vmatpush.bf16.msrb.mxu2 %v3545_v16  ;;  %v838_v15 = vrot.slane %v823_v46, 4  ;;  %v488_v47 = vpop.permute.xlu0 %487  ;;  %v3617_v16 = vor.u32 %v3934_v26, %v3614_v6  ;;  %v423_v26 = vld [vmem:[%s4147_s28 + $0x10] sm:$0xff] }
 0x110   : > { %v500_v48 = vrot.slane %v488_v47, 4  ;;  %v426_v6 = vld [vmem:[%s4147_s28 + $0x30] sm:$0xff]  ;;  %v434_v27 = vpack.c.bf16 %v423_v26, %v423_v26 }
 0x111   : > { %v846_v49 = vsel %vm505_vm0, %v838_v15, %v839_v57  ;;  %v3887_v57 = vld [vmem:[#allocation2 + $0x20] sm:$0xf0]  ;;  %v3584_v15 = vld [vmem:[#allocation2 + $0x158] sm:$0xf] }
 0x112   : > { %v848_v5 = vsel %vm847_vm7, %v823_v46, %v846_v49  ;;  %v510_v51 = vsel %vm505_vm0, %v499_v44, %v500_v48  ;;  %v512_v50 = vsel %vm507_vm6, %v488_v47, %v500_v48  ;;  %v3421_v4 = vor.u32 %v3887_v57, %v3420_v56  ;;  %v3602_v44 = vld [vmem:[#allocation2 + $0x18c] sm:$0xf0]  ;;  %v3927_v47 = vld [vmem:[#allocation2 + $0x160] sm:$0xf0]  ;;  %v742_v57 = vpop.permute.xlu2 %741  ;;  %442 = vst [vmem:[#allocation2 + $0x8] sm:$0xf] %v434_v27 }
 0x113   : > { %867 = vst [vmem:[#allocation2 + $0xf0] sm:$0xff] %v848_v5  ;;  %v511_v53 = vsel %vm507_vm6, %v4419_v39, %v510_v51  ;;  %v3432_v59 = vld [vmem:[#allocation2 + $0x30] sm:$0xf]  ;;  %v3889_v39 = vld [vmem:[#allocation2 + $0x34] sm:$0xf] }
 0x114   : > { %529 = vst [vmem:[#allocation2 + $0x3c] sm:$0xff] %v511_v53  ;;  %v3931_v5 = vld [vmem:[#allocation2 + $0x184] sm:$0xf]  ;;  %v3924_v51 = vld [vmem:[#allocation2 + $0x148] sm:$0xf0] }
 0x115   : > { %530 = vst [vmem:[#allocation2 + $0x44] sm:$0xf] %v512_v50  ;;  %v3605_v53 = vor.u32 %v3931_v5, %v3602_v44  ;;  %v3903_v5 = vld [vmem:[#allocation2 + $0xa0] sm:$0xf0] }
 0x116   : > { %v829_v45 = vpop.permute.xlu1 %828 }
 0x117   : > { %v841_v19 = vrot.slane %v829_v45, 4  ;;  %v827_v14 = vpop.permute.xlu0 %826 }
 0x118   : > { %v840_v55 = vrot.slane %v827_v14, 4 }
 0x119   : > { %v852_v54 = vsel %vm847_vm7, %v829_v45, %v841_v19  ;;  %v3585_v45 = vor.u32 %v3927_v47, %v3584_v15 }
 0x11a   : > { %870 = vst [vmem:[#allocation2 + $0x104] sm:$0xf] %v852_v54  ;;  %v850_v25 = vsel %vm505_vm0, %v840_v55, %v841_v19  ;;  %v3528_v31 = vld [vmem:[#allocation2 + $0xf0] sm:$0xf]  ;;  %v3913_v32 = vld [vmem:[#allocation2 + $0xf4] sm:$0xf] }
 0x11b   : > { %v851_v61 = vsel %vm847_vm7, %v827_v14, %v850_v25  ;;  %v3890_v62 = vld [vmem:[#allocation2 + $0x38] sm:$0xf0]  ;;  %v3434_v63 = vld [vmem:[#allocation2 + $0x3c] sm:$0xf0] }
 0x11c   : > { %869 = vst [vmem:[#allocation2 + $0xfc] sm:$0xff] %v851_v61  ;;  %v3433_v0 = vor.u32 %v3890_v62, %v3432_v59  ;;  %v3437_v1 = vor.u32 %v3889_v39, %v3434_v63  ;;  %v3572_v59 = vld [vmem:[#allocation2 + $0x140] sm:$0xf]  ;;  %v755_v61 = vrot.slane %v742_v57, 4  ;;  %v3921_v63 = vld [vmem:[#allocation2 + $0x130] sm:$0xf0] }
 0x11d   : > { %v3573_v62 = vor.u32 %v3924_v51, %v3572_v59  ;;  %v3933_v51 = vld [vmem:[#allocation2 + $0x190] sm:$0xf0] }
 0x11e   : > { %1552 = vmatpush.bf16.msra.mxu0 %v3433_v0  ;;  %1609 = vmatpush.bf16.msra.mxu3 %v3437_v1  ;;  %v750_v3 = vpop.permute.xlu1 %749  ;;  %v4027_v0 = vld [vmem:[#allocation4] ss:$0 sm:$0xff]  ;;  %v3897_v59 = vld [vmem:[#allocation2 + $0x70] sm:$0xf0] }
 0x11f   : > { %v759_v11 = vrot.slane %v750_v3, 4  ;;  %v748_v13 = vpop.permute.xlu0 %747  ;;  %1733 = vperm.xlu1 %4024, %v4027_v0   ;;  %v3452_v0 = vld [vmem:[#allocation2 + $0x50] sm:$0xf] }
 0x120   : > { %v758_v17 = vrot.slane %v748_v13, 4 }
 0x121   : > { %v771_v22 = vsel %vm505_vm0, %v759_v11, %v760_v37 }
 0x122   : > { %v772_v28 = vsel %vm762_vm9, %v750_v3, %v771_v22  ;;  %v768_v29 = vsel %vm505_vm0, %v757_v24, %v758_v17  ;;  %v770_v30 = vsel %vm762_vm9, %v748_v13, %v758_v17  ;;  %1553 = vmatpush.bf16.msra.mxu0 %v3421_v4  ;;  %1610 = vmatpush.bf16.msra.mxu3 %v3425_v8  ;;  %v429_v24 = vld [vmem:[%s4147_s28 + $0x50] sm:$0xff]  ;;  %v3560_v4 = vld [vmem:[#allocation2 + $0x128] sm:$0xf]  ;;  %v3396_v13 = vld [vmem:[%s5285_s2 + $0x18] sm:$0xf] }
 0x123   : > { %788 = vst [vmem:[#allocation2 + $0xe4] sm:$0xff] %v772_v28  ;;  %v769_v33 = vsel %vm762_vm9, %v4458_v21, %v768_v29  ;;  %v3914_v34 = vld [vmem:[#allocation2 + $0xf8] sm:$0xf0]  ;;  %v3530_v7 = vld [vmem:[#allocation2 + $0xfc] sm:$0xf0]  ;;  %v432_v3 = vld [vmem:[%s4147_s28 + $0x70] sm:$0xff]  ;;  %v438_v8 = vpack.c.bf16 %v429_v24, %v429_v24  ;;  %v3561_v11 = vor.u32 %v3921_v63, %v3560_v4  ;;  %v436_v28 = vpack.c.bf16 %v426_v6, %v426_v6 }
 0x124   : > { %786 = vst [vmem:[#allocation2 + $0xd8] sm:$0xff] %v769_v33  ;;  %v3529_v36 = vor.u32 %v3914_v34, %v3528_v31  ;;  %v3533_v37 = vor.u32 %v3913_v32, %v3530_v7  ;;  %v3881_v17 = vld [vmem:[%s5285_s2 + $0x20] sm:$0xf0]  ;;  %v440_v18 = vpack.c.bf16 %v432_v3, %v432_v3  ;;  %v3548_v22 = vld [vmem:[#allocation2 + $0x110] sm:$0xf] }
 0x125   : > { %787 = vst [vmem:[#allocation2 + $0xe0] sm:$0xf] %v770_v30  ;;  %v4528_v12 = vor.u32 %v3881_v17, %v3396_v13  ;;  %v3915_v30 = vld [vmem:[#allocation2 + $0x100] sm:$0xf0]  ;;  %v3500_v31 = vld [vmem:[#allocation2 + $0xb0] sm:$0xf] }
 0x126   : > { %1554 = vmatpush.bf16.msra.mxu0 %v3409_v23  ;;  %1571 = vmatpush.bf16.msra.mxu1 %v3529_v36  ;;  %v740_v42 = vpop.permute.xlu1 %739  ;;  %v3918_v23 = vld [vmem:[#allocation2 + $0x118] sm:$0xf0]  ;;  %446 = vst [vmem:[#allocation2 + $0x20] sm:$0xf] %v438_v8  ;;  %v3936_v33 = vld [vmem:[#allocation2 + $0x1a8] sm:$0xf0] }
 0x127   : > { %1611 = vmatpush.bf16.msra.mxu3 %v3413_v35  ;;  %1628 = vmatpush.bf16.msrb.mxu2 %v3533_v37  ;;  %v754_v46 = vrot.slane %v740_v42, 4  ;;  %v738_v21 = vpop.permute.xlu0 %737  ;;  %v3549_v29 = vor.u32 %v3918_v23, %v3548_v22  ;;  %448 = vst [vmem:[#allocation2 + $0x2c] sm:$0xf] %v440_v18  ;;  %v3906_v32 = vld [vmem:[#allocation2 + $0xb8] sm:$0xf0]  ;;  %v3621_v47 = vor.u32 %v3936_v33, %v3620_v2 }
 0x128   : > { %v753_v48 = vrot.slane %v738_v21, 4  ;;  %444 = vst [vmem:[#allocation2 + $0x14] sm:$0xf] %v436_v28  ;;  %v3536_v34 = vld [vmem:[#allocation2 + $0xf8] sm:$0xf]  ;;  %v3501_v15 = vor.u32 %v3906_v32, %v3500_v31 }
 0x129   : > { %v764_v49 = vsel %vm762_vm9, %v740_v42, %v754_v46  ;;  %1555 = vmatmul.bf16.vlgmr.msra.gmra.mxu0 %v4505_v41  ;;  %v3912_v35 = vld [vmem:[#allocation2 + $0xe8] sm:$0xf0]  ;;  %v3877_v7 = vld [vmem:[%s5285_s2 + $0x4] sm:$0xf]  ;;  %v3537_v36 = vor.u32 %v3915_v30, %v3536_v34  ;;  %v3386_v42 = vld [vmem:[%s5285_s2 + $0xc] sm:$0xf0] }
 0x12a   : > { %1648 = vmatpush.bf16.msrb.mxu0 %v3617_v16  ;;  %783 = vst [vmem:[#allocation2 + $0xc8] sm:$0xf] %v764_v49  ;;  %v761_v50 = vsel %vm505_vm0, %v753_v48, %v754_v46  ;;  %v3911_v19 = vld [vmem:[#allocation2 + $0xe0] sm:$0xf0]  ;;  %v3518_v14 = vld [vmem:[#allocation2 + $0xe4] sm:$0xf0]  ;;  %1612 = vmatmul.bf16.vlgmr.msra.gmra.mxu3 %v4505_v41  ;;  %v3389_v48 = vor.u32 %v3877_v7, %v3386_v42 }
 0x12b   : > { %1680 = vmatpush.bf16.msrb.mxu3 %v3597_v43  ;;  %v763_v55 = vsel %vm762_vm9, %v738_v21, %v761_v50  ;;  %v3516_v54 = vld [vmem:[#allocation2 + $0xd8] sm:$0xf]  ;;  %v3910_v56 = vld [vmem:[#allocation2 + $0xdc] sm:$0xf]  ;;  %v3398_v63 = vld [vmem:[%s5285_s2 + $0x24] sm:$0xf0] }
 0x12c   : > { %782 = vst [vmem:[#allocation2 + $0xc0] sm:$0xff] %v763_v55  ;;  %v3517_v58 = vor.u32 %v3911_v19, %v3516_v54  ;;  %v3521_v25 = vor.u32 %v3910_v56, %v3518_v14  ;;  %v3524_v40 = vld [vmem:[#allocation2 + $0xe0] sm:$0xf]  ;;  %v3900_v56 = vld [vmem:[#allocation2 + $0x88] sm:$0xf0]  ;;  %v1213_v34 = vld [vmem:[%s5286_s3 + $0x18] sm:$0xff] }
 0x12d   : > { %v3525_v49 = vor.u32 %v3912_v35, %v3524_v40  ;;  %v3891_v3 = vld [vmem:[#allocation2 + $0x40] sm:$0xf0]  ;;  %v3440_v4 = vld [vmem:[#allocation2 + $0x38] sm:$0xf]  ;;  %v3428_v8 = vld [vmem:[#allocation2 + $0x20] sm:$0xf] }
 0x12e   : > { %1649 = vmatpush.bf16.msrb.mxu0 %v3605_v53  ;;  %1572 = vmatpush.bf16.msra.mxu1 %v3517_v58  ;;  %v3488_v53 = vld [vmem:[#allocation2 + $0x98] sm:$0xf]  ;;  %v3416_v13 = vld [vmem:[#allocation2 + $0x8] sm:$0xf]  ;;  %v4572_v42 = vld [vmem:[%s5284_s1] sm:$0x7] }
 0x12f   : > { %1681 = vmatpush.bf16.msrb.mxu3 %v3585_v45  ;;  %1629 = vmatpush.bf16.msrb.mxu2 %v3521_v25  ;;  %v744_v39 = vpop.permute.xlu0 %743  ;;  %v3608_v45 = vld [vmem:[#allocation2 + $0x188] sm:$0xf]  ;;  %v3489_v19 = vor.u32 %v3903_v5, %v3488_v53  ;;  %v3885_v17 = vld [vmem:[#allocation2 + $0x10] sm:$0xf0] }
 0x130   : > { %v756_v1 = vrot.slane %v744_v39, 4  ;;  %v3609_v55 = vor.u32 %v3933_v51, %v3608_v45  ;;  %v3464_v25 = vld [vmem:[#allocation2 + $0x68] sm:$0xf]  ;;  %v3417_v18 = vor.u32 %v3885_v17, %v3416_v13 }
 0x131   : > { %v3512_v14 = vld [vmem:[#allocation2 + $0xc8] sm:$0xf] }
 0x132   : > { %v765_v9 = vsel %vm505_vm0, %v755_v61, %v756_v1  ;;  %v767_v10 = vsel %vm762_vm9, %v744_v39, %v756_v1  ;;  %v3465_v61 = vor.u32 %v3897_v59, %v3464_v25  ;;  %v3880_v39 = vld [vmem:[%s5285_s2 + $0x1c] sm:$0xf] }
 0x133   : > { %1682 = vmatpush.bf16.msrb.mxu3 %v3573_v62  ;;  %v766_v20 = vsel %vm762_vm9, %v742_v57, %v765_v9  ;;  %785 = vst [vmem:[#allocation2 + $0xd4] sm:$0xf] %v767_v10  ;;  %v3504_v37 = vld [vmem:[#allocation2 + $0xc0] sm:$0xf]  ;;  %v3907_v43 = vld [vmem:[#allocation2 + $0xc4] sm:$0xf]  ;;  %v3401_v24 = vor.u32 %v3880_v39, %v3398_v63  ;;  %v3441_v10 = vor.u32 %v3891_v3, %v3440_v4 }
 0x134   : > { %784 = vst [vmem:[#allocation2 + $0xcc] sm:$0xff] %v766_v20  ;;  %v3476_v57 = vld [vmem:[#allocation2 + $0x80] sm:$0xf]  ;;  %v3894_v62 = vld [vmem:[#allocation2 + $0x58] sm:$0xf0] }
 0x135   : > { %v3477_v58 = vor.u32 %v3900_v56, %v3476_v57  ;;  %v3453_v1 = vor.u32 %v3894_v62, %v3452_v0  ;;  %v3888_v9 = vld [vmem:[#allocation2 + $0x28] sm:$0xf0]  ;;  %v1217_v57 = vld [vmem:[%s5286_s3 + $0x38] sm:$0xff] }
 0x137   : > { %1683 = vmatpush.bf16.msrb.mxu3 %v3561_v11  ;;  %v3429_v11 = vor.u32 %v3888_v9, %v3428_v8 }
 0x139   : > { %1560 = vmatmul.bf16.gmra.mxu0 %v4528_v12 }
 0x13a   : > { %1617 = vmatmul.bf16.gmra.mxu3 %v4528_v12  ;;  %v3909_v50 = vld [vmem:[#allocation2 + $0xd0] sm:$0xf0] }
 0x13b   : > { %1684 = vmatpush.bf16.msrb.mxu3 %v3549_v29  ;;  %v3908_v16 = vld [vmem:[#allocation2 + $0xc8] sm:$0xf0]  ;;  %v3506_v44 = vld [vmem:[#allocation2 + $0xcc] sm:$0xf0]  ;;  %v3513_v54 = vor.u32 %v3909_v50, %v3512_v14  ;;  %v1210_v29 = vld [vmem:[%s5286_s3] sm:$0xff] }
 0x13c   : > { %v3505_v46 = vor.u32 %v3908_v16, %v3504_v37  ;;  %v3509_v21 = vor.u32 %v3907_v43, %v3506_v44  ;;  %v1216_v50 = vld [vmem:[%s5286_s3 + $0x30] sm:$0xff] }
 0x13e   : > { %1573 = vmatpush.bf16.msra.mxu1 %v3505_v46  ;;  %1630 = vmatpush.bf16.msrb.mxu2 %v3509_v21 }
 0x13f   : > { %1685 = vmatpush.bf16.msrb.mxu3 %v3537_v36 }
 0x141   : > { %1574 = vmatmul.bf16.vlgmr.msra.gmra.mxu1 %v3389_v48  ;;  %1631 = vmatmul.bf16.vlgmr.msrb.gmra.mxu2 %v3389_v48 }
 0x142   : > { %1661 = vmatpush.bf16.msrb.mxu1 %v3501_v15  ;;  %1705 = vmatpush.bf16.msra.mxu2 %v3621_v47  ;;  %v1214_v15 = vld [vmem:[%s5286_s3 + $0x20] sm:$0xff]  ;;  %v4579_v47 = vperm.slane %v4572_v42, 0 }
 0x143   : > { %1686 = vmatpush.bf16.msrb.mxu3 %v3525_v49 }
 0x146   : > { %1662 = vmatpush.bf16.msrb.mxu1 %v3489_v19  ;;  %1706 = vmatpush.bf16.msra.mxu2 %v3609_v55 }
 0x147   : > { %1687 = vmatpush.bf16.msrb.mxu3 %v3513_v54 }
 0x149   : > { %3624 = vmatmul.msk.bf16.vlgmr.msrb.gmra.mxu0 %vm1540_vm8, %v4434_v52 }
 0x14a   : > { %1663 = vmatpush.bf16.msrb.mxu1 %v3477_v58  ;;  %1688 = vmatmul.bf16.vlgmr.msrb.gmra.mxu3 %v3389_v48  ;;  %v4582_v48 = vperm.slane %v4572_v42, 1 }
 0x14e   : > { %1664 = vmatpush.bf16.msrb.mxu1 %v3465_v61 }
 0x151   : > { %1579 = vmatmul.bf16.gmra.mxu1 %v3401_v24  ;;  %1636 = vmatmul.bf16.gmra.mxu2 %v3401_v24 }
 0x152   : > { %1665 = vmatpush.bf16.msrb.mxu1 %v3453_v1 }
 0x156   : > { %1666 = vmatpush.bf16.msrb.mxu1 %v3441_v10 }
 0x159   : > { %3625 = vmatmul.msk.bf16.gmra.mxu0 %vm1540_vm8, %v4474_v38 }
 0x15a   : > { %1667 = vmatpush.bf16.msrb.mxu1 %v3429_v11  ;;  %1693 = vmatmul.bf16.gmra.mxu3 %v3401_v24 }
 0x15e   : > { %1668 = vmatpush.bf16.msrb.mxu1 %v3417_v18 }
 0x161   : > { %1669 = vmatmul.bf16.vlgmr.msrb.gmra.mxu1 %v4505_v41  ;;  %3626 = vmatmul.msk.bf16.vlgmr.msra.gmra.mxu2 %vm1540_vm8, %v4434_v52 }
 0x163   : > { %v1594_v20 = vpop.f32.mrf.mxu2 }
 0x16b   : > { %v1596_v23 = vpop.f32.mrf.mxu2 }
 0x171   : > { %3627 = vmatmul.msk.bf16.gmra.mxu2 %vm1540_vm8, %v4474_v38  ;;  %1674 = vmatmul.bf16.gmra.mxu1 %v4528_v12  ;;  %v1211_v38 = vld [vmem:[%s5286_s3 + $0x8] sm:$0xff] }
 0x17a   : > { %v1599_v27 = vpop.f32.mrf.mxu2 }
 0x182   : > { %v4557_v30 = vpop.f32.mrf.mxu2 }
 0x191   : > { %v4567_v35 = vpop.permute.xlu1 %1733 }
 0x1a6   : > { %v1556_v22 = vpop.f32.mrf.mxu0 }
 0x1a7   : > { %v1557_v52 = vadd.f32 %v1556_v22, %v1210_v29 }
 0x1ad   : > { %v1613_v6 = vpop.f32.mrf.mxu3 }
 0x1ae   : > { %v1558_v26 = vpop.f32.mrf.mxu0  ;;  %v1614_v2 = vadd.f32 %v1613_v6, %v1211_v38 }
 0x1af   : > { %v1559_v36 = vadd.f32 %v1558_v26, %v1213_v34 }
 0x1b5   : > { %v1615_v41 = vpop.f32.mrf.mxu3 }
 0x1b6   : > { %v1561_v28 = vpop.f32.mrf.mxu0  ;;  %v1616_v53 = vadd.f32 %v1615_v41, %v1214_v15  ;;  %v1212_v41 = vld [vmem:[%s5286_s3 + $0x10] sm:$0xff] }
 0x1b7   : > { %v1562_v54 = vadd.f32 %v1561_v28, %v1216_v50  ;;  %v1220_v28 = vld [vmem:[%s5286_s3 + $0x50] sm:$0xff] }
 0x1bd   : > { %v1618_v40 = vpop.f32.mrf.mxu3 }
 0x1be   : > { %v4562_v12 = vpop.f32.mrf.mxu0  ;;  %v1575_v31 = vpop.f32.mrf.mxu1  ;;  %v1619_v63 = vadd.f32 %v1618_v40, %v1217_v57 }
 0x1bf   : > { %v1576_v32 = vadd.f32 %v1575_v31, %v1557_v52  ;;  %v1219_v31 = vld [vmem:[%s5286_s3 + $0x48] sm:$0xff] }
 0x1c1   : > { %v1595_v33 = vadd.f32 %v1594_v20, %v1576_v32 }
 0x1c3   : > { %v1736_v16 = vmul.f32 %v4567_v35, %v1595_v33  ;;  %vm1718_vm10 = vcmp.gt.f32.partialorder %v1595_v33, 0.0 }
 0x1c4   : > { %v1632_v7 = vpop.f32.mrf.mxu2 }
 0x1c5   : > { %v1633_v37 = vadd.f32 %v1632_v7, %v1614_v2  ;;  %v1748_v51 = vsel %vm1718_vm10, %v1595_v33, %v1736_v16  ;;  %v1620_v0 = vpop.f32.mrf.mxu3  ;;  %v1564_v7 = vadd.f32 %v4562_v12, %v1219_v31  ;;  %vm1779_vm10 = vcmask 150528  }
 0x1c6   : > { %v1577_v43 = vpop.f32.mrf.mxu1  ;;  %v1651_v44 = vpop.f32.mrf.mxu0  ;;  %v1767_v14 = vmul.f32 %v4579_v47, %v1748_v51  ;;  %v1621_v33 = vadd.f32 %v1620_v0, %v1220_v28  ;;  %1781 = vst.msk [vmem:[#allocation3 + $0x10] sm:$0xf] %vm1779_vm10, %v4060_v60 }
 0x1c7   : > { %v1578_v46 = vadd.f32 %v1577_v43, %v1559_v36  ;;  %v1652_v21 = vadd.f32 %v1651_v44, %v1633_v37  ;;  %1780 = vst.msk [vmem:[#allocation3] sm:$0xf] %vm1779_vm10, %v4060_v60 }
 0x1c8   : > { %1782 = vst.msk [vmem:[#allocation3 + $0x20] sm:$0xf] %vm1779_vm10, %v4060_v60 }
 0x1c9   : > { %v1597_v49 = vadd.f32 %v1596_v23, %v1578_v46  ;;  %vm1719_vm11 = vcmp.gt.f32.partialorder %v1652_v21, 0.0  ;;  %v1737_v5 = vmul.f32 %v4567_v35, %v1652_v21  ;;  %v1215_v46 = vld [vmem:[%s5286_s3 + $0x28] sm:$0xff]  ;;  %1783 = vst.msk [vmem:[#allocation3 + $0x30] sm:$0xf] %vm1779_vm10, %v4060_v60 }
 0x1cb   : > { %v1749_v45 = vsel %vm1719_vm11, %v1652_v21, %v1737_v5  ;;  %v1739_v56 = vmul.f32 %v4567_v35, %v1597_v49  ;;  %vm1721_vm12 = vcmp.gt.f32.partialorder %v1597_v49, 0.0  ;;  %v4618_v5 = vperm.slane %v4572_v42, 2 }
 0x1cc   : > { %v1634_v19 = vpop.f32.mrf.mxu2  ;;  %v1768_v55 = vmul.f32 %v4582_v48, %v1749_v45 }
 0x1cd   : > { %v1635_v58 = vadd.f32 %v1634_v19, %v1616_v53  ;;  %v1751_v3 = vsel %vm1721_vm12, %v1597_v49, %v1739_v56  ;;  %v1689_v6 = vpop.f32.mrf.mxu3 }
 0x1ce   : > { %v1580_v25 = vpop.f32.mrf.mxu1  ;;  %v1653_v59 = vpop.f32.mrf.mxu0  ;;  %v1789_v61 = vpack.c.bf16 %v1768_v55, %v1767_v14  ;;  %v1770_v9 = vmul.f32 %v4579_v47, %v1751_v3 }
 0x1cf   : > { %v1581_v62 = vadd.f32 %v1580_v25, %v1562_v54  ;;  %v1654_v39 = vadd.f32 %v1653_v59, %v1635_v58  ;;  %v1218_v54 = vld [vmem:[%s5286_s3 + $0x40] sm:$0xff] }
 0x1d0   : > { %1805 = vrot.lane.b32.xlu0 %v1789_v61, %s4061_s21 }
 0x1d1   : > { %v1600_v1 = vadd.f32 %v1599_v27, %v1581_v62  ;;  %vm1722_vm13 = vcmp.gt.f32.partialorder %v1654_v39, 0.0  ;;  %v1740_v24 = vmul.f32 %v4567_v35, %v1654_v39 }
 0x1d3   : > { %v1752_v4 = vsel %vm1722_vm13, %v1654_v39, %v1740_v24  ;;  %v1742_v11 = vmul.f32 %v4567_v35, %v1600_v1  ;;  %vm1724_vm14 = vcmp.gt.f32.partialorder %v1600_v1, 0.0 }
 0x1d4   : > { %v1637_v8 = vpop.f32.mrf.mxu2  ;;  %v1771_v10 = vmul.f32 %v4582_v48, %v1752_v4 }
 0x1d5   : > { %v1638_v13 = vadd.f32 %v1637_v8, %v1619_v63  ;;  %v1754_v26 = vsel %vm1724_vm14, %v1600_v1, %v1742_v11  ;;  %v1691_v43 = vpop.f32.mrf.mxu3 }
 0x1d6   : > { %v1582_v17 = vpop.f32.mrf.mxu1  ;;  %v1656_v18 = vpop.f32.mrf.mxu0  ;;  %v1791_v20 = vpack.c.bf16 %v1771_v10, %v1770_v9  ;;  %v1773_v52 = vmul.f32 %v4579_v47, %v1754_v26  ;;  %v1221_v9 = vld [vmem:[%s5286_s3 + $0x58] sm:$0xff] }
 0x1d7   : > { %v1657_v22 = vadd.f32 %v1656_v18, %v1638_v13  ;;  %v1583_v16 = vadd.f32 %v1582_v17, %v1564_v7 }
 0x1d8   : > { %1809 = vrot.lane.b32.xlu2 %v1791_v20, %s4061_s21 }
 0x1d9   : > { %vm1725_vm15 = vcmp.gt.f32.partialorder %v1657_v22, 0.0  ;;  %v1743_v23 = vmul.f32 %v4567_v35, %v1657_v22  ;;  %v1602_v51 = vadd.f32 %v4557_v30, %v1583_v16 }
 0x1db   : > { %v1755_v27 = vsel %vm1725_vm15, %v1657_v22, %v1743_v23  ;;  %v1745_v30 = vmul.f32 %v4567_v35, %v1602_v51  ;;  %vm1727_vm13 = vcmp.gt.f32.partialorder %v1602_v51, 0.0 }
 0x1dc   : > { %v1639_v29 = vpop.f32.mrf.mxu2  ;;  %v1774_v38 = vmul.f32 %v4582_v48, %v1755_v27 }
 0x1dd   : > { %v1640_v36 = vadd.f32 %v1639_v29, %v1621_v33  ;;  %v1694_v56 = vpop.f32.mrf.mxu3  ;;  %v1757_v62 = vsel %vm1727_vm13, %v1602_v51, %v1745_v30  ;;  %vm1829_vm13 = vcmask 154624  }
 0x1de   : > { %v1670_v32 = vpop.f32.mrf.mxu1  ;;  %v1793_v2 = vpack.c.bf16 %v1774_v38, %v1773_v52  ;;  %v1658_v40 = vpop.f32.mrf.mxu0  ;;  %v1776_v1 = vmul.f32 %v4579_v47, %v1757_v62 }
 0x1df   : > { %v1671_v34 = vadd.f32 %v1670_v32, %v1212_v41  ;;  %v1659_v21 = vadd.f32 %v1658_v40, %v1640_v36 }
 0x1e0   : > { %1813 = vrot.lane.b32.xlu2 %v1793_v2, %s4061_s21 }
 0x1e1   : > { %v1690_v37 = vadd.f32 %v1689_v6, %v1671_v34  ;;  %v1746_v53 = vmul.f32 %v4567_v35, %v1659_v21  ;;  %vm1728_vm12 = vcmp.gt.f32.partialorder %v1659_v21, 0.0 }
 0x1e3   : > { %v1758_v57 = vsel %vm1728_vm12, %v1659_v21, %v1746_v53  ;;  %vm1851_vm12 = vcmask 1047556  }
 0x1e4   : > { %v1708_v44 = vpop.f32.mrf.mxu2  ;;  %v1777_v39 = vmul.f32 %v4582_v48, %v1758_v57 }
 0x1e5   : > { %v1709_v15 = vadd.f32 %v1708_v44, %v1690_v37  ;;  %v1696_v13 = vpop.f32.mrf.mxu3 }
 0x1e6   : > { %v1672_v49 = vpop.f32.mrf.mxu1  ;;  %v1795_v4 = vpack.c.bf16 %v1777_v39, %v1776_v1 }
 0x1e7   : > { %vm1720_vm11 = vcmp.gt.f32.partialorder %v1709_v15, 0.0  ;;  %v1738_v12 = vmul.f32 %v4567_v35, %v1709_v15  ;;  %v1673_v50 = vadd.f32 %v1672_v49, %v1215_v46 }
 0x1e9   : > { %v1750_v45 = vsel %vm1720_vm11, %v1709_v15, %v1738_v12  ;;  %v1692_v19 = vadd.f32 %v1691_v43, %v1673_v50  ;;  %vm1850_vm11 = vcmask 1043608  }
 0x1ea   : > { %v1769_v42 = vmul.f32 %v4618_v5, %v1750_v45 }
 0x1ec   : > { %v1710_v14 = vpop.f32.mrf.mxu2  ;;  %v1790_v55 = vpack.c.bf16 %v1769_v42, %v1769_v42 }
 0x1ed   : > { %v1711_v58 = vadd.f32 %v1710_v14, %v1692_v19 }
 0x1ee   : > { %1807 = vrot.lane.b32.xlu1 %v1790_v55, %s4061_s21  ;;  %v1675_v25 = vpop.f32.mrf.mxu1 }
 0x1ef   : > { %vm1723_vm14 = vcmp.gt.f32.partialorder %v1711_v58, 0.0  ;;  %v1741_v59 = vmul.f32 %v4567_v35, %v1711_v58  ;;  %v1676_v61 = vadd.f32 %v1675_v25, %v1218_v54 }
 0x1f1   : > { %v1753_v63 = vsel %vm1723_vm14, %v1711_v58, %v1741_v59  ;;  %v1695_v0 = vadd.f32 %v1694_v56, %v1676_v61  ;;  %vm4648_vm14 = vmor %vm1851_vm12, %vm1850_vm11 }
 0x1f2   : > { %v1772_v24 = vmul.f32 %v4618_v5, %v1753_v63 }
 0x1f4   : > { %v1713_v3 = vpop.f32.mrf.mxu2  ;;  %v1792_v8 = vpack.c.bf16 %v1772_v24, %v1772_v24 }
 0x1f5   : > { %v1714_v10 = vadd.f32 %v1713_v3, %v1695_v0 }
 0x1f6   : > { %1817 = vrot.lane.b32.xlu1 %v1795_v4, %s4061_s21  ;;  %1811 = vrot.lane.b32.xlu0 %v1792_v8, %s4061_s21  ;;  %v1677_v11 = vpop.f32.mrf.mxu1 }
 0x1f7   : > { %vm1726_vm15 = vcmp.gt.f32.partialorder %v1714_v10, 0.0  ;;  %v1744_v17 = vmul.f32 %v4567_v35, %v1714_v10  ;;  %v1678_v18 = vadd.f32 %v1677_v11, %v1221_v9 }
 0x1f9   : > { %v1756_v20 = vsel %vm1726_vm15, %v1714_v10, %v1744_v17  ;;  %v1697_v22 = vadd.f32 %v1696_v13, %v1678_v18  ;;  %vm1784_vm15 = vcmask 306328  }
 0x1fa   : > { %v1775_v23 = vmul.f32 %v4618_v5, %v1756_v20  ;;  %1785 = vst.msk [vmem:[#allocation3 + $0xc] sm:$0xf] %vm1784_vm15, %v4060_v60 }
 0x1fb   : > { %1786 = vst.msk [vmem:[#allocation3 + $0x1c] sm:$0xf] %vm1784_vm15, %v4060_v60 }
 0x1fc   : > { %v1715_v26 = vpop.f32.mrf.mxu2  ;;  %v1794_v6 = vpack.c.bf16 %v1775_v23, %v1775_v23  ;;  %1787 = vst.msk [vmem:[#allocation3 + $0x2c] sm:$0xf] %vm1784_vm15, %v4060_v60 }
 0x1fd   : > { %v1716_v27 = vadd.f32 %v1715_v26, %v1697_v22  ;;  %1788 = vst.msk [vmem:[#allocation3 + $0x3c] sm:$0xf] %vm1784_vm15, %v4060_v60 }
 0x1fe   : > { %1815 = vrot.lane.b32.xlu0 %v1794_v6, %s4061_s21 }
 0x1ff   : > { %vm1729_vm10 = vcmp.gt.f32.partialorder %v1716_v27, 0.0  ;;  %v1747_v28 = vmul.f32 %v4567_v35, %v1716_v27 }
 0x201   : > { %v1759_v29 = vsel %vm1729_vm10, %v1716_v27, %v1747_v28  ;;  %vm1855_vm10 = vcmask 154628  }
 0x202   : > { %v1778_v41 = vmul.f32 %v4618_v5, %v1759_v29  ;;  %vm4697_vm11 = vmor %vm1855_vm10, %vm505_vm0 }
 0x204   : > { %v1796_v52 = vpack.c.bf16 %v1778_v41, %v1778_v41 }
 0x206   : > { %1819 = vrot.lane.b32.xlu2 %v1796_v52, %s4061_s21 }
 0x232   : > { %v1810_v38 = vpop.permute.xlu2 %1809 }
 0x233   : > { %v1823_v32 = vrot.slane %v1810_v38, 4 }
 0x235   : > { %v1833_v2 = vsel %vm1829_vm13, %v1823_v32, %v1810_v38 }
 0x236   : > { %1858 = vst.msk [vmem:[#allocation3 + $0x10] sm:$0xff] %vm4648_vm14, %v1833_v2 }
 0x23a   : > { %v4655_v33 = vpop.permute.xlu2 %1813 }
 0x23b   : > { %v1825_v34 = vrot.slane %v4655_v33, 4 }
 0x23d   : > { %v4658_v7 = vld [vmem:[#allocation3 + $0x10] sm:$0xff]  ;;  %v1836_v36 = vsel %vm1829_vm13, %v1825_v34, %v4655_v33 }
 0x23e   : > { %1874 = vst [vmem:[#allocation2 + $0xc] sm:$0xff] %v4658_v7 }
 0x23f   : > { %1860 = vst.msk [vmem:[#allocation3 + $0x20] sm:$0xff] %vm4648_vm14, %v1836_v36 }
 0x242   : > { %v1806_v37 = vpop.permute.xlu0 %1805 }
 0x243   : > { %v1821_v40 = vrot.slane %v1806_v37, 4 }
 0x245   : > { %v1830_v16 = vsel %vm1829_vm13, %v1821_v40, %v1806_v37 }
 0x246   : > { %v4670_v43 = vld [vmem:[#allocation3 + $0x20] sm:$0xff]  ;;  %1853 = vst.msk [vmem:[#allocation3] sm:$0xff] %vm4648_vm14, %v1830_v16 }
 0x247   : > { %1876 = vst [vmem:[#allocation2 + $0x18] sm:$0xff] %v4670_v43 }
 0x24d   : > { %v4675_v44 = vld [vmem:[#allocation3] sm:$0xff] }
 0x24e   : > { %1872 = vst [vmem:[#allocation2] sm:$0xff] %v4675_v44  ;;  %2304 = vrot.lane.b32.xlu0 %v4675_v44, %s4054_s13  ;;  %2032 = vrot.lane.b32.xlu1 %v4675_v44, %s4053_s30 }
 0x24f   : > { %1964 = vrot.lane.b32.xlu2 %v4675_v44, %s4055_s14 }
 0x256   : > { %2236 = vrot.lane.b32.xlu1 %v4675_v44, %s4056_s15  ;;  %1896 = vrot.lane.b32.xlu0 %v4675_v44, %s4057_s16 }
 0x257   : > { %2168 = vrot.lane.b32.xlu2 %v4675_v44, %s4058_s17 }
 0x25e   : > { %1968 = vrot.lane.b32.xlu1 %v4658_v7, %s4055_s14  ;;  %2036 = vrot.lane.b32.xlu0 %v4658_v7, %s4053_s30 }
 0x25f   : > { %2308 = vrot.lane.b32.xlu2 %v4658_v7, %s4054_s13 }
 0x260   : > { %v1808_v60 = vpop.permute.xlu1 %1807  ;;  %v1820_v51 = vpop.permute.xlu2 %1819 }
 0x261   : > { %v1822_v46 = vrot.slane %v1808_v60, 4  ;;  %v1828_v53 = vrot.slane %v1820_v51, 4 }
 0x263   : > { %v1831_v15 = vsel %vm505_vm0, %v1821_v40, %v1822_v46 }
 0x264   : > { %v1832_v49 = vsel %vm1829_vm13, %v1831_v15, %v1808_v60 }
 0x265   : > { %1857 = vst.msk [vmem:[#allocation3 + $0x8] sm:$0xff] %vm4697_vm11, %v1832_v49 }
 0x266   : > { %2172 = vrot.lane.b32.xlu1 %v4658_v7, %s4058_s17  ;;  %2240 = vrot.lane.b32.xlu0 %v4658_v7, %s4056_s15 }
 0x267   : > { %1900 = vrot.lane.b32.xlu2 %v4658_v7, %s4057_s16 }
 0x268   : > { %v1818_v12 = vpop.permute.xlu1 %1817  ;;  %v1812_v50 = vpop.permute.xlu0 %1811 }
 0x269   : > { %v1827_v45 = vrot.slane %v1818_v12, 4  ;;  %v1824_v42 = vrot.slane %v1812_v50, 4 }
 0x26b   : > { %v1839_v30 = vsel %vm1829_vm13, %v1827_v45, %v1818_v12  ;;  %v1840_v19 = vsel %vm505_vm0, %v1827_v45, %v1828_v53  ;;  %v1834_v14 = vsel %vm505_vm0, %v1823_v32, %v1824_v42 }
 0x26c   : > { %v1865_v55 = vld [vmem:[#allocation3 + $0x8] sm:$0xf]  ;;  %v1841_v54 = vsel %vm1829_vm13, %v1840_v19, %v1820_v51  ;;  %1862 = vst.msk [vmem:[#allocation3 + $0x30] sm:$0xff] %vm4648_vm14, %v1839_v30  ;;  %v1835_v56 = vsel %vm1829_vm13, %v1834_v14, %v1812_v50 }
 0x26d   : > { %v4718_v57 = vld [vmem:[#allocation3 + $0x8] sm:$0xff]  ;;  %1873 = vst [vmem:[#allocation2 + $0x8] sm:$0xf] %v1865_v55 }
 0x26e   : > { %1863 = vst.msk [vmem:[#allocation3 + $0x38] sm:$0xff] %vm4697_vm11, %v1841_v54  ;;  %2306 = vrot.lane.b32.xlu1 %v4718_v57, %s4054_s13  ;;  %1966 = vrot.lane.b32.xlu0 %v4718_v57, %s4055_s14 }
 0x26f   : > { %1859 = vst.msk [vmem:[#allocation3 + $0x18] sm:$0xff] %vm4697_vm11, %v1835_v56  ;;  %2034 = vrot.lane.b32.xlu2 %v4718_v57, %s4053_s30 }
 0x270   : > { %v1816_v58 = vpop.permute.xlu0 %1815 }
 0x271   : > { %v1826_v25 = vrot.slane %v1816_v58, 4 }
 0x273   : > { %v4730_v59 = vld [vmem:[#allocation3 + $0x30] sm:$0xff]  ;;  %v1837_v61 = vsel %vm505_vm0, %v1825_v34, %v1826_v25 }
 0x274   : > { %1878 = vst [vmem:[#allocation2 + $0x24] sm:$0xff] %v4730_v59  ;;  %v1838_v62 = vsel %vm1829_vm13, %v1837_v61, %v1816_v58 }
 0x275   : > { %1861 = vst.msk [vmem:[#allocation3 + $0x28] sm:$0xff] %vm4697_vm11, %v1838_v62  ;;  %v1871_v39 = vld [vmem:[#allocation3 + $0x38] sm:$0xf] }
 0x276   : > { %v1867_v63 = vld [vmem:[#allocation3 + $0x18] sm:$0xf]  ;;  %1898 = vrot.lane.b32.xlu1 %v4718_v57, %s4057_s16  ;;  %2170 = vrot.lane.b32.xlu0 %v4718_v57, %s4058_s17  ;;  %1879 = vst [vmem:[#allocation2 + $0x2c] sm:$0xf] %v1871_v39 }
 0x277   : > { %1875 = vst [vmem:[#allocation2 + $0x14] sm:$0xf] %v1867_v63  ;;  %2238 = vrot.lane.b32.xlu2 %v4718_v57, %s4056_s15  ;;  %v4755_v1 = vld [vmem:[#allocation3 + $0x18] sm:$0xff] }
 0x278   : > { %v2295_v13 = vld [vmem:[#allocation3 + $0x38] sm:$0xff] }
 0x27c   : > { %v1869_v0 = vld [vmem:[#allocation3 + $0x28] sm:$0xf] }
 0x27d   : > { %1877 = vst [vmem:[#allocation2 + $0x20] sm:$0xf] %v1869_v0  ;;  %v2293_v3 = vld [vmem:[#allocation3 + $0x28] sm:$0xff] }
 0x27e   : > { %2312 = vrot.lane.b32.xlu1 %v4670_v43, %s4054_s13  ;;  %1972 = vrot.lane.b32.xlu0 %v4670_v43, %s4055_s14 }
 0x27f   : > { %2040 = vrot.lane.b32.xlu2 %v4670_v43, %s4053_s30 }
 0x286   : > { %1904 = vrot.lane.b32.xlu1 %v4670_v43, %s4057_s16  ;;  %2176 = vrot.lane.b32.xlu0 %v4670_v43, %s4058_s17 }
 0x287   : > { %2244 = vrot.lane.b32.xlu2 %v4670_v43, %s4056_s15 }
 0x28e   : > { %2108 = vrot.lane.b32.xlu1 %v4670_v43, %s4059_s18  ;;  %2310 = vrot.lane.b32.xlu0 %v4755_v1, %s4054_s13 }
 0x28f   : > { %1970 = vrot.lane.b32.xlu2 %v4755_v1, %s4055_s14 }
 0x296   : > { %2038 = vrot.lane.b32.xlu1 %v4755_v1, %s4053_s30  ;;  %1902 = vrot.lane.b32.xlu0 %v4755_v1, %s4057_s16 }
 0x297   : > { %2174 = vrot.lane.b32.xlu2 %v4755_v1, %s4058_s17 }
 0x29e   : > { %2242 = vrot.lane.b32.xlu1 %v4755_v1, %s4056_s15  ;;  %2316 = vrot.lane.b32.xlu0 %v4730_v59, %s4054_s13 }
 0x29f   : > { %1976 = vrot.lane.b32.xlu2 %v4730_v59, %s4055_s14 }
 0x2a6   : > { %2044 = vrot.lane.b32.xlu1 %v4730_v59, %s4053_s30  ;;  %1908 = vrot.lane.b32.xlu0 %v4730_v59, %s4057_s16 }
 0x2a7   : > { %2180 = vrot.lane.b32.xlu2 %v4730_v59, %s4058_s17 }
 0x2a9   : > { %v4781_v24 = vpop.permute.xlu2 %1964 }
 0x2aa   : > { %v1980_v16 = vrot.slane %v4781_v24, 4 }
 0x2ae   : > { %2248 = vrot.lane.b32.xlu1 %v4730_v59, %s4056_s15  ;;  %2112 = vrot.lane.b32.xlu0 %v4730_v59, %s4059_s18 }
 0x2af   : > { %2314 = vrot.lane.b32.xlu2 %v2293_v3, %s4054_s13 }
 0x2b1   : > { %v4788_v4 = vpop.permute.xlu2 %2168 }
 0x2b2   : > { %v2184_v30 = vrot.slane %v4788_v4, 4 }
 0x2b6   : > { %2042 = vrot.lane.b32.xlu0 %v2293_v3, %s4053_s30  ;;  %1974 = vrot.lane.b32.xlu1 %v2293_v3, %s4055_s14 }
 0x2b7   : > { %1906 = vrot.lane.b32.xlu2 %v2293_v3, %s4057_s16 }
 0x2b9   : > { %v4793_v8 = vpop.permute.xlu2 %2308 }
 0x2be   : > { %2246 = vrot.lane.b32.xlu0 %v2293_v3, %s4056_s15  ;;  %2178 = vrot.lane.b32.xlu1 %v2293_v3, %s4058_s17 }
 0x2bf   : > { %2110 = vrot.lane.b32.xlu2 %v2293_v3, %s4059_s18 }
 0x2c0   : > { %v2033_v9 = vpop.permute.xlu1 %2032  ;;  %v2305_v10 = vpop.permute.xlu0 %2304 }
 0x2c1   : > { %v4798_v11 = vpop.permute.xlu2 %1900  ;;  %v2048_v22 = vrot.slane %v2033_v9, 4  ;;  %v2320_v60 = vrot.slane %v2305_v10, 4 }
 0x2c6   : > { %2102 = vrot.lane.b32.xlu0 %v4718_v57, %s4059_s18  ;;  %2318 = vrot.lane.b32.xlu1 %v2295_v13, %s4054_s13 }
 0x2c7   : > { %2046 = vrot.lane.b32.xlu2 %v2295_v13, %s4053_s30 }
 0x2c8   : > { %v2237_v17 = vpop.permute.xlu1 %2236  ;;  %v4804_v18 = vpop.permute.xlu0 %1896 }
 0x2c9   : > { %v2035_v20 = vpop.permute.xlu2 %2034  ;;  %v2252_v52 = vrot.slane %v2237_v17, 4  ;;  %v1912_v19 = vrot.slane %v4804_v18, 4 }
 0x2ca   : > { %v2049_v23 = vrot.slane %v2035_v20, 4 }
 0x2cc   : > { %v2056_v26 = vsel %vm505_vm0, %v2048_v22, %v2049_v23  ;;  %v2058_v6 = vsel %vm677_vm2, %v2035_v20, %v2049_v23  ;;  %v2506_v23 = vld [vmem:[%s5289_s6 + $0x10] sm:$0xff] }
 0x2cd   : > { %v2057_v27 = vsel %vm677_vm2, %v2033_v9, %v2056_v26  ;;  %2077 = vst [vmem:[#allocation2 + $0x98] sm:$0xf] %v2058_v6 }
 0x2ce   : > { %2076 = vst [vmem:[#allocation2 + $0x90] sm:$0xff] %v2057_v27  ;;  %1978 = vrot.lane.b32.xlu0 %v2295_v13, %s4055_s14  ;;  %2104 = vrot.lane.b32.xlu1 %v4658_v7, %s4059_s18  ;;  %v2322_v27 = vrot.slane %v4793_v8, 4 }
 0x2cf   : > { %2250 = vrot.lane.b32.xlu2 %v2295_v13, %s4056_s15 }
 0x2d0   : > { %v1969_v28 = vpop.permute.xlu1 %1968  ;;  %v4813_v29 = vpop.permute.xlu0 %2036 }
 0x2d1   : > { %v2239_v41 = vpop.permute.xlu2 %2238  ;;  %v1982_v56 = vrot.slane %v1969_v28, 4 }
 0x2d2   : > { %v2253_v38 = vrot.slane %v2239_v41, 4 }
 0x2d4   : > { %v2260_v31 = vsel %vm505_vm0, %v2252_v52, %v2253_v38  ;;  %v2262_v32 = vsel %vm932_vm4, %v2239_v41, %v2253_v38 }
 0x2d5   : > { %v2261_v2 = vsel %vm932_vm4, %v2237_v17, %v2260_v31  ;;  %2281 = vst [vmem:[#allocation2 + $0x128] sm:$0xf] %v2262_v32 }
 0x2d6   : > { %2280 = vst [vmem:[#allocation2 + $0x120] sm:$0xff] %v2261_v2  ;;  %2182 = vrot.lane.b32.xlu0 %v2295_v13, %s4058_s17  ;;  %2382 = vrot.lane.b32.xlu1 %v2293_v3, %s4052_s29  ;;  %v1914_v2 = vrot.slane %v4798_v11, 4 }
 0x2d7   : > { %2100 = vrot.lane.b32.xlu2 %v4675_v44, %s4059_s18 }
 0x2d8   : > { %v2173_v33 = vpop.permute.xlu1 %2172  ;;  %v4822_v34 = vpop.permute.xlu0 %2240 }
 0x2d9   : > { %v4824_v36 = vpop.permute.xlu2 %2040 }
 0x2de   : > { %2380 = vrot.lane.b32.xlu0 %v4670_v43, %s4052_s29  ;;  %1910 = vrot.lane.b32.xlu1 %v2295_v13, %s4057_s16 }
 0x2df   : > { %2106 = vrot.lane.b32.xlu2 %v4755_v1, %s4059_s18 }
 0x2e0   : > { %v2307_v37 = vpop.permute.xlu1 %2306  ;;  %v1967_v40 = vpop.permute.xlu0 %1966 }
 0x2e1   : > { %v2321_v46 = vrot.slane %v2307_v37, 4  ;;  %v4832_v21 = vpop.permute.xlu2 %2244  ;;  %v1981_v15 = vrot.slane %v1967_v40, 4 }
 0x2e3   : > { %v2328_v49 = vsel %vm505_vm0, %v2320_v60, %v2321_v46  ;;  %v2330_v51 = vsel %vm1017_vm3, %v2307_v37, %v2321_v46  ;;  %v1988_v43 = vsel %vm505_vm0, %v1980_v16, %v1981_v15  ;;  %v1990_v53 = vsel %vm592_vm5, %v1967_v40, %v1981_v15 }
 0x2e4   : > { %v2329_v12 = vsel %vm1017_vm3, %v2305_v10, %v2328_v49  ;;  %2349 = vst [vmem:[#allocation2 + $0x158] sm:$0xf] %v2330_v51  ;;  %v1989_v50 = vsel %vm592_vm5, %v4781_v24, %v1988_v43 }
 0x2e5   : > { %2348 = vst [vmem:[#allocation2 + $0x150] sm:$0xff] %v2329_v12 }
 0x2e6   : > { %2008 = vst [vmem:[#allocation2 + $0x60] sm:$0xff] %v1989_v50  ;;  %2386 = vrot.lane.b32.xlu0 %v2295_v13, %s4052_s29  ;;  %2114 = vrot.lane.b32.xlu1 %v2295_v13, %s4059_s18 }
 0x2e7   : > { %2009 = vst [vmem:[#allocation2 + $0x68] sm:$0xf] %v1990_v53  ;;  %2384 = vrot.lane.b32.xlu2 %v4730_v59, %s4052_s29 }
 0x2e8   : > { %v1899_v45 = vpop.permute.xlu1 %1898  ;;  %v2171_v42 = vpop.permute.xlu0 %2170 }
 0x2e9   : > { %v1913_v14 = vrot.slane %v1899_v45, 4  ;;  %v1971_v55 = vpop.permute.xlu2 %1970  ;;  %v2185_v54 = vrot.slane %v2171_v42, 4 }
 0x2ea   : > { %v1983_v58 = vrot.slane %v1971_v55, 4 }
 0x2eb   : > { %v1920_v25 = vsel %vm505_vm0, %v1912_v19, %v1913_v14  ;;  %v1922_v61 = vsel %vm507_vm6, %v1899_v45, %v1913_v14  ;;  %v2192_v62 = vsel %vm505_vm0, %v2184_v30, %v2185_v54  ;;  %v2194_v3 = vsel %vm847_vm7, %v2171_v42, %v2185_v54 }
 0x2ec   : > { %v1921_v59 = vsel %vm507_vm6, %v4804_v18, %v1920_v25  ;;  %1941 = vst [vmem:[#allocation2 + $0x38] sm:$0xf] %v1922_v61  ;;  %v1991_v39 = vsel %vm505_vm0, %v1982_v56, %v1983_v58  ;;  %v1993_v63 = vsel %vm592_vm5, %v1971_v55, %v1983_v58  ;;  %v2193_v24 = vsel %vm847_vm7, %v4788_v4, %v2192_v62 }
 0x2ed   : > { %1940 = vst [vmem:[#allocation2 + $0x30] sm:$0xff] %v1921_v59  ;;  %v1992_v0 = vsel %vm592_vm5, %v1969_v28, %v1991_v39  ;;  %v2186_v4 = vrot.slane %v2173_v33, 4 }
 0x2ee   : > { %2010 = vst [vmem:[#allocation2 + $0x6c] sm:$0xff] %v1992_v0  ;;  %2376 = vrot.lane.b32.xlu0 %v4658_v7, %s4052_s29  ;;  %2372 = vrot.lane.b32.xlu1 %v4675_v44, %s4052_s29 }
 0x2ef   : > { %2011 = vst [vmem:[#allocation2 + $0x74] sm:$0xf] %v1993_v63  ;;  %2374 = vrot.lane.b32.xlu2 %v4718_v57, %s4052_s29 }
 0x2f0   : > { %2212 = vst [vmem:[#allocation2 + $0xf0] sm:$0xff] %v2193_v24  ;;  %v2313_v9 = vpop.permute.xlu1 %2312  ;;  %v4864_v10 = vpop.permute.xlu0 %1972 }
 0x2f1   : > { %2213 = vst [vmem:[#allocation2 + $0xf8] sm:$0xf] %v2194_v3  ;;  %v2175_v13 = vpop.permute.xlu2 %2174  ;;  %v2324_v60 = vrot.slane %v2313_v9, 4 }
 0x2f2   : > { %v2187_v17 = vrot.slane %v2175_v13, 4 }
 0x2f4   : > { %v2195_v18 = vsel %vm505_vm0, %v2186_v4, %v2187_v17  ;;  %v2197_v20 = vsel %vm847_vm7, %v2175_v13, %v2187_v17 }
 0x2f5   : > { %v2196_v7 = vsel %vm847_vm7, %v2173_v33, %v2195_v18  ;;  %2215 = vst [vmem:[#allocation2 + $0x104] sm:$0xf] %v2197_v20  ;;  %v2050_v33 = vrot.slane %v4813_v29, 4 }
 0x2f6   : > { %2214 = vst [vmem:[#allocation2 + $0xfc] sm:$0xff] %v2196_v7  ;;  %2378 = vrot.lane.b32.xlu1 %v4755_v1, %s4052_s29 }
 0x2f8   : > { %v1905_v44 = vpop.permute.xlu1 %1904  ;;  %v4871_v57 = vpop.permute.xlu0 %2176 }
 0x2f9   : > { %v4873_v22 = vpop.permute.xlu2 %1976  ;;  %v1916_v55 = vrot.slane %v1905_v44, 4 }
 0x2fe   : > { %2520 = vperm.xlu1 %4024, %v2506_v23  }
 0x300   : > { %v2109_v26 = vpop.permute.xlu1 %2108  ;;  %v2311_v6 = vpop.permute.xlu0 %2310 }
 0x301   : > { %v4879_v28 = vpop.permute.xlu2 %2180  ;;  %v2323_v41 = vrot.slane %v2311_v6, 4  ;;  %v2120_v0 = vrot.slane %v2109_v26, 4 }
 0x303   : > { %v2331_v52 = vsel %vm505_vm0, %v2322_v27, %v2323_v41  ;;  %v2333_v1 = vsel %vm1017_vm3, %v2311_v6, %v2323_v41  ;;  %v1984_v41 = vrot.slane %v4864_v10, 4 }
 0x304   : > { %v2332_v38 = vsel %vm1017_vm3, %v4793_v8, %v2331_v52  ;;  %2351 = vst [vmem:[#allocation2 + $0x164] sm:$0xf] %v2333_v1 }
 0x305   : > { %2350 = vst [vmem:[#allocation2 + $0x15c] sm:$0xff] %v2332_v38 }
 0x308   : > { %v2039_v31 = vpop.permute.xlu1 %2038  ;;  %v1903_v32 = vpop.permute.xlu0 %1902 }
 0x309   : > { %v2051_v37 = vrot.slane %v2039_v31, 4  ;;  %v2315_v40 = vpop.permute.xlu2 %2314  ;;  %v1915_v16 = vrot.slane %v1903_v32, 4 }
 0x30a   : > { %v2325_v46 = vrot.slane %v2315_v40, 4 }
 0x30b   : > { %v2059_v15 = vsel %vm505_vm0, %v2050_v33, %v2051_v37  ;;  %v2061_v49 = vsel %vm677_vm2, %v2039_v31, %v2051_v37  ;;  %v1923_v51 = vsel %vm505_vm0, %v1914_v2, %v1915_v16  ;;  %v1925_v45 = vsel %vm507_vm6, %v1903_v32, %v1915_v16 }
 0x30c   : > { %v2060_v8 = vsel %vm677_vm2, %v4813_v29, %v2059_v15  ;;  %2079 = vst [vmem:[#allocation2 + $0xa4] sm:$0xf] %v2061_v49  ;;  %v2334_v43 = vsel %vm505_vm0, %v2324_v60, %v2325_v46  ;;  %v2336_v12 = vsel %vm1017_vm3, %v2315_v40, %v2325_v46  ;;  %v1924_v53 = vsel %vm507_vm6, %v4798_v11, %v1923_v51 }
 0x30d   : > { %2078 = vst [vmem:[#allocation2 + $0x9c] sm:$0xff] %v2060_v8  ;;  %v2335_v50 = vsel %vm1017_vm3, %v2313_v9, %v2334_v43  ;;  %v2254_v29 = vrot.slane %v4822_v34, 4  ;;  %v2188_v43 = vrot.slane %v4871_v57, 4 }
 0x30e   : > { %2352 = vst [vmem:[#allocation2 + $0x168] sm:$0xff] %v2335_v50 }
 0x30f   : > { %2353 = vst [vmem:[#allocation2 + $0x170] sm:$0xf] %v2336_v12 }
 0x310   : > { %1942 = vst [vmem:[#allocation2 + $0x3c] sm:$0xff] %v1924_v53  ;;  %v2243_v42 = vpop.permute.xlu1 %2242  ;;  %v4898_v30 = vpop.permute.xlu0 %2316 }
 0x311   : > { %1943 = vst [vmem:[#allocation2 + $0x44] sm:$0xf] %v1925_v45  ;;  %v2255_v19 = vrot.slane %v2243_v42, 4  ;;  %v1907_v14 = vpop.permute.xlu2 %1906 }
 0x312   : > { %v1917_v54 = vrot.slane %v1907_v14, 4 }
 0x313   : > { %v2263_v56 = vsel %vm505_vm0, %v2254_v29, %v2255_v19  ;;  %v2265_v58 = vsel %vm932_vm4, %v2243_v42, %v2255_v19 }
 0x314   : > { %v2264_v11 = vsel %vm932_vm4, %v4822_v34, %v2263_v56  ;;  %2283 = vst [vmem:[#allocation2 + $0x134] sm:$0xf] %v2265_v58  ;;  %v1926_v25 = vsel %vm505_vm0, %v1916_v55, %v1917_v54  ;;  %v1928_v61 = vsel %vm507_vm6, %v1907_v14, %v1917_v54 }
 0x315   : > { %2282 = vst [vmem:[#allocation2 + $0x12c] sm:$0xff] %v2264_v11  ;;  %v1927_v62 = vsel %vm507_vm6, %v1905_v44, %v1926_v25 }
 0x316   : > { %1944 = vst [vmem:[#allocation2 + $0x48] sm:$0xff] %v1927_v62 }
 0x317   : > { %1945 = vst [vmem:[#allocation2 + $0x50] sm:$0xf] %v1928_v61 }
 0x318   : > { %v2045_v59 = vpop.permute.xlu1 %2044  ;;  %v4908_v39 = vpop.permute.xlu0 %1908 }
 0x319   : > { %v2111_v63 = vpop.permute.xlu2 %2110  ;;  %v2054_v18 = vrot.slane %v2045_v59, 4 }
 0x31a   : > { %v2121_v24 = vrot.slane %v2111_v63, 4 }
 0x31c   : > { %v2130_v3 = vsel %vm505_vm0, %v2120_v0, %v2121_v24  ;;  %v2132_v34 = vsel %vm762_vm9, %v2111_v63, %v2121_v24 }
 0x31d   : > { %v2131_v9 = vsel %vm762_vm9, %v2109_v26, %v2130_v3  ;;  %2149 = vst [vmem:[#allocation2 + $0xe0] sm:$0xf] %v2132_v34  ;;  %v2052_v26 = vrot.slane %v4824_v36, 4  ;;  %v3728_v3 = vld [vmem:[#allocation2 + $0x9c] sm:$0xf0] }
 0x31e   : > { %2148 = vst [vmem:[#allocation2 + $0xd8] sm:$0xff] %v2131_v9  ;;  %v3726_v9 = vld [vmem:[#allocation2 + $0x90] sm:$0xf] }
 0x320   : > { %v2249_v13 = vpop.permute.xlu1 %2248  ;;  %v4913_v4 = vpop.permute.xlu0 %2112 }
 0x321   : > { %v2047_v17 = vpop.permute.xlu2 %2046  ;;  %v2258_v31 = vrot.slane %v2249_v13, 4 }
 0x322   : > { %v2055_v20 = vrot.slane %v2047_v17, 4 }
 0x324   : > { %v2065_v7 = vsel %vm505_vm0, %v2054_v18, %v2055_v20  ;;  %v2067_v44 = vsel %vm677_vm2, %v2047_v17, %v2055_v20 }
 0x325   : > { %v2066_v23 = vsel %vm677_vm2, %v2045_v59, %v2065_v7  ;;  %2083 = vst [vmem:[#allocation2 + $0xbc] sm:$0xf] %v2067_v44  ;;  %v3962_v59 = vld [vmem:[#allocation2 + $0x98] sm:$0xf0]  ;;  %v3961_v7 = vld [vmem:[#allocation2 + $0x94] sm:$0xf] }
 0x326   : > { %2082 = vst [vmem:[#allocation2 + $0xb4] sm:$0xff] %v2066_v23  ;;  %v3727_v20 = vor.u32 %v3962_v59, %v3726_v9  ;;  %v3980_v59 = vld [vmem:[#allocation2 + $0x128] sm:$0xf0] }
 0x328   : > { %v1975_v6 = vpop.permute.xlu1 %1974  ;;  %v2043_v27 = vpop.permute.xlu0 %2042 }
 0x329   : > { %v1985_v52 = vrot.slane %v1975_v6, 4  ;;  %v2251_v1 = vpop.permute.xlu2 %2250  ;;  %v2053_v38 = vrot.slane %v2043_v27, 4 }
 0x32a   : > { %v2259_v32 = vrot.slane %v2251_v1, 4 }
 0x32b   : > { %v1994_v2 = vsel %vm505_vm0, %v1984_v41, %v1985_v52  ;;  %v1996_v33 = vsel %vm592_vm5, %v1975_v6, %v1985_v52  ;;  %v2062_v37 = vsel %vm505_vm0, %v2052_v26, %v2053_v38  ;;  %v2064_v49 = vsel %vm677_vm2, %v2043_v27, %v2053_v38 }
 0x32c   : > { %v1995_v40 = vsel %vm592_vm5, %v4864_v10, %v1994_v2  ;;  %2013 = vst [vmem:[#allocation2 + $0x80] sm:$0xf] %v1996_v33  ;;  %v2269_v16 = vsel %vm505_vm0, %v2258_v31, %v2259_v32  ;;  %v2271_v60 = vsel %vm932_vm4, %v2251_v1, %v2259_v32  ;;  %v2063_v15 = vsel %vm677_vm2, %v4824_v36, %v2062_v37 }
 0x32d   : > { %2012 = vst [vmem:[#allocation2 + $0x78] sm:$0xff] %v1995_v40  ;;  %v2270_v46 = vsel %vm932_vm4, %v2249_v13, %v2269_v16  ;;  %v2256_v10 = vrot.slane %v4832_v21, 4  ;;  %v3965_v55 = vld [vmem:[#allocation2 + $0xb0] sm:$0xf0]  ;;  %v3740_v54 = vld [vmem:[#allocation2 + $0xb4] sm:$0xf0]  ;;  %v3731_v27 = vor.u32 %v3961_v7, %v3728_v3 }
 0x32e   : > { %2286 = vst [vmem:[#allocation2 + $0x144] sm:$0xff] %v2270_v46  ;;  %v1986_v1 = vrot.slane %v4873_v22, 4  ;;  %v3834_v16 = vld [vmem:[#allocation2 + $0x168] sm:$0xf]  ;;  %v1918_v3 = vrot.slane %v4908_v39, 4 }
 0x32f   : > { %2287 = vst [vmem:[#allocation2 + $0x14c] sm:$0xf] %v2271_v60 }
 0x330   : > { %2080 = vst [vmem:[#allocation2 + $0xa8] sm:$0xff] %v2063_v15  ;;  %v2179_v51 = vpop.permute.xlu1 %2178  ;;  %v2247_v8 = vpop.permute.xlu0 %2246  ;;  %v3986_v15 = vld [vmem:[#allocation2 + $0x158] sm:$0xf0] }
 0x331   : > { %2081 = vst [vmem:[#allocation2 + $0xb0] sm:$0xf] %v2064_v49  ;;  %v2189_v12 = vrot.slane %v2179_v51, 4  ;;  %v2101_v50 = vpop.permute.xlu2 %2100  ;;  %v2257_v53 = vrot.slane %v2247_v8, 4 }
 0x332   : > { %v2116_v63 = vrot.slane %v2101_v50, 4 }
 0x333   : > { %v2198_v45 = vsel %vm505_vm0, %v2188_v43, %v2189_v12  ;;  %v2200_v42 = vsel %vm847_vm7, %v2179_v51, %v2189_v12  ;;  %v2266_v36 = vsel %vm505_vm0, %v2256_v10, %v2257_v53  ;;  %v2268_v14 = vsel %vm932_vm4, %v2247_v8, %v2257_v53  ;;  %v3822_v8 = vld [vmem:[#allocation2 + $0x150] sm:$0xf] }
 0x334   : > { %v2199_v29 = vsel %vm847_vm7, %v4871_v57, %v2198_v45  ;;  %2217 = vst [vmem:[#allocation2 + $0x110] sm:$0xf] %v2200_v42  ;;  %v2267_v19 = vsel %vm932_vm4, %v4832_v21, %v2266_v36  ;;  %v2326_v57 = vrot.slane %v4898_v30, 4  ;;  %v2190_v10 = vrot.slane %v4879_v28, 4 }
 0x335   : > { %2216 = vst [vmem:[#allocation2 + $0x108] sm:$0xff] %v2199_v29  ;;  %v3823_v53 = vor.u32 %v3986_v15, %v3822_v8  ;;  %v3714_v29 = vld [vmem:[#allocation2 + $0x78] sm:$0xf]  ;;  %v3690_v15 = vld [vmem:[#allocation2 + $0x48] sm:$0xf] }
 0x336   : > { %2284 = vst [vmem:[#allocation2 + $0x138] sm:$0xff] %v2267_v19 }
 0x337   : > { %2285 = vst [vmem:[#allocation2 + $0x140] sm:$0xf] %v2268_v14  ;;  %v3738_v56 = vld [vmem:[#allocation2 + $0xa8] sm:$0xf]  ;;  %v3964_v58 = vld [vmem:[#allocation2 + $0xac] sm:$0xf] }
 0x338   : > { %v3739_v11 = vor.u32 %v3965_v55, %v3738_v56  ;;  %v3743_v25 = vor.u32 %v3964_v58, %v3740_v54  ;;  %v2319_v61 = vpop.permute.xlu1 %2318  ;;  %v2103_v62 = vpop.permute.xlu0 %2102  ;;  %v3983_v54 = vld [vmem:[#allocation2 + $0x140] sm:$0xf0]  ;;  %v3958_v56 = vld [vmem:[#allocation2 + $0x7c] sm:$0xf] }
 0x339   : > { %v2327_v0 = vrot.slane %v2319_v61, 4  ;;  %v2107_v24 = vpop.permute.xlu2 %2106  ;;  %v2117_v21 = vrot.slane %v2103_v62, 4 }
 0x33a   : > { %2852 = vmatpush.bf16.msra.mxu0 %v3739_v11  ;;  %2909 = vmatpush.bf16.msrb.mxu2 %v3743_v25  ;;  %v2119_v34 = vrot.slane %v2107_v24, 4 }
 0x33b   : > { %v2337_v13 = vsel %vm505_vm0, %v2326_v57, %v2327_v0  ;;  %v2339_v17 = vsel %vm1017_vm3, %v2319_v61, %v2327_v0  ;;  %v2124_v18 = vsel %vm505_vm0, %v2116_v63, %v2117_v21  ;;  %v2126_v26 = vsel %vm762_vm9, %v2103_v62, %v2117_v21  ;;  %v3956_v57 = vld [vmem:[#allocation2 + $0x68] sm:$0xf0]  ;;  %v3704_v63 = vld [vmem:[#allocation2 + $0x6c] sm:$0xf0]  ;;  %v3798_v21 = vld [vmem:[#allocation2 + $0x120] sm:$0xf] }
 0x33c   : > { %v2338_v44 = vsel %vm1017_vm3, %v4898_v30, %v2337_v13  ;;  %2355 = vst [vmem:[#allocation2 + $0x17c] sm:$0xf] %v2339_v17  ;;  %v2129_v23 = vsel %vm762_vm9, %v2107_v24, %v2119_v34  ;;  %v2125_v6 = vsel %vm762_vm9, %v2101_v50, %v2124_v18  ;;  %v3702_v24 = vld [vmem:[#allocation2 + $0x60] sm:$0xf]  ;;  %v3799_v13 = vor.u32 %v3980_v59, %v3798_v21  ;;  %v3955_v17 = vld [vmem:[#allocation2 + $0x64] sm:$0xf] }
 0x33d   : > { %2354 = vst [vmem:[#allocation2 + $0x174] sm:$0xff] %v2338_v44  ;;  %v3810_v45 = vld [vmem:[#allocation2 + $0x138] sm:$0xf]  ;;  %v3703_v18 = vor.u32 %v3956_v57, %v3702_v24  ;;  %v3654_v57 = vld [vmem:[#allocation2] sm:$0xf] }
 0x33e   : > { %2147 = vst [vmem:[#allocation2 + $0xd4] sm:$0xf] %v2129_v23  ;;  %2853 = vmatpush.bf16.msra.mxu0 %v3727_v20  ;;  %2910 = vmatpush.bf16.msrb.mxu2 %v3731_v27  ;;  %v3811_v11 = vor.u32 %v3983_v54, %v3810_v45  ;;  %v3707_v20 = vor.u32 %v3955_v17, %v3704_v63  ;;  %v3947_v54 = vld [vmem:[#allocation2 + $0x20] sm:$0xf0]  ;;  %v3630_v17 = vld [vmem:[%s5288_s5] sm:$0xf] }
 0x33f   : > { %2144 = vst [vmem:[#allocation2 + $0xc0] sm:$0xff] %v2125_v6  ;;  %v3943_v21 = vld [vmem:[#allocation2 + $0x4] sm:$0xf] }
 0x340   : > { %2145 = vst [vmem:[#allocation2 + $0xc8] sm:$0xf] %v2126_v26  ;;  %v2105_v41 = vpop.permute.xlu1 %2104  ;;  %v1979_v52 = vpop.permute.xlu0 %1978  ;;  %v3786_v26 = vld [vmem:[#allocation2 + $0x108] sm:$0xf] }
 0x341   : > { %v2118_v38 = vrot.slane %v2105_v41, 4  ;;  %v4951_v30 = vpop.permute.xlu2 %2384  ;;  %v1987_v31 = vrot.slane %v1979_v52, 4 }
 0x343   : > { %v2127_v32 = vsel %vm505_vm0, %v2118_v38, %v2119_v34  ;;  %v1997_v2 = vsel %vm505_vm0, %v1986_v1, %v1987_v31  ;;  %v1999_v33 = vsel %vm592_vm5, %v1979_v52, %v1987_v31  ;;  %v3974_v1 = vld [vmem:[#allocation2 + $0xf8] sm:$0xf0] }
 0x344   : > { %v2128_v37 = vsel %vm762_vm9, %v2105_v41, %v2127_v32  ;;  %v1998_v40 = vsel %vm592_vm5, %v4873_v22, %v1997_v2  ;;  %2015 = vst [vmem:[#allocation2 + $0x8c] sm:$0xf] %v1999_v33  ;;  %v3989_v60 = vld [vmem:[#allocation2 + $0x170] sm:$0xf0]  ;;  %v2122_v32 = vrot.slane %v4913_v4, 4  ;;  %v2394_v2 = vrot.slane %v4951_v30, 4 }
 0x345   : > { %2146 = vst [vmem:[#allocation2 + $0xcc] sm:$0xff] %v2128_v37  ;;  %v3835_v46 = vor.u32 %v3989_v60, %v3834_v16  ;;  %v3774_v37 = vld [vmem:[#allocation2 + $0xf0] sm:$0xf] }
 0x346   : > { %2014 = vst [vmem:[#allocation2 + $0x84] sm:$0xff] %v1998_v40  ;;  %v3775_v40 = vor.u32 %v3974_v1, %v3774_v37 }
 0x347   : > { %2871 = vmatpush.bf16.msra.mxu1 %v3835_v46 }
 0x348   : > { %v2383_v49 = vpop.permute.xlu1 %2382  ;;  %v2183_v51 = vpop.permute.xlu0 %2182 }
 0x349   : > { %v2393_v43 = vrot.slane %v2383_v49, 4  ;;  %v4960_v12 = vpop.permute.xlu2 %2374  ;;  %v2191_v50 = vrot.slane %v2183_v51, 4 }
 0x34a   : > { %v2389_v22 = vrot.slane %v4960_v12, 4 }
 0x34b   : > { %v2404_v42 = vsel %vm1102_vm1, %v2383_v49, %v2393_v43  ;;  %v2201_v36 = vsel %vm505_vm0, %v2190_v10, %v2191_v50  ;;  %2872 = vmatpush.bf16.msra.mxu1 %v3823_v53  ;;  %v2203_v55 = vsel %vm847_vm7, %v2183_v51, %v2191_v50  ;;  %v3952_v49 = vld [vmem:[#allocation2 + $0x4c] sm:$0xf] }
 0x34c   : > { %2421 = vst [vmem:[#allocation2 + $0x1a0] sm:$0xf] %v2404_v42  ;;  %v2398_v19 = vsel %vm1102_vm1, %v4960_v12, %v2389_v22  ;;  %v2202_v14 = vsel %vm847_vm7, %v4879_v28, %v2201_v36  ;;  %v3950_v42 = vld [vmem:[#allocation2 + $0x38] sm:$0xf0]  ;;  %v3680_v36 = vld [vmem:[#allocation2 + $0x3c] sm:$0xf0] }
 0x34d   : > { %2417 = vst [vmem:[#allocation2 + $0x188] sm:$0xf] %v2398_v19  ;;  %v3959_v58 = vld [vmem:[#allocation2 + $0x80] sm:$0xf0]  ;;  %v3716_v25 = vld [vmem:[#allocation2 + $0x84] sm:$0xf0] }
 0x34e   : > { %2218 = vst [vmem:[#allocation2 + $0x114] sm:$0xff] %v2202_v14  ;;  %v3715_v61 = vor.u32 %v3959_v58, %v3714_v29  ;;  %v3719_v62 = vor.u32 %v3958_v56, %v3716_v25  ;;  %v3949_v19 = vld [vmem:[#allocation2 + $0x34] sm:$0xf]  ;;  %v3666_v58 = vld [vmem:[#allocation2 + $0x18] sm:$0xf]  ;;  %v2505_v12 = vld [vmem:[%s5289_s6 + $0x8] sm:$0xff] }
 0x34f   : > { %2219 = vst [vmem:[#allocation2 + $0x11c] sm:$0xf] %v2203_v55  ;;  %2873 = vmatpush.bf16.msra.mxu1 %v3811_v11  ;;  %v3946_v11 = vld [vmem:[#allocation2 + $0x1c] sm:$0xf]  ;;  %v3668_v25 = vld [vmem:[#allocation2 + $0x24] sm:$0xf0]  ;;  %v3667_v63 = vor.u32 %v3947_v54, %v3666_v58  ;;  %2515 = vperm.xlu0 %4026, %v2505_v12  }
 0x350   : > { %2854 = vmatpush.bf16.msra.mxu0 %v3715_v61  ;;  %2911 = vmatpush.bf16.msrb.mxu2 %v3719_v62  ;;  %v1911_v0 = vpop.permute.xlu1 %1910  ;;  %v2381_v28 = vpop.permute.xlu0 %2380  ;;  %v3762_v62 = vld [vmem:[#allocation2 + $0xd8] sm:$0xf]  ;;  %v3981_v58 = vld [vmem:[#allocation2 + $0x130] sm:$0xf0]  ;;  %v3940_v12 = vld [vmem:[%s5288_s5 + $0x1c] sm:$0xf] }
 0x351   : > { %v1919_v34 = vrot.slane %v1911_v0, 4  ;;  %v2392_v9 = vrot.slane %v2381_v28, 4 }
 0x353   : > { %v1929_v7 = vsel %vm505_vm0, %v1918_v3, %v1919_v34  ;;  %v1931_v44 = vsel %vm507_vm6, %v1911_v0, %v1919_v34  ;;  %v2402_v23 = vsel %vm505_vm0, %v2392_v9, %v2393_v43  ;;  %2874 = vmatpush.bf16.msra.mxu1 %v3799_v13  ;;  %v3671_v34 = vor.u32 %v3946_v11, %v3668_v25  ;;  %v3968_v9 = vld [vmem:[#allocation2 + $0xc8] sm:$0xf0]  ;;  %v3836_v13 = vld [vmem:[#allocation2 + $0x174] sm:$0xf0]  ;;  %v3979_v25 = vld [vmem:[#allocation2 + $0x124] sm:$0xf] }
 0x354   : > { %v1930_v6 = vsel %vm507_vm6, %v4908_v39, %v1929_v7  ;;  %1947 = vst [vmem:[#allocation2 + $0x5c] sm:$0xf] %v1931_v44  ;;  %v2403_v27 = vsel %vm1102_vm1, %v2381_v28, %v2402_v23  ;;  %2855 = vmatpush.bf16.msra.mxu0 %v3703_v18  ;;  %2912 = vmatpush.bf16.msrb.mxu2 %v3707_v20  ;;  %v3938_v18 = vld [vmem:[%s5288_s5 + $0x8] sm:$0xf0]  ;;  %v3937_v20 = vld [vmem:[%s5288_s5 + $0x4] sm:$0xf] }
 0x355   : > { %1946 = vst [vmem:[#allocation2 + $0x54] sm:$0xff] %v1930_v6  ;;  %v3977_v41 = vld [vmem:[#allocation2 + $0x110] sm:$0xf0]  ;;  %v3632_v7 = vld [vmem:[%s5288_s5 + $0xc] sm:$0xf0] }
 0x356   : > { %2420 = vst [vmem:[#allocation2 + $0x198] sm:$0xff] %v2403_v27  ;;  %v3787_v52 = vor.u32 %v3977_v41, %v3786_v26  ;;  %v3944_v23 = vld [vmem:[#allocation2 + $0x8] sm:$0xf0]  ;;  %v3750_v6 = vld [vmem:[#allocation2 + $0xc0] sm:$0xf]  ;;  %v5010_v37 = vor.u32 %v3937_v20, %v3632_v7 }
 0x357   : > { %v3990_v27 = vld [vmem:[#allocation2 + $0x178] sm:$0xf0]  ;;  %v3751_v1 = vor.u32 %v3968_v9, %v3750_v6  ;;  %v3794_v20 = vld [vmem:[#allocation2 + $0x110] sm:$0xf]  ;;  %v3776_v6 = vld [vmem:[#allocation2 + $0xfc] sm:$0xf0] }
 0x358   : > { %2875 = vmatpush.bf16.msra.mxu1 %v3787_v52  ;;  %v2115_v38 = vpop.permute.xlu1 %2114  ;;  %v2387_v31 = vpop.permute.xlu0 %2386  ;;  %v3655_v52 = vor.u32 %v3944_v23, %v3654_v57  ;;  %v3978_v9 = vld [vmem:[#allocation2 + $0x118] sm:$0xf0] }
 0x359   : > { %v2123_v33 = vrot.slane %v2115_v38, 4  ;;  %v2395_v39 = vrot.slane %v2387_v31, 4  ;;  %v3795_v23 = vor.u32 %v3978_v9, %v3794_v20  ;;  %v3945_v9 = vld [vmem:[#allocation2 + $0x10] sm:$0xf0] }
 0x35b   : > { %v2133_v16 = vsel %vm505_vm0, %v2122_v32, %v2123_v33  ;;  %v2135_v60 = vsel %vm762_vm9, %v2115_v38, %v2123_v33  ;;  %v2405_v46 = vsel %vm505_vm0, %v2394_v2, %v2395_v39  ;;  %v2407_v10 = vsel %vm1102_vm1, %v2387_v31, %v2395_v39  ;;  %v3656_v38 = vld [vmem:[#allocation2 + $0xc] sm:$0xf0]  ;;  %v3988_v31 = vld [vmem:[#allocation2 + $0x16c] sm:$0xf] }
 0x35c   : > { %v2134_v51 = vsel %vm762_vm9, %v4913_v4, %v2133_v16  ;;  %2151 = vst [vmem:[#allocation2 + $0xec] sm:$0xf] %v2135_v60  ;;  %v2406_v8 = vsel %vm1102_vm1, %v4951_v30, %v2405_v46  ;;  %2876 = vmatpush.bf16.msra.mxu1 %v3775_v40  ;;  %v3953_v43 = vld [vmem:[#allocation2 + $0x50] sm:$0xf0]  ;;  %v3692_v50 = vld [vmem:[#allocation2 + $0x54] sm:$0xf0]  ;;  %v3683_v30 = vor.u32 %v3949_v19, %v3680_v36 }
 0x35d   : > { %2150 = vst [vmem:[#allocation2 + $0xe4] sm:$0xff] %v2134_v51  ;;  %v3691_v53 = vor.u32 %v3953_v43, %v3690_v15  ;;  %v3695_v45 = vor.u32 %v3952_v49, %v3692_v50  ;;  %v3678_v4 = vld [vmem:[#allocation2 + $0x30] sm:$0xf]  ;;  %v3858_v28 = vld [vmem:[#allocation2 + $0x198] sm:$0xf]  ;;  %v3659_v32 = vor.u32 %v3943_v21, %v3656_v38  ;;  %v3839_v2 = vor.u32 %v3988_v31, %v3836_v13 }
 0x35e   : > { %2422 = vst [vmem:[#allocation2 + $0x1a4] sm:$0xff] %v2406_v8  ;;  %v3679_v55 = vor.u32 %v3950_v42, %v3678_v4  ;;  %v3842_v33 = vld [vmem:[#allocation2 + $0x170] sm:$0xf]  ;;  %v5008_v39 = vor.u32 %v3938_v18, %v3630_v17  ;;  %v3824_v46 = vld [vmem:[#allocation2 + $0x15c] sm:$0xf0] }
 0x35f   : > { %2423 = vst [vmem:[#allocation2 + $0x1ac] sm:$0xf] %v2407_v10  ;;  %2856 = vmatpush.bf16.msra.mxu0 %v3691_v53  ;;  %2913 = vmatpush.bf16.msrb.mxu2 %v3695_v45  ;;  %v3843_v60 = vor.u32 %v3990_v27, %v3842_v33  ;;  %v3987_v49 = vld [vmem:[#allocation2 + $0x160] sm:$0xf0]  ;;  %v3985_v51 = vld [vmem:[#allocation2 + $0x154] sm:$0xf] }
 0x360   : > { %v2373_v29 = vpop.permute.xlu1 %2372  ;;  %v3827_v8 = vor.u32 %v3985_v51, %v3824_v46  ;;  %v3830_v10 = vld [vmem:[#allocation2 + $0x158] sm:$0xf]  ;;  %v3982_v50 = vld [vmem:[#allocation2 + $0x13c] sm:$0xf]  ;;  %v3818_v53 = vld [vmem:[#allocation2 + $0x140] sm:$0xf] }
 0x361   : > { %v2388_v14 = vrot.slane %v2373_v29, 4  ;;  %v3831_v43 = vor.u32 %v3987_v49, %v3830_v10  ;;  %v3812_v45 = vld [vmem:[#allocation2 + $0x144] sm:$0xf0]  ;;  %v3984_v36 = vld [vmem:[#allocation2 + $0x148] sm:$0xf0] }
 0x362   : > { %v3815_v42 = vor.u32 %v3982_v50, %v3812_v45  ;;  %v3819_v4 = vor.u32 %v3984_v36, %v3818_v53  ;;  %v3746_v19 = vld [vmem:[#allocation2 + $0xb0] sm:$0xf]  ;;  %v3976_v13 = vld [vmem:[#allocation2 + $0x10c] sm:$0xf]  ;;  %v3782_v31 = vld [vmem:[#allocation2 + $0xf8] sm:$0xf] }
 0x363   : > { %v2396_v56 = vsel %vm505_vm0, %v2388_v14, %v2389_v22  ;;  %2857 = vmatpush.bf16.msra.mxu0 %v3679_v55  ;;  %2914 = vmatpush.bf16.msrb.mxu2 %v3683_v30  ;;  %v2377_v22 = vpop.permute.xlu0 %2376  ;;  %v3638_v14 = vld [vmem:[%s5288_s5 + $0x8] sm:$0xf]  ;;  %v3939_v55 = vld [vmem:[%s5288_s5 + $0x10] sm:$0xf0]  ;;  %v3960_v27 = vld [vmem:[#allocation2 + $0x88] sm:$0xf0] }
 0x364   : > { %v2397_v61 = vsel %vm1102_vm1, %v2373_v29, %v2396_v56  ;;  %v3971_v59 = vld [vmem:[#allocation2 + $0xe0] sm:$0xf0]  ;;  %v2390_v26 = vrot.slane %v2377_v22, 4  ;;  %v3800_v29 = vld [vmem:[#allocation2 + $0x12c] sm:$0xf0] }
 0x365   : > { %2416 = vst [vmem:[#allocation2 + $0x180] sm:$0xff] %v2397_v61  ;;  %v3763_v0 = vor.u32 %v3971_v59, %v3762_v62  ;;  %v3995_v24 = vld [vmem:[#allocation2 + $0x1a0] sm:$0xf0]  ;;  %v3806_v56 = vld [vmem:[#allocation2 + $0x128] sm:$0xf]  ;;  %v3803_v59 = vor.u32 %v3979_v25, %v3800_v29 }
 0x366   : > { %v3859_v3 = vor.u32 %v3995_v24, %v3858_v28  ;;  %v3966_v61 = vld [vmem:[#allocation2 + $0xb8] sm:$0xf0]  ;;  %v3963_v62 = vld [vmem:[#allocation2 + $0xa0] sm:$0xf0]  ;;  %v3642_v28 = vld [vmem:[%s5288_s5 + $0x18] sm:$0xf]  ;;  %v3807_v21 = vor.u32 %v3981_v58, %v3806_v56 }
 0x367   : > { %2858 = vmatpush.bf16.msra.mxu0 %v3667_v63  ;;  %2877 = vmatpush.bf16.msra.mxu1 %v3763_v0  ;;  %v3747_v57 = vor.u32 %v3966_v61, %v3746_v19  ;;  %v5024_v63 = vor.u32 %v3939_v55, %v3638_v14  ;;  %v3788_v0 = vld [vmem:[#allocation2 + $0x114] sm:$0xf0]  ;;  %v3941_v24 = vld [vmem:[%s5288_s5 + $0x20] sm:$0xf0]  ;;  %v3957_v33 = vld [vmem:[#allocation2 + $0x70] sm:$0xf0] }
 0x368   : > { %2896 = vmatpush.bf16.msra.mxu3 %v3859_v3  ;;  %2915 = vmatpush.bf16.msrb.mxu2 %v3671_v34  ;;  %v2379_v44 = vpop.permute.xlu1 %2378  ;;  %v2504_v3 = vld [vmem:[%s5289_s6] sm:$0xff]  ;;  %v3734_v34 = vld [vmem:[#allocation2 + $0x98] sm:$0xf]  ;;  %v3791_v18 = vor.u32 %v3976_v13, %v3788_v0  ;;  %v5043_v7 = vor.u32 %v3941_v24, %v3642_v28  ;;  %v3698_v10 = vld [vmem:[#allocation2 + $0x50] sm:$0xf] }
 0x369   : > { %v2391_v41 = vrot.slane %v2379_v44, 4  ;;  %v3735_v17 = vor.u32 %v3963_v62, %v3734_v34  ;;  %2510 = vperm.xlu2 %4025, %v2504_v3   ;;  %v3770_v49 = vld [vmem:[#allocation2 + $0xe0] sm:$0xf]  ;;  %v3969_v50 = vld [vmem:[#allocation2 + $0xd0] sm:$0xf0]  ;;  %v2507_v34 = vld [vmem:[%s5289_s6 + $0x18] sm:$0xff] }
 0x36a   : > { %v3758_v53 = vld [vmem:[#allocation2 + $0xc8] sm:$0xf]  ;;  %v3650_v45 = vld [vmem:[%s5288_s5 + $0x20] sm:$0xf]  ;;  %v3967_v36 = vld [vmem:[#allocation2 + $0xc4] sm:$0xf] }
 0x36b   : > { %v2399_v40 = vsel %vm505_vm0, %v2390_v26, %v2391_v41  ;;  %v2401_v16 = vsel %vm1102_vm1, %v2379_v44, %v2391_v41  ;;  %2859 = vmatpush.bf16.msra.mxu0 %v3655_v52  ;;  %2878 = vmatpush.bf16.msra.mxu1 %v3751_v1  ;;  %v3975_v26 = vld [vmem:[#allocation2 + $0x100] sm:$0xf0]  ;;  %v3973_v41 = vld [vmem:[#allocation2 + $0xf4] sm:$0xf]  ;;  %v3722_v52 = vld [vmem:[#allocation2 + $0x80] sm:$0xf]  ;;  %v3759_v55 = vor.u32 %v3969_v50, %v3758_v53 }
 0x36c   : > { %v2400_v15 = vsel %vm1102_vm1, %v2377_v22, %v2399_v40  ;;  %2419 = vst [vmem:[#allocation2 + $0x194] sm:$0xf] %v2401_v16  ;;  %2916 = vmatpush.bf16.msrb.mxu2 %v3659_v32  ;;  %v3846_v30 = vld [vmem:[#allocation2 + $0x180] sm:$0xf]  ;;  %v3644_v22 = vld [vmem:[%s5288_s5 + $0x24] sm:$0xf0]  ;;  %v3779_v1 = vor.u32 %v3973_v41, %v3776_v6  ;;  %v3723_v38 = vor.u32 %v3960_v27, %v3722_v52 }
 0x36d   : > { %2418 = vst [vmem:[#allocation2 + $0x18c] sm:$0xff] %v2400_v15  ;;  %v5045_v44 = vor.u32 %v3940_v12, %v3644_v22  ;;  %v3783_v32 = vor.u32 %v3975_v26, %v3782_v31  ;;  %v3972_v40 = vld [vmem:[#allocation2 + $0xe8] sm:$0xf0]  ;;  %v3970_v16 = vld [vmem:[#allocation2 + $0xdc] sm:$0xf]  ;;  %vm3063_vm0 = vcmask 15360  }
 0x36e   : > { %2860 = vmatmul.bf16.vlgmr.msra.gmra.mxu0 %v5008_v39  ;;  %2879 = vmatmul.bf16.vlgmr.msra.gmra.mxu1 %v5010_v37  ;;  %v3771_v51 = vor.u32 %v3972_v40, %v3770_v49  ;;  %v3860_v29 = vld [vmem:[#allocation2 + $0x1a4] sm:$0xf0]  ;;  %v3951_v58 = vld [vmem:[#allocation2 + $0x40] sm:$0xf0]  ;;  %v3686_v61 = vld [vmem:[#allocation2 + $0x38] sm:$0xf] }
 0x36f   : > { %2928 = vmatpush.bf16.msrb.mxu0 %v3839_v2  ;;  %3997 = vmatpush.bf16.msrb.mxu1 %v3839_v2  ;;  %v3764_v2 = vld [vmem:[#allocation2 + $0xe4] sm:$0xf0]  ;;  %v3991_v0 = vld [vmem:[#allocation2 + $0x184] sm:$0xf]  ;;  %v3674_v24 = vld [vmem:[#allocation2 + $0x20] sm:$0xf] }
 0x370   : > { %2985 = vmatpush.bf16.msra.mxu2 %v3843_v60  ;;  %v3710_v60 = vld [vmem:[#allocation2 + $0x68] sm:$0xf]  ;;  %v3767_v46 = vor.u32 %v3970_v16, %v3764_v2  ;;  %v3948_v22 = vld [vmem:[#allocation2 + $0x28] sm:$0xf0] }
 0x371   : > { %2917 = vmatmul.bf16.vlgmr.msrb.gmra.mxu2 %v5008_v39  ;;  %v3711_v15 = vor.u32 %v3957_v33, %v3710_v60  ;;  %v3854_v28 = vld [vmem:[#allocation2 + $0x188] sm:$0xf]  ;;  %v3675_v3 = vor.u32 %v3948_v22, %v3674_v24  ;;  %2525 = vperm.xlu2 %4025, %v2507_v34   ;;  %v2521_v22 = vpop.permute.xlu1 %2520 }
 0x372   : > { %v3662_v13 = vld [vmem:[#allocation2 + $0x8] sm:$0xf] }
 0x373   : > { %2929 = vmatpush.bf16.msrb.mxu0 %v3827_v8  ;;  %3998 = vmatpush.bf16.msrb.mxu1 %v3827_v8  ;;  %v3752_v8 = vld [vmem:[#allocation2 + $0xcc] sm:$0xf0] }
 0x374   : > { %2986 = vmatpush.bf16.msra.mxu2 %v3831_v43  ;;  %v3992_v54 = vld [vmem:[#allocation2 + $0x188] sm:$0xf0]  ;;  %v3954_v43 = vld [vmem:[#allocation2 + $0x58] sm:$0xf0]  ;;  %v3755_v19 = vor.u32 %v3967_v36, %v3752_v8  ;;  %v3848_v62 = vld [vmem:[#allocation2 + $0x18c] sm:$0xf0] }
 0x375   : > { %v3847_v11 = vor.u32 %v3992_v54, %v3846_v30  ;;  %v3699_v14 = vor.u32 %v3954_v43, %v3698_v10  ;;  %v3994_v30 = vld [vmem:[#allocation2 + $0x19c] sm:$0xf]  ;;  %v3866_v54 = vld [vmem:[#allocation2 + $0x1a0] sm:$0xf] }
 0x377   : > { %2930 = vmatpush.bf16.msrb.mxu0 %v3815_v42  ;;  %3999 = vmatpush.bf16.msrb.mxu1 %v3815_v42  ;;  %v3942_v42 = vld [vmem:[%s5288_s5 + $0x28] sm:$0xf0] }
 0x378   : > { %2987 = vmatpush.bf16.msra.mxu2 %v3819_v4  ;;  %2897 = vmatpush.bf16.msra.mxu3 %v3847_v11  ;;  %v3996_v4 = vld [vmem:[#allocation2 + $0x1a8] sm:$0xf0]  ;;  %v3651_v56 = vor.u32 %v3942_v42, %v3650_v45  ;;  %v3863_v11 = vor.u32 %v3994_v30, %v3860_v29 }
 0x379   : > { %v3867_v25 = vor.u32 %v3996_v4, %v3866_v54 }
 0x37b   : > { %2931 = vmatpush.bf16.msrb.mxu0 %v3803_v59  ;;  %4000 = vmatpush.bf16.msrb.mxu1 %v3803_v59  ;;  %v3993_v59 = vld [vmem:[#allocation2 + $0x190] sm:$0xf0] }
 0x37c   : > { %2966 = vmatpush.bf16.msrb.mxu3 %v3747_v57  ;;  %2988 = vmatpush.bf16.msra.mxu2 %v3807_v21  ;;  %v3687_v57 = vor.u32 %v3951_v58, %v3686_v61  ;;  %v3851_v21 = vor.u32 %v3991_v0, %v3848_v62  ;;  %v3855_v12 = vor.u32 %v3993_v59, %v3854_v28 }
 0x37d   : > { %3868 = vmatmul.msk.bf16.vlgmr.msra.gmra.mxu3 %vm1540_vm8, %v5024_v63 }
 0x37e   : > { %2865 = vmatmul.bf16.gmra.mxu0 %v5043_v7  ;;  %2884 = vmatmul.bf16.gmra.mxu1 %v5045_v44 }
 0x37f   : > { %2932 = vmatpush.bf16.msrb.mxu0 %v3791_v18  ;;  %4001 = vmatpush.bf16.msrb.mxu1 %v3791_v18  ;;  %v3172_v18 = vld [vmem:[%s4147_s28 + $0x10] sm:$0xff] }
 0x380   : > { %2967 = vmatpush.bf16.msrb.mxu3 %v3735_v17  ;;  %2989 = vmatpush.bf16.msra.mxu2 %v3795_v23  ;;  %v3663_v17 = vor.u32 %v3945_v9, %v3662_v13  ;;  %v3174_v23 = vld [vmem:[%s4147_s28 + $0x20] sm:$0xff] }
 0x381   : > { %2922 = vmatmul.bf16.gmra.mxu2 %v5043_v7  ;;  %3206 = vrot.lane.b32.xlu2 %v3172_v18, %s4059_s18 }
 0x383   : > { %2933 = vmatpush.bf16.msrb.mxu0 %v3779_v1  ;;  %4002 = vmatpush.bf16.msrb.mxu1 %v3779_v1 }
 0x384   : > { %2968 = vmatpush.bf16.msrb.mxu3 %v3723_v38  ;;  %2990 = vmatpush.bf16.msra.mxu2 %v3783_v32 }
 0x387   : > { %2934 = vmatpush.bf16.msrb.mxu0 %v3767_v46  ;;  %4003 = vmatpush.bf16.msrb.mxu1 %v3767_v46 }
 0x388   : > { %2969 = vmatpush.bf16.msrb.mxu3 %v3711_v15  ;;  %2991 = vmatpush.bf16.msra.mxu2 %v3771_v51 }
 0x38b   : > { %2935 = vmatpush.bf16.msrb.mxu0 %v3755_v19  ;;  %4004 = vmatpush.bf16.msrb.mxu1 %v3755_v19 }
 0x38c   : > { %2970 = vmatpush.bf16.msrb.mxu3 %v3699_v14  ;;  %2992 = vmatpush.bf16.msra.mxu2 %v3759_v55 }
 0x38d   : > { %3869 = vmatmul.msk.bf16.gmra.mxu3 %vm1540_vm8, %v3651_v56 }
 0x38e   : > { %2936 = vmatmul.bf16.vlgmr.msrb.gmra.mxu0 %v5010_v37  ;;  %2941 = vmatmul.bf16.vlgmr.msrb.gmra.mxu1 %v5045_v44 }
 0x38f   : > { %2953 = vmatpush.bf16.msra.mxu1 %v3863_v11  ;;  %3010 = vmatpush.bf16.msra.mxu0 %v3867_v25 }
 0x390   : > { %2971 = vmatpush.bf16.msrb.mxu3 %v3687_v57 }
 0x391   : > { %2993 = vmatmul.bf16.vlgmr.msra.gmra.mxu2 %v5010_v37  ;;  %v3171_v37 = vld [vmem:[%s4147_s28 + $0x8] sm:$0xff] }
 0x392   : > { %3204 = vrot.lane.b32.xlu0 %v3171_v37, %s4059_s18 }
 0x393   : > { %2954 = vmatpush.bf16.msra.mxu1 %v3851_v21  ;;  %3011 = vmatpush.bf16.msra.mxu0 %v3855_v12 }
 0x394   : > { %2972 = vmatpush.bf16.msrb.mxu3 %v3675_v3 }
 0x398   : > { %2973 = vmatpush.bf16.msrb.mxu3 %v3663_v17 }
 0x39a   : > { %3210 = vrot.lane.b32.xlu0 %v3174_v23, %s4059_s18 }
 0x39d   : > { %2974 = vmatmul.bf16.vlgmr.msrb.gmra.mxu3 %v5008_v39 }
 0x39e   : > { %3870 = vmatmul.msk.bf16.vlgmr.msra.gmra.mxu1 %vm1540_vm8, %v5024_v63  ;;  %3872 = vmatmul.msk.bf16.vlgmr.msra.gmra.mxu0 %vm1540_vm8, %v5024_v63 }
 0x3a1   : > { %2998 = vmatmul.bf16.gmra.mxu2 %v5045_v44 }
 0x3ad   : > { %2979 = vmatmul.bf16.gmra.mxu3 %v5043_v7 }
 0x3ae   : > { %3871 = vmatmul.msk.bf16.gmra.mxu1 %vm1540_vm8, %v3651_v56  ;;  %3873 = vmatmul.msk.bf16.gmra.mxu0 %vm1540_vm8, %v3651_v56 }
 0x3c1   : > { %v2516_v42 = vpop.permute.xlu0 %2515 }
 0x3c3   : > { %v2511_v46 = vpop.permute.xlu2 %2510 }
 0x3cb   : > { %v2526_v23 = vpop.permute.xlu2 %2525 }
 0x3eb   : > { %v2861_v39 = vpop.f32.mrf.mxu0  ;;  %v2880_v20 = vpop.f32.mrf.mxu1 }
 0x3ec   : > { %v2862_v49 = vadd.f32 %v2861_v39, %v2511_v46 }
 0x3ee   : > { %v2881_v53 = vadd.f32 %v2880_v20, %v2862_v49 }
 0x3f3   : > { %v2863_v63 = vpop.f32.mrf.mxu0  ;;  %v2882_v6 = vpop.f32.mrf.mxu1 }
 0x3f4   : > { %v2918_v44 = vpop.f32.mrf.mxu2  ;;  %v2864_v19 = vadd.f32 %v2863_v63, %v2516_v42 }
 0x3f5   : > { %v2919_v51 = vadd.f32 %v2918_v44, %v2511_v46 }
 0x3f6   : > { %v2883_v61 = vadd.f32 %v2882_v6, %v2864_v19 }
 0x3fb   : > { %v2866_v27 = vpop.f32.mrf.mxu0  ;;  %v2885_v7 = vpop.f32.mrf.mxu1 }
 0x3fc   : > { %v2920_v41 = vpop.f32.mrf.mxu2  ;;  %v2867_v3 = vadd.f32 %v2866_v27, %v2521_v22 }
 0x3fd   : > { %v2921_v14 = vadd.f32 %v2920_v41, %v2516_v42 }
 0x3fe   : > { %v2886_v20 = vadd.f32 %v2885_v7, %v2867_v3  ;;  %v3055_v3 = vld [vmem:[%s5290_s7] sm:$0xff] }
 0x400   : > { %v2899_v26 = vpop.f32.mrf.mxu3 }
 0x401   : > { %v2900_v29 = vadd.f32 %v2899_v26, %v2881_v53 }
 0x403   : > { %v5078_v52 = vpop.f32.mrf.mxu0  ;;  %v5080_v1 = vpop.f32.mrf.mxu1  ;;  %v5088_v54 = vmul.f32 %v2900_v29, %v4579_v47 }
 0x404   : > { %v2923_v31 = vpop.f32.mrf.mxu2 }
 0x405   : > { %v2924_v34 = vadd.f32 %v2923_v31, %v2521_v22 }
 0x408   : > { %v2901_v38 = vpop.f32.mrf.mxu3 }
 0x409   : > { %v2902_v24 = vadd.f32 %v2901_v38, %v2883_v61  ;;  %v5147_v61 = vpop.permute.xlu2 %3206 }
 0x40b   : > { %v2937_v32 = vpop.f32.mrf.mxu0  ;;  %v2942_v2 = vpop.f32.mrf.mxu1  ;;  %v5100_v17 = vmul.f32 %v2902_v24, %v4579_v47  ;;  %v3056_v24 = vld [vmem:[%s5290_s7 + $0x8] sm:$0xff] }
 0x40c   : > { %v2925_v40 = vpop.f32.mrf.mxu2  ;;  %v2938_v10 = vadd.f32 %v2937_v32, %v2919_v51  ;;  %v2943_v37 = vadd.f32 %v2942_v2, %v2924_v34  ;;  %v2869_v2 = vadd.f32 %v5078_v52, %v2526_v23  ;;  %v3057_v34 = vld [vmem:[%s5290_s7 + $0x10] sm:$0xff] }
 0x410   : > { %v2904_v33 = vpop.f32.mrf.mxu3 }
 0x411   : > { %v2905_v41 = vadd.f32 %v2904_v33, %v2886_v20  ;;  %v2888_v33 = vadd.f32 %v5080_v1, %v2869_v2  ;;  %v3058_v20 = vld [vmem:[%s5290_s7 + $0x18] sm:$0xff] }
 0x413   : > { %v2939_v16 = vpop.f32.mrf.mxu0  ;;  %v2944_v60 = vpop.f32.mrf.mxu1  ;;  %v5113_v49 = vmul.f32 %v2905_v41, %v4579_v47 }
 0x414   : > { %v2994_v8 = vpop.f32.mrf.mxu2  ;;  %v2940_v56 = vadd.f32 %v2939_v16, %v2921_v14  ;;  %v2926_v16 = vadd.f32 %v2925_v40, %v2526_v23 }
 0x418   : > { %v5082_v15 = vpop.f32.mrf.mxu3 }
 0x419   : > { %v2907_v53 = vadd.f32 %v5082_v15, %v2888_v33  ;;  %v3077_v33 = vld [vmem:[%s5291_s8] sm:$0x1] }
 0x41b   : > { %v2956_v43 = vpop.f32.mrf.mxu1  ;;  %v3013_v50 = vpop.f32.mrf.mxu0 }
 0x41c   : > { %v2957_v45 = vadd.f32 %v2956_v43, %v2938_v10  ;;  %v2996_v25 = vpop.f32.mrf.mxu2 }
 0x41e   : > { %v5085_v55 = vmul.f32 %v2957_v45, %v4582_v48 }
 0x420   : > { %v2975_v36 = vpop.f32.mrf.mxu3  ;;  %v3035_v57 = vadd.f32 %v5085_v55, %v5088_v54 }
 0x421   : > { %v2976_v4 = vadd.f32 %v2975_v36, %v2511_v46 }
 0x423   : > { %v2995_v30 = vadd.f32 %v2994_v8, %v2976_v4  ;;  %v2958_v11 = vpop.f32.mrf.mxu1  ;;  %v3015_v28 = vpop.f32.mrf.mxu0  ;;  %v2945_v8 = vadd.f32 %v2944_v60, %v2926_v16  ;;  %v5127_v4 = vmul.f32 %v2907_v53, %v4579_v47  ;;  %v3175_v47 = vld [vmem:[%s4147_s28 + $0x28] sm:$0xff] }
 0x424   : > { %v2959_v59 = vadd.f32 %v2958_v11, %v2940_v56  ;;  %v2999_v26 = vpop.f32.mrf.mxu2  ;;  %v3170_v56 = vld [vmem:[%s4147_s28] sm:$0xff]  ;;  %v3176_v11 = vld [vmem:[%s4147_s28 + $0x30] sm:$0xff] }
 0x425   : > { %v3014_v58 = vadd.f32 %v3013_v50, %v2995_v30 }
 0x426   : > { %v5097_v9 = vmul.f32 %v2959_v59, %v4582_v48 }
 0x427   : > { %v5091_v62 = vmul.f32 %v3014_v58, %v4618_v5  ;;  %v3173_v58 = vld [vmem:[%s4147_s28 + $0x18] sm:$0xff] }
 0x428   : > { %v2977_v0 = vpop.f32.mrf.mxu3  ;;  %v3039_v44 = vadd.f32 %v5097_v9, %v5100_v17 }
 0x429   : > { %v2978_v21 = vadd.f32 %v2977_v0, %v2516_v42  ;;  %v3036_v12 = vadd.f32 %v3035_v57, %v5091_v62 }
 0x42b   : > { %v2997_v13 = vadd.f32 %v2996_v25, %v2978_v21  ;;  %3037 = vadd.xlane.f32.xlu1 %v3036_v12  ;;  %v2961_v39 = vpop.f32.mrf.mxu1  ;;  %v3018_v32 = vpop.f32.mrf.mxu0  ;;  %v3177_v25 = vld [vmem:[%s4147_s28 + $0x38] sm:$0xff] }
 0x42c   : > { %v2962_v6 = vadd.f32 %v2961_v39, %v2943_v37  ;;  %v3001_v36 = vpop.f32.mrf.mxu2 }
 0x42d   : > { %v3016_v18 = vadd.f32 %v3015_v28, %v2997_v13 }
 0x42e   : > { %v5110_v7 = vmul.f32 %v2962_v6, %v4582_v48 }
 0x42f   : > { %v5103_v63 = vmul.f32 %v3016_v18, %v4618_v5 }
 0x430   : > { %v2980_v27 = vpop.f32.mrf.mxu3  ;;  %v3043_v43 = vadd.f32 %v5110_v7, %v5113_v49 }
 0x431   : > { %v2981_v38 = vadd.f32 %v2980_v27, %v2521_v22  ;;  %v3040_v31 = vadd.f32 %v3039_v44, %v5103_v63 }
 0x433   : > { %v3000_v46 = vadd.f32 %v2999_v26, %v2981_v38  ;;  %3041 = vadd.xlane.f32.xlu2 %v3040_v31  ;;  %v2963_v10 = vpop.f32.mrf.mxu1  ;;  %v3020_v29 = vpop.f32.mrf.mxu0 }
 0x434   : > { %v2964_v52 = vadd.f32 %v2963_v10, %v2945_v8 }
 0x435   : > { %v3019_v51 = vadd.f32 %v3018_v32, %v3000_v46 }
 0x436   : > { %v5124_v60 = vmul.f32 %v2964_v52, %v4582_v48  ;;  %v3079_v48 = vld [vmem:[#allocation5] sm:$0x1] }
 0x437   : > { %v5119_v50 = vmul.f32 %v3019_v51, %v4618_v5 }
 0x438   : > { %v2982_v40 = vpop.f32.mrf.mxu3  ;;  %v3047_v15 = vadd.f32 %v5124_v60, %v5127_v4 }
 0x439   : > { %v2983_v45 = vadd.f32 %v2982_v40, %v2526_v23  ;;  %v3044_v42 = vadd.f32 %v3043_v43, %v5119_v50 }
 0x43b   : > { %v3002_v1 = vadd.f32 %v3001_v36, %v2983_v45  ;;  %3045 = vadd.xlane.f32.xlu0 %v3044_v42  ;;  %v3090_v42 = vld [vmem:[%s5292_s10 + $0x8] sm:$0xff]  ;;  %v3089_v36 = vld [vmem:[%s5292_s10] sm:$0xff] }
 0x43d   : > { %v3021_v19 = vadd.f32 %v3020_v29, %v3002_v1 }
 0x43f   : > { %v5132_v14 = vmul.f32 %v3021_v19, %v4618_v5  ;;  %v5145_v5 = vpop.permute.xlu0 %3204 }
 0x441   : > { %v3048_v30 = vadd.f32 %v3047_v15, %v5132_v14 }
 0x443   : > { %3049 = vadd.xlane.f32.xlu2 %v3048_v30 }
 0x444   : > { %3083 = vperm.xlu1 %4024, %v3079_v48   ;;  %v3092_v48 = vld [vmem:[%s5292_s10 + $0x18] sm:$0xff] }
 0x447   : > { %v5149_v59 = vpop.permute.xlu0 %3210 }
 0x44c   : > { %3202 = vrot.lane.b32.xlu1 %v3170_v56, %s4059_s18  ;;  %v3091_v56 = vld [vmem:[%s5292_s10 + $0x10] sm:$0xff] }
 0x44f   : > { %3216 = vrot.lane.b32.xlu0 %v3177_v25, %s4059_s18 }
 0x454   : > { %3208 = vrot.lane.b32.xlu1 %v3173_v58, %s4059_s18 }
 0x45b   : > { %3212 = vrot.lane.b32.xlu2 %v3175_v47, %s4059_s18 }
 0x45c   : > { %3214 = vrot.lane.b32.xlu1 %v3176_v11, %s4059_s18 }
 0x49e   : > { %v3038_v0 = vpop.xlane.xlu1 %3037 }
 0x49f   : > { %v3051_v12 = vmul.f32 0.00390625, %v3038_v0  ;;  %v3179_v0 = vld [vmem:[%s4147_s28 + $0x48] sm:$0xff] }
 0x4a0   : > { %3220 = vrot.lane.b32.xlu1 %v3179_v0, %s4059_s18 }
 0x4a1   : > { %v3059_v37 = vmul.f32 %v3055_v3, %v3051_v12  ;;  %v3110_v3 = vld [vmem:[%s5293_s11] sm:$0xff] }
 0x4a3   : > { %v3064_v6 = vsel %vm3063_vm0, %v3059_v37, 0.0 }
 0x4a6   : > { %v3042_v57 = vpop.xlane.xlu2 %3041 }
 0x4a7   : > { %v3052_v28 = vmul.f32 0.00390625, %v3042_v57  ;;  %v3178_v57 = vld [vmem:[%s4147_s28 + $0x40] sm:$0xff] }
 0x4a9   : > { %v3060_v13 = vmul.f32 %v3056_v24, %v3052_v28  ;;  %v3180_v28 = vld [vmem:[%s4147_s28 + $0x50] sm:$0xff]  ;;  %v3181_v24 = vld [vmem:[%s4147_s28 + $0x58] sm:$0xff] }
 0x4ab   : > { %v3065_v39 = vsel %vm3063_vm0, %v3060_v13, 0.0 }
 0x4ac   : > { %v3066_v26 = vadd.f32 %v3065_v39, %v3064_v6 }
 0x4ae   : > { %v3046_v21 = vpop.xlane.xlu0 %3045 }
 0x4af   : > { %v3053_v22 = vmul.f32 0.00390625, %v3046_v21 }
 0x4b1   : > { %v3061_v18 = vmul.f32 %v3057_v34, %v3053_v22  ;;  %v3182_v22 = vld [vmem:[%s4147_s28 + $0x60] sm:$0xff]  ;;  %v3111_v34 = vld [vmem:[%s5293_s11 + $0x8] sm:$0xff] }
 0x4b2   : > { %3226 = vrot.lane.b32.xlu1 %v3182_v22, %s4059_s18 }
 0x4b3   : > { %v3067_v44 = vsel %vm3063_vm0, %v3061_v18, 0.0 }
 0x4b4   : > { %v3068_v38 = vadd.f32 %v3067_v44, %v3066_v26  ;;  %v3113_v26 = vld [vmem:[%s5293_s11 + $0x18] sm:$0xff] }
 0x4b6   : > { %v3050_v23 = vpop.xlane.xlu2 %3049  ;;  %v3084_v10 = vpop.permute.xlu1 %3083 }
 0x4b7   : > { %v3054_v27 = vmul.f32 0.00390625, %v3050_v23  ;;  %v3086_v52 = vperm.slane %v3084_v10, 0 }
 0x4b9   : > { %v3062_v41 = vmul.f32 %v3058_v20, %v3054_v27  ;;  %v3112_v27 = vld [vmem:[%s5293_s11 + $0x10] sm:$0xff] }
 0x4bb   : > { %v3069_v31 = vsel %vm3063_vm0, %v3062_v41, 0.0 }
 0x4bc   : > { %v3070_v32 = vadd.f32 %v3069_v31, %v3068_v38 }
 0x4be   : > { %v3071_v2 = vrot.slane %v3070_v32, 4  ;;  %v5194_v21 = vpop.permute.xlu2 %3212 }
 0x4c0   : > { %v3072_v16 = vadd.f32 %v3071_v2, %v3070_v32 }
 0x4c1   : > { %v5196_v12 = vpop.permute.xlu0 %3216 }
 0x4c2   : > { %v3073_v46 = vrot.slane %v3072_v16, 2 }
 0x4c4   : > { %v3074_v51 = vadd.f32 %v3073_v46, %v3072_v16 }
 0x4c6   : > { %v3075_v8 = vrot.slane %v3074_v51, 1 }
 0x4c8   : > { %v3076_v43 = vadd.f32 %v3075_v8, %v3074_v51 }
 0x4ca   : > { %v3078_v40 = vadd.f32 %v3077_v33, %v3076_v43 }
 0x4cc   : > { %vm3080_vm1 = vcmp.gt.f32.partialorder %v3078_v40, 0.0  ;;  %v3087_v53 = vmul.f32 %v3086_v52, %v3078_v40 }
 0x4ce   : > { %v3088_v45 = vsel %vm3080_vm1, %v3078_v40, %v3087_v53 }
 0x4cf   : > { %v3093_v1 = vperm.slane %v3088_v45, 0 }
 0x4d1   : > { %v3095_v29 = vmul.f32 %v3093_v1, %v3090_v42  ;;  %v3094_v19 = vmul.f32 %v3093_v1, %v3089_v36  ;;  %v3097_v58 = vmul.f32 %v3093_v1, %v3092_v48  ;;  %v3096_v47 = vmul.f32 %v3093_v1, %v3091_v56  ;;  %v3184_v1 = vld [vmem:[%s4147_s28 + $0x70] sm:$0xff]  ;;  %v3203_v56 = vpop.permute.xlu1 %3202 }
 0x4d3   : > { %v3101_v15 = vsel %vm3063_vm0, %v3095_v29, 0.0  ;;  %v3098_v30 = vsel %vm3063_vm0, %v3094_v19, 0.0  ;;  %v3107_v11 = vsel %vm3063_vm0, %v3097_v58, 0.0  ;;  %v3104_v25 = vsel %vm3063_vm0, %v3096_v47, 0.0  ;;  %v3183_v29 = vld [vmem:[%s4147_s28 + $0x68] sm:$0xff] }
 0x4d4   : > { %3102 = vadd.xlane.f32.xlu0 %v3101_v15  ;;  %3099 = vadd.xlane.f32.xlu2 %v3098_v30  ;;  %v3185_v30 = vld [vmem:[%s4147_s28 + $0x78] sm:$0xff] }
 0x4d9   : > { %v3209_v47 = vpop.permute.xlu1 %3208 }
 0x4da   : > { %v3237_v22 = vsel %vm762_vm9, %v5147_v61, %v3209_v47 }
 0x4dc   : > { %3108 = vadd.xlane.f32.xlu0 %v3107_v11  ;;  %3105 = vadd.xlane.f32.xlu2 %v3104_v25 }
 0x4f0   : > { %3222 = vrot.lane.b32.xlu0 %v3180_v28, %s4059_s18  ;;  %v3236_v28 = vsel %vm762_vm9, %v5145_v5, %v5147_v61 }
 0x4f4   : > { %3218 = vrot.lane.b32.xlu2 %v3178_v57, %s4059_s18 }
 0x4fc   : > { %3224 = vrot.lane.b32.xlu2 %v3181_v24, %s4059_s18  ;;  %v3235_v24 = vsel %vm762_vm9, %v3203_v56, %v5145_v5 }
 0x547   : > { %v3100_v13 = vpop.xlane.xlu2 %3099  ;;  %v3103_v37 = vpop.xlane.xlu0 %3102 }
 0x548   : > { %v3114_v18 = vadd.f32 %v3110_v3, %v3100_v13  ;;  %v3115_v39 = vadd.f32 %v3111_v34, %v3103_v37  ;;  %v3215_v37 = vpop.permute.xlu1 %3214 }
 0x54a   : > { %v3118_v20 = vsub.f32 0.0, %v3114_v18  ;;  %v3119_v23 = vsub.f32 0.0, %v3115_v39 }
 0x54c   : > { %v3122_v6 = vmul.f32 1.442695, %v3118_v20  ;;  %v3124_v44 = vmul.f32 1.442695, %v3119_v23 }
 0x54e   : > { %4028 = vpow2.f32 %v3122_v6 }
 0x54f   : > { %4030 = vpow2.f32 %v3124_v44  ;;  %v3106_v41 = vpop.xlane.xlu2 %3105  ;;  %v3109_v38 = vpop.xlane.xlu0 %3108 }
 0x550   : > { %v3116_v31 = vadd.f32 %v3112_v27, %v3106_v41  ;;  %v3117_v32 = vadd.f32 %v3113_v26, %v3109_v38  ;;  %v3221_v39 = vpop.permute.xlu1 %3220  ;;  %v3238_v41 = vsel %vm762_vm9, %v5149_v59, %v5194_v21  ;;  %v3239_v38 = vsel %vm762_vm9, %v5194_v21, %v3215_v37 }
 0x552   : > { %v3120_v2 = vsub.f32 0.0, %v3116_v31  ;;  %v3121_v16 = vsub.f32 0.0, %v3117_v32  ;;  %v3240_v31 = vsel %vm762_vm9, %v3215_v37, %v5196_v12 }
 0x554   : > { %v4029_v46 = vpop.eup %4028  ;;  %v3126_v51 = vmul.f32 1.442695, %v3120_v2  ;;  %v3128_v43 = vmul.f32 1.442695, %v3121_v16 }
 0x555   : > { %v4031_v8 = vpop.eup %4030  ;;  %v3130_v10 = vadd.f32 1.0, %v4029_v46 }
 0x556   : > { %v3131_v33 = vadd.f32 1.0, %v4031_v8  ;;  %4032 = vpow2.f32 %v3126_v51 }
 0x557   : > { %4034 = vrcp.f32 %v3130_v10  ;;  %v3219_v48 = vpop.permute.xlu2 %3218 }
 0x558   : > { %4036 = vrcp.f32 %v3131_v33  ;;  %v3227_v23 = vpop.permute.xlu1 %3226  ;;  %v3241_v33 = vsel %vm762_vm9, %v3219_v48, %v3221_v39 }
 0x559   : > { %4038 = vpow2.f32 %v3128_v43 }
 0x55c   : > { %v4033_v52 = vpop.eup %4032 }
 0x55d   : > { %v4035_v40 = vpop.eup %4034  ;;  %v3132_v53 = vadd.f32 1.0, %v4033_v52 }
 0x55e   : > { %v4037_v45 = vpop.eup %4036  ;;  %3140 = vperm.xlu2 %4025, %v4035_v40  }
 0x55f   : > { %4040 = vrcp.f32 %v3132_v53  ;;  %3145 = vperm.xlu0 %4026, %v4037_v45   ;;  %v4039_v42 = vpop.eup %4038  ;;  %v3225_v58 = vpop.permute.xlu2 %3224 }
 0x560   : > { %v3133_v36 = vadd.f32 1.0, %v4039_v42 }
 0x562   : > { %4042 = vrcp.f32 %v3133_v36  ;;  %v3223_v20 = vpop.permute.xlu0 %3222 }
 0x563   : > { %v3243_v59 = vsel %vm762_vm9, %v3223_v20, %v3225_v58  ;;  %v3242_v43 = vsel %vm762_vm9, %v3221_v39, %v3223_v20 }
 0x565   : > { %v4041_v19 = vpop.eup %4040 }
 0x566   : > { %3150 = vperm.xlu1 %4024, %v4041_v19   ;;  %3230 = vrot.lane.b32.xlu2 %v3184_v1, %s4059_s18 }
 0x567   : > { %3228 = vrot.lane.b32.xlu0 %v3183_v29, %s4059_s18 }
 0x568   : > { %v4043_v15 = vpop.eup %4042 }
 0x56e   : > { %3155 = vperm.xlu1 %4024, %v4043_v15  }
 0x576   : > { %3232 = vrot.lane.b32.xlu1 %v3185_v30, %s4059_s18  ;;  %s5232_s18 = scalar_lea.vmem %s5294_s12, %s4005_s19 }
 0x5b8   : > { %v3141_v11 = vpop.permute.xlu2 %3140 }
 0x5b9   : > { %v3158_v25 = vmul.f32 %v3141_v11, %v5088_v54  ;;  %v3159_v57 = vmul.f32 %v3141_v11, %v5085_v55  ;;  %v3160_v0 = vmul.f32 %v3141_v11, %v5091_v62 }
 0x5bb   : > { %v3259_v3 = vadd.f32 %v3235_v24, %v3158_v25  ;;  %v3260_v34 = vadd.f32 %v3236_v28, %v3159_v57  ;;  %v3261_v13 = vadd.f32 %v3237_v22, %v3160_v0 }
 0x5bd   : > { %vm3271_vm2 = vcmp.gt.f32.partialorder %v3259_v3, 0.0  ;;  %vm3272_vm3 = vcmp.gt.f32.partialorder %v3260_v34, 0.0  ;;  %vm3273_vm4 = vcmp.gt.f32.partialorder %v3261_v13, 0.0  ;;  %v3283_v55 = vmul.f32 %v3259_v3, %v4567_v35 }
 0x5be   : > { %v3284_v54 = vmul.f32 %v3260_v34, %v4567_v35  ;;  %v3285_v62 = vmul.f32 %v3261_v13, %v4567_v35 }
 0x5bf   : > { %v3295_v5 = vsel %vm3271_vm2, %v3259_v3, %v3283_v55 }
 0x5c0   : > { %v3296_v61 = vsel %vm3272_vm3, %v3260_v34, %v3284_v54  ;;  %v3297_v18 = vsel %vm3273_vm4, %v3261_v13, %v3285_v62  ;;  %3307 = vst [vmem:[%s5232_s18] sm:$0xff] %v3295_v5  ;;  %v3231_v42 = vpop.permute.xlu2 %3230 }
 0x5c1   : > { %3308 = vst [vmem:[%s5232_s18 + $0x8] sm:$0xff] %v3296_v61 }
 0x5c2   : > { %3309 = vst [vmem:[%s5232_s18 + $0x10] sm:$0xff] %v3297_v18 }
 0x5d1   : > { %v3146_v6 = vpop.permute.xlu0 %3145 }
 0x5d2   : > { %v3161_v44 = vmul.f32 %v3146_v6, %v5100_v17  ;;  %v3162_v27 = vmul.f32 %v3146_v6, %v5097_v9  ;;  %v3163_v26 = vmul.f32 %v3146_v6, %v5103_v63 }
 0x5d4   : > { %v3262_v32 = vadd.f32 %v3238_v41, %v3161_v44  ;;  %v3263_v2 = vadd.f32 %v3239_v38, %v3162_v27  ;;  %v3264_v16 = vadd.f32 %v3240_v31, %v3163_v26 }
 0x5d6   : > { %vm3274_vm5 = vcmp.gt.f32.partialorder %v3262_v32, 0.0  ;;  %vm3275_vm6 = vcmp.gt.f32.partialorder %v3263_v2, 0.0  ;;  %vm3276_vm7 = vcmp.gt.f32.partialorder %v3264_v16, 0.0  ;;  %v3286_v9 = vmul.f32 %v3262_v32, %v4567_v35 }
 0x5d7   : > { %v3287_v17 = vmul.f32 %v3263_v2, %v4567_v35  ;;  %v3288_v63 = vmul.f32 %v3264_v16, %v4567_v35 }
 0x5d8   : > { %v3298_v21 = vsel %vm3274_vm5, %v3262_v32, %v3286_v9  ;;  %v3151_v46 = vpop.permute.xlu1 %3150 }
 0x5d9   : > { %v3299_v51 = vsel %vm3275_vm6, %v3263_v2, %v3287_v17  ;;  %v3300_v12 = vsel %vm3276_vm7, %v3264_v16, %v3288_v63  ;;  %3310 = vst [vmem:[%s5232_s18 + $0x18] sm:$0xff] %v3298_v21  ;;  %v3164_v8 = vmul.f32 %v3151_v46, %v5113_v49  ;;  %v3165_v10 = vmul.f32 %v3151_v46, %v5110_v7 }
 0x5da   : > { %3311 = vst [vmem:[%s5232_s18 + $0x20] sm:$0xff] %v3299_v51  ;;  %v3166_v52 = vmul.f32 %v3151_v46, %v5119_v50  ;;  %v3229_v50 = vpop.permute.xlu0 %3228 }
 0x5db   : > { %3312 = vst [vmem:[%s5232_s18 + $0x28] sm:$0xff] %v3300_v12  ;;  %v3265_v40 = vadd.f32 %v3241_v33, %v3164_v8  ;;  %v3266_v53 = vadd.f32 %v3242_v43, %v3165_v10  ;;  %v3245_v30 = vsel %vm762_vm9, %v3229_v50, %v3231_v42  ;;  %v3244_v58 = vsel %vm762_vm9, %v3227_v23, %v3229_v50 }
 0x5dc   : > { %v3267_v45 = vadd.f32 %v3243_v59, %v3166_v52 }
 0x5dd   : > { %vm3277_vm8 = vcmp.gt.f32.partialorder %v3265_v40, 0.0  ;;  %vm3278_vm12 = vcmp.gt.f32.partialorder %v3266_v53, 0.0  ;;  %v3289_v49 = vmul.f32 %v3265_v40, %v4567_v35  ;;  %v3290_v7 = vmul.f32 %v3266_v53, %v4567_v35 }
 0x5de   : > { %vm3279_vm13 = vcmp.gt.f32.partialorder %v3267_v45, 0.0  ;;  %v3291_v36 = vmul.f32 %v3267_v45, %v4567_v35 }
 0x5df   : > { %v3301_v1 = vsel %vm3277_vm8, %v3265_v40, %v3289_v49  ;;  %v3302_v29 = vsel %vm3278_vm12, %v3266_v53, %v3290_v7 }
 0x5e0   : > { %v3303_v19 = vsel %vm3279_vm13, %v3267_v45, %v3291_v36  ;;  %3313 = vst [vmem:[%s5232_s18 + $0x30] sm:$0xff] %v3301_v1  ;;  %v3156_v15 = vpop.permute.xlu1 %3155 }
 0x5e1   : > { %3314 = vst [vmem:[%s5232_s18 + $0x38] sm:$0xff] %v3302_v29  ;;  %v3167_v48 = vmul.f32 %v3156_v15, %v5127_v4  ;;  %v3168_v56 = vmul.f32 %v3156_v15, %v5124_v60  ;;  %v3169_v24 = vmul.f32 %v3156_v15, %v5132_v14 }
 0x5e2   : > { %3315 = vst [vmem:[%s5232_s18 + $0x40] sm:$0xff] %v3303_v19 }
 0x5e3   : > { %v3268_v47 = vadd.f32 %v3244_v58, %v3167_v48  ;;  %v3269_v11 = vadd.f32 %v3245_v30, %v3168_v56 }
 0x5e5   : > { %vm3280_vm14 = vcmp.gt.f32.partialorder %v3268_v47, 0.0  ;;  %v3292_v25 = vmul.f32 %v3268_v47, %v4567_v35  ;;  %vm3281_vm15 = vcmp.gt.f32.partialorder %v3269_v11, 0.0  ;;  %v3293_v57 = vmul.f32 %v3269_v11, %v4567_v35 }
 0x5e7   : > { %v3304_v0 = vsel %vm3280_vm14, %v3268_v47, %v3292_v25  ;;  %v3305_v28 = vsel %vm3281_vm15, %v3269_v11, %v3293_v57 }
 0x5e8   : > { %3316 = vst [vmem:[%s5232_s18 + $0x48] sm:$0xff] %v3304_v0  ;;  %v3233_v4 = vpop.permute.xlu1 %3232 }
 0x5e9   : > { %3317 = vst [vmem:[%s5232_s18 + $0x50] sm:$0xff] %v3305_v28  ;;  %v3246_v60 = vsel %vm762_vm9, %v3231_v42, %v3233_v4 }
 0x5ea   : > { %v3270_v22 = vadd.f32 %v3246_v60, %v3169_v24 }
 0x5ec   : > { %vm3282_vm10 = vcmp.gt.f32.partialorder %v3270_v22, 0.0  ;;  %v3294_v3 = vmul.f32 %v3270_v22, %v4567_v35 }
 0x5ee   : > { %v3306_v34 = vsel %vm3282_vm10, %v3270_v22, %v3294_v3 }
 0x5ef   : > { %3318 = vst [vmem:[%s5232_s18 + $0x58] sm:$0xff] %v3306_v34 }
 0x5f0 PF: > { %s26_s25 = sadd.s32 1, %s4050_s25  }
 0x5f1   : > { %p23_p4 = scmp.ge.s32.totalorder %s26_s25, 4  }
 0x5f3   :  { %25 = sbr.rel (!%p23_p4) target bundleno = 4 (0x4), region = 98 }

</bundles_post_ra>
